<compile_context>
chip_gen: v6e
topology: v6e:2x2x1
jax: 0.10.0
libtpu: 0.0.40
codegen_flags: <defaults>
</compile_context>

<pallas_src>
from collections import Counter

import jax
import jax.numpy as jnp
from jax import lax
from jax.experimental import pallas as pl
from jax.experimental.pallas import tpu as pltpu


# ----------------------------------------------------------------------------
# Synthetic "dictionary" (stand-in for the fairseq dictionary used in __init__)
# ----------------------------------------------------------------------------
class SimpleDictionary:
    def __init__(self, words):
        self._specials = ["<pad>", "<bos>", "<eos>", "<unk>"]
        self.symbols = self._specials + list(words)
        self.nspecial = len(self._specials)
        self.pad_index = 0


def to_ngram(word, n=4):
    ngrams = []
    for l in range(1, min(n + 1, len(word) + 1)):
        for start, end in zip(range(len(word)), range(l, len(word) + 1)):
            ngrams.append(word[start:end])
    return ngrams


def _round_up(x, m):
    return ((x + m - 1) // m) * m


# ----------------------------------------------------------------------------
# Pallas kernel 1: fused emb_weight builder
#   tanh -> matmul(lang, latent^T) -> softmax -> matmul(dist, latent) -> add
#   + special rows written into block 0 (replaces the torch.cat)
# ----------------------------------------------------------------------------
def _make_sde_kernel(nspecial):
    def kernel(special_ref, bag_ref, lat_ref, out_ref):
        # bag_ref:     (tile_v, dim) f32 summed ngram embs (rows shifted by nspecial)
        # lat_ref:     (latent, dim) bf16 latent matrix (cast hoisted to wrapper)
        # special_ref: (nspecial, dim) f32
        # out_ref:     (tile_v, dim) f32 slice of the final emb_weight table
        lang = jnp.tanh(bag_ref[...])                       # f32
        lat_bf = lat_ref[...]                               # already bf16 (hoisted)

        # latent_scores = lang @ latent_mat^T   (bf16 MXU inputs, f32 accum)
        scores = lax.dot_general(
            lang.astype(jnp.bfloat16), lat_bf,
            (((1,), (1,)), ((), ())),
            preferred_element_type=jnp.float32,
        )                                                   # (tile_v, latent) f32

        # softmax over the latent axis; reciprocal on the EUP slot
        m = jnp.max(scores, axis=-1, keepdims=True)
        e = jnp.exp(scores - m)
        denom = jnp.sum(e, axis=-1, keepdims=True)
        dist = e * pl.reciprocal(denom, approx=True)

        # latent_emb = dist @ latent_mat ; token_emb = lang + latent_emb
        latent_emb = jnp.dot(
            dist.astype(jnp.bfloat16), lat_bf, preferred_element_type=jnp.float32
        )                                                   # (tile_v, dim) f32
        out_ref[...] = lang + latent_emb

        # Block 0 also carries the special-token rows of emb_weight.
        @pl.when(pl.program_id(0) == 0)
        def _():
            out_ref[0:nspecial, :] = special_ref[...]

    return kernel


def compute_emb_weight(special_emb, bag_full, latent_bf16, *, tile_v):
    """bag_full is already laid out as the padded emb_weight table:
       rows [0, nspecial) zero (overwritten with special_emb),
       rows [nspecial, nspecial+n_words) ngram-bag sums, rest padding."""
    v_pad, dim = bag_full.shape
    latent = latent_bf16.shape[0]
    nspecial = special_emb.shape[0]
    assert v_pad % tile_v == 0 and nspecial <= tile_v
    # NOTE: the latent / special blocks are constant-index (stay resident, one
    # DMA).  pipeline_mode=pl.Buffered(1) would shave their second buffer
    # (~66 KiB here) — skipped as negligible at latent=256.
    return pl.pallas_call(
        _make_sde_kernel(nspecial),
        out_shape=jax.ShapeDtypeStruct((v_pad, dim), jnp.float32),
        grid=(v_pad // tile_v,),
        in_specs=[
            pl.BlockSpec((nspecial, dim), lambda i: (0, 0)),
            pl.BlockSpec((tile_v, dim), lambda i: (i, 0)),
            pl.BlockSpec((latent, dim), lambda i: (0, 0)),
        ],
        out_specs=pl.BlockSpec((tile_v, dim), lambda i: (i, 0)),
        compiler_params=pltpu.CompilerParams(dimension_semantics=("parallel",)),
    )(special_emb, bag_full, latent_bf16)


# ----------------------------------------------------------------------------
# Pallas kernel 2: embedding lookup as a double-buffered DMA row gather
# ----------------------------------------------------------------------------
def _make_gather_kernel(tile_n, n_inner):
    def kernel(ids_ref, emb_hbm, out_ref, buf, sem):
        # ids_ref: (N_pad,) int32 in SMEM (scalar prefetch)
        # emb_hbm: (V_pad, dim) table left in HBM (memory_space=pl.ANY)
        # out_ref: (tile_n, dim) VMEM output block
        # buf:     (2, tile_n, dim) VMEM double buffer
        # sem:     (2,) DMA semaphores, one per slot (counted waits, not 1/row)
        j = pl.program_id(1)
        step = pl.program_id(0) * n_inner + j

        def issue(s, slot):
            base = s * tile_n
            for t in range(tile_n):
                pltpu.make_async_copy(
                    emb_hbm.at[ids_ref[base + t]], buf.at[slot, t], sem.at[slot]
                ).start()

        # Prime the pipeline at the start of every inner sweep (works under
        # megacore: the outer "parallel" axis is split across cores, the inner
        # "arbitrary" axis runs sequentially per core, so j==0 always fires
        # before any wait on that core).
        @pl.when(j == 0)
        def _():
            issue(step, 0)

        # Keep the NEXT inner step's row fetches in flight while this step's
        # land (cross-step DMA overlap).
        @pl.when(j + 1 < n_inner)
        def _():
            issue(step + 1, (j + 1) % 2)

        slot = j % 2
        # Counted waits on the shared per-slot semaphore (one per in-flight row).
        for t in range(tile_n):
            pltpu.make_async_copy(
                emb_hbm.at[0], buf.at[slot, t], sem.at[slot]
            ).wait()
        out_ref[...] = buf[slot]   # slot fully landed before the block writeback

    return kernel


def embedding_lookup(flat_ids, emb_table, *, tile_n=128, inner_steps=8):
    """Gather rows of emb_table at flat_ids.  O(N*dim) DMA bytes; table never
    enters VMEM in full (safe for large vocabularies / v7x 64 MiB VMEM)."""
    # TODO(synk): on v5e/v6e (128 MiB VMEM) a VMEM-resident table gather
    # (constant-index full-table BlockSpec + on-chip gather) would avoid the
    # per-row HBM DMAs entirely for small vocabularies; kept the HBM path as
    # the portable default.
    n = flat_ids.shape[0]
    v, dim = emb_table.shape
    tile = min(tile_n, max(8, _round_up(n, 8)))
    steps = -(-n // tile)
    n_inner = max(1, min(inner_steps, steps))
    n_outer = -(-steps // n_inner)
    n_pad = n_outer * n_inner * tile
    ids = jnp.clip(flat_ids.astype(jnp.int32), 0, v - 1)
    ids = jnp.pad(ids, (0, n_pad - n))       # pad tokens gather row 0 (discarded)
    out = pl.pallas_call(
        _make_gather_kernel(tile, n_inner),
        out_shape=jax.ShapeDtypeStruct((n_pad, dim), emb_table.dtype),
        grid_spec=pltpu.PrefetchScalarGridSpec(
            num_scalar_prefetch=1,
            grid=(n_outer, n_inner),
            in_specs=[pl.BlockSpec(memory_space=pl.ANY)],
            out_specs=pl.BlockSpec(
                (tile, dim), lambda i, j, ids: (i * n_inner + j, 0)
            ),
            scratch_shapes=[
                pltpu.VMEM((2, tile, dim), emb_table.dtype),
                pltpu.SemaphoreType.DMA((2,)),
            ],
        ),
        compiler_params=pltpu.CompilerParams(
            dimension_semantics=("parallel", "arbitrary")),
    )(ids, emb_table)
    return out[:n]


# ----------------------------------------------------------------------------
# Full forward (mirrors precalcSDE.forward; do_layer_norm=False default -> no LN)
# ----------------------------------------------------------------------------
def precalc_sde_forward(x, params, ngram_ids, ngram_word_idx, n_words,
                        lang_pair=None, *, tile_v=1024, tile_n=128):
    ngram_emb_w = params["ngram_emb_weight"]   # (n_ngram_vocab, dim)
    latent_mat = params["latent_mat"]          # (latent, dim)
    special_emb = params["special_emb"]        # (nspecial, dim), pad row zeroed
    dim = ngram_emb_w.shape[1]
    nspecial = special_emb.shape[0]
    v_total = nspecial + n_words

    # Cap tile_v so tiny vocabularies don't compute padding rows; 1024 keeps
    # kernel-1 VMEM (~6 MiB) inside v5e's 16 MiB scoped default.  Raise
    # vmem_limit_bytes if you go above 1024 on v5e.
    tile_v_eff = min(tile_v, _round_up(v_total, 256))
    v_pad = _round_up(v_total, tile_v_eff)

    # EmbeddingBag(mode='sum'): ragged segment-sum of ngram embeddings per word,
    # scattered directly into the (padded, nspecial-shifted) emb_weight layout.
    # TODO(synk): ragged EmbeddingBag gather/segment-sum kept in plain JAX
    # (data-dependent ragged indexing).
    gathered = ngram_emb_w[ngram_ids]                                   # (N_ngrams, dim)
    bag_full = jnp.zeros((v_pad, dim), jnp.float32).at[
        ngram_word_idx + nspecial
    ].add(gathered)

    # Loop-invariant cast hoisted out of the kernel (was re-run every grid step).
    latent_bf16 = latent_mat.astype(jnp.bfloat16)

    # Hot path: fused tanh + latent-softmax mixing + special rows -> emb_weight.
    emb_weight_padded = compute_emb_weight(
        special_emb, bag_full, latent_bf16, tile_v=tile_v_eff
    )                                                                   # (v_pad, dim)

    # sde_emb = embedding(x, emb_weight) — double-buffered DMA row gather.
    flat_ids = jnp.clip(x.reshape(-1).astype(jnp.int32), 0, v_total - 1)
    flat = embedding_lookup(flat_ids, emb_weight_padded, tile_n=tile_n)  # (B*T, dim)
    sde_emb = flat.reshape(x.shape + (dim,))

    # API-compat view of self.sde_weight (off the hot path; gather reads the padded table).
    emb_weight = emb_weight_padded[:v_total]
    return sde_emb, emb_weight


if __name__ == "__main__":
    # --- module hyper-parameters (small, consistent with defaults) ---
    n = 4
    threshold = 64
    dim = 128
    latent = 256

    words = [
        "hello", "world", "kernel", "pallas", "tensor", "matrix", "vector", "lang",
        "token", "embed", "latent", "score", "batch", "model", "layer", "train",
    ]
    dictionary = SimpleDictionary(words)
    pad_idx = dictionary.pad_index
    nspecial = dictionary.nspecial

    # --- replicate __init__ ngram bookkeeping ---
    word_vocab = dictionary.symbols[dictionary.nspecial:]
    word_ngrams = [to_ngram(w, n=n) for w in word_vocab]
    all_ngrams = Counter(sum(word_ngrams, []))
    top_ngrams = all_ngrams.most_common(threshold)
    top_ngrams_symbols = [t[0] for t in top_ngrams]
    ngram_to_id = {s: i + 1 for i, s in enumerate(top_ngrams_symbols)}
    UNK_ID = 0
    ngram_to_id["<UNK>"] = UNK_ID
    ngrams_id = [[ngram_to_id.get(w, UNK_ID) for w in ww] for ww in word_ngrams]
    ngram_ids_list, word_idx_list = [], []
    for wi, ids in enumerate(ngrams_id):
        ngram_ids_list.extend(ids)
        word_idx_list.extend([wi] * len(ids))
    ngram_ids = jnp.asarray(ngram_ids_list, jnp.int32)
    ngram_word_idx = jnp.asarray(word_idx_list, jnp.int32)
    n_words = len(word_vocab)
    n_ngram_vocab = len(ngram_to_id)

    # --- deterministic parameter init (matching nn.init.normal_ semantics) ---
    key = jax.random.PRNGKey(0)
    k1, k2, k3, k4 = jax.random.split(key, 4)
    ngram_emb_weight = jax.random.normal(k1, (n_ngram_vocab, dim), jnp.float32) * dim ** (-0.5)
    latent_mat = jax.random.normal(k2, (latent, dim), jnp.float32) * latent ** (-0.5)
    special_emb = jax.random.normal(k3, (nspecial, dim), jnp.float32) * dim ** (-0.5)
    special_emb = special_emb.at[pad_idx].set(0.0)
    params = {
        "ngram_emb_weight": ngram_emb_weight,
        "latent_mat": latent_mat,
        "special_emb": special_emb,
    }

    # --- example input: token ids, batch=2, seq=8 ---
    B, T = 2, 8
    x = jax.random.randint(k4, (B, T), 0, nspecial + n_words, dtype=jnp.int32)
    x = x.at[0, 0].set(pad_idx)  # exercise the padding row (zeros)

    fwd = jax.jit(
        lambda xx: precalc_sde_forward(xx, params, ngram_ids, ngram_word_idx, n_words)
    )
    sde_emb, emb_weight = fwd(x)
    sde_emb = jax.block_until_ready(sde_emb)
    emb_weight = jax.block_until_ready(emb_weight)

    # --- pure-JAX f32 reference check (bf16 MXU inputs -> loosened tolerance) ---
    bag_ref = jnp.zeros((n_words, dim), jnp.float32).at[ngram_word_idx].add(
        ngram_emb_weight[ngram_ids]
    )
    lang_ref = jnp.tanh(bag_ref)
    scores_ref = lang_ref @ latent_mat.T
    dist_ref = jax.nn.softmax(scores_ref, axis=-1)
    token_emb_ref = lang_ref + dist_ref @ latent_mat
    emb_weight_ref = jnp.concatenate([special_emb, token_emb_ref], axis=0)
    sde_ref = emb_weight_ref[x]

    assert emb_weight.shape == emb_weight_ref.shape
    assert jnp.allclose(emb_weight, emb_weight_ref, atol=1e-2, rtol=1e-2), "emb_weight mismatch"
    assert jnp.allclose(sde_emb, sde_ref, atol=1e-2, rtol=1e-2), "mismatch vs reference"
    assert jnp.allclose(sde_emb[0, 0], 0.0), "padding row should be zeros"
    print("KERNEL_OK")
</pallas_src>

<mosaic_0001>
module attributes {stable_mosaic.version = 11 : i64} {
  func.func @kernel(%arg0: i32, %arg1: memref<4x128xf32, #tpu.memory_space<vmem>>, %arg2: memref<256x128xf32, #tpu.memory_space<vmem>>, %arg3: memref<256x128xbf16, #tpu.memory_space<vmem>>, %arg4: memref<256x128xf32, #tpu.memory_space<vmem>>) attributes {dimension_semantics = [#tpu.dimension_semantics<parallel>], iteration_bounds = array<i64: 1>, scalar_prefetch = 0 : i64, scratch_operands = 0 : i64, tpu.core_type = #tpu.core_type<tc>, window_params = [{pipeline_mode = #tpu.pipeline_mode<synchronous>, transform_indices = @transform_0, window_bounds = array<i64: 4, 128>}, {transform_indices = @transform_1, window_bounds = array<i64: 256, 128>}, {pipeline_mode = #tpu.pipeline_mode<synchronous>, transform_indices = @transform_2, window_bounds = array<i64: 256, 128>}, {transform_indices = @transform_3, window_bounds = array<i64: 256, 128>}]} {
    %c0 = arith.constant 0 : index
    %c0_0 = arith.constant 0 : index
    %0 = vector.load %arg2[%c0, %c0_0] : memref<256x128xf32, #tpu.memory_space<vmem>>, vector<256x128xf32>
    %1 = math.tanh %0 : vector<256x128xf32>
    %c0_1 = arith.constant 0 : index
    %c0_2 = arith.constant 0 : index
    %2 = vector.load %arg3[%c0_1, %c0_2] : memref<256x128xbf16, #tpu.memory_space<vmem>>, vector<256x128xbf16>
    %3 = arith.truncf %1 : vector<256x128xf32> to vector<256x128xbf16>
    %cst = arith.constant dense<0.000000e+00> : vector<256x256xf32>
    %4 = tpu.matmul %3, %2, %cst {dimension_numbers = #tpu.dot_dimension_numbers<[1], [1], [0], [0], [0, 0, 1, 0], [], []>} : vector<256x128xbf16>, vector<256x128xbf16>, vector<256x256xf32> -> vector<256x256xf32>
    %cst_3 = arith.constant dense<0xFF800000> : vector<256xf32>
    %5 = vector.multi_reduction <maximumf>, %4, %cst_3 [1] : vector<256x256xf32> to vector<256xf32>
    %6 = vector.shape_cast %5 : vector<256xf32> to vector<256x1xf32>
    %7 = vector.broadcast %6 : vector<256x1xf32> to vector<256x256xf32>
    %8 = arith.subf %4, %7 : vector<256x256xf32>
    %9 = math.exp %8 : vector<256x256xf32>
    %cst_4 = arith.constant dense<0.000000e+00> : vector<256xf32>
    %10 = vector.multi_reduction <add>, %9, %cst_4 [1] : vector<256x256xf32> to vector<256xf32>
    %11 = vector.shape_cast %10 : vector<256xf32> to vector<256x1xf32>
    %12 = tpu.reciprocal %11 {approx = true} : vector<256x1xf32> -> vector<256x1xf32>
    %13 = vector.broadcast %12 : vector<256x1xf32> to vector<256x256xf32>
    %14 = arith.mulf %9, %13 : vector<256x256xf32>
    %15 = arith.truncf %14 : vector<256x256xf32> to vector<256x256xbf16>
    %cst_5 = arith.constant dense<0.000000e+00> : vector<256x128xf32>
    %16 = tpu.matmul %15, %2, %cst_5 {dimension_numbers = #tpu.dot_dimension_numbers<[1], [0], [0], [1], [0, 0, 1, 1], [], []>} : vector<256x256xbf16>, vector<256x128xbf16>, vector<256x128xf32> -> vector<256x128xf32>
    %17 = arith.addf %1, %16 : vector<256x128xf32>
    %c0_6 = arith.constant 0 : index
    %c0_7 = arith.constant 0 : index
    %18 = vector.load %arg4[%c0_6, %c0_7] : memref<256x128xf32, #tpu.memory_space<vmem>>, vector<256x128xf32>
    tpu.vector_store %arg4[%c0_6, %c0_7], %17 {strides = array<i32>} : memref<256x128xf32, #tpu.memory_space<vmem>>, vector<256x128xf32>,
    %c0_i32 = arith.constant 0 : i32
    %19 = arith.cmpi eq, %arg0, %c0_i32 : i32
    %20 = arith.extui %19 : i1 to i32
    %c0_i32_8 = arith.constant 0 : i32
    %21 = arith.cmpi ne, %20, %c0_i32_8 : i32
    scf.if %21 {
      %c0_9 = arith.constant 0 : index
      %c0_10 = arith.constant 0 : index
      %22 = vector.load %arg1[%c0_9, %c0_10] : memref<4x128xf32, #tpu.memory_space<vmem>>, vector<4x128xf32>
      %c0_11 = arith.constant 0 : index
      %c0_12 = arith.constant 0 : index
      %23 = vector.load %arg4[%c0_11, %c0_12] : memref<256x128xf32, #tpu.memory_space<vmem>>, vector<4x128xf32>
      tpu.vector_store %arg4[%c0_11, %c0_12], %22 {strides = array<i32>} : memref<256x128xf32, #tpu.memory_space<vmem>>, vector<4x128xf32>,
    } else {
    }
    return
  }
  func.func @transform_0(%arg0: i32) -> (i32, i32) {
    %c0_i32 = arith.constant 0 : i32
    %c0_i32_0 = arith.constant 0 : i32
    %c0_i32_1 = arith.constant 0 : i32
    return %c0_i32, %c0_i32_0 : i32, i32
  }
  func.func @transform_1(%arg0: i32) -> (i32, i32) {
    %c0_i32 = arith.constant 0 : i32
    %c0_i32_0 = arith.constant 0 : i32
    return %arg0, %c0_i32 : i32, i32
  }
  func.func @transform_2(%arg0: i32) -> (i32, i32) {
    %c0_i32 = arith.constant 0 : i32
    %c0_i32_0 = arith.constant 0 : i32
    %c0_i32_1 = arith.constant 0 : i32
    return %c0_i32, %c0_i32_0 : i32, i32
  }
  func.func @transform_3(%arg0: i32) -> (i32, i32) {
    %c0_i32 = arith.constant 0 : i32
    %c0_i32_0 = arith.constant 0 : i32
    return %arg0, %c0_i32 : i32, i32
  }
}

module attributes {stable_mosaic.version = 11 : i64} {
  func.func @kernel(%arg0: i32, %arg1: i32, %arg2: memref<16xi32, #tpu.memory_space<smem>>, %arg3: memref<256x128xf32, #tpu.memory_space<any>>, %arg4: memref<16x128xf32, #tpu.memory_space<vmem>>, %arg5: memref<2x16x128xf32, #tpu.memory_space<vmem>>, %arg6: memref<2x!tpu.dma_semaphore, #tpu.memory_space<semaphore_mem>>) attributes {dimension_semantics = [#tpu.dimension_semantics<parallel>, #tpu.dimension_semantics<arbitrary>], iteration_bounds = array<i64: 1, 1>, scalar_prefetch = 1 : i64, scratch_operands = 2 : i64, tpu.core_type = #tpu.core_type<tc>, window_params = [{}, {transform_indices = @transform_1, window_bounds = array<i64: 16, 128>}]} {
    %c1_i32 = arith.constant 1 : i32
    %0 = arith.muli %arg0, %c1_i32 : i32
    %1 = arith.addi %0, %arg1 : i32
    %c0_i32 = arith.constant 0 : i32
    %2 = arith.cmpi eq, %arg1, %c0_i32 : i32
    %3 = arith.extui %2 : i1 to i32
    %c0_i32_0 = arith.constant 0 : i32
    %4 = arith.cmpi ne, %3, %c0_i32_0 : i32
    scf.if %4 {
      %c16_i32 = arith.constant 16 : i32
      %119 = arith.muli %1, %c16_i32 : i32
      %c0_i32_63 = arith.constant 0 : i32
      %120 = arith.addi %119, %c0_i32_63 : i32
      %121 = arith.index_cast %120 : i32 to index
      %122 = memref.load %arg2[%121] : memref<16xi32, #tpu.memory_space<smem>>
      %c0_i32_64 = arith.constant 0 : i32
      %c0_i32_65 = arith.constant 0 : i32
      %c0_i32_66 = arith.constant 0 : i32
      %c0_i32_67 = arith.constant 0 : i32
      %123 = tpu.memref_slice %arg3[%122, %c0_i32_67] : memref<256x128xf32, #tpu.memory_space<any>> -> memref<1x128xf32, #tpu.memory_space<any>>
      %124 = tpu.memref_squeeze %123 : memref<1x128xf32, #tpu.memory_space<any>> -> memref<128xf32, #tpu.memory_space<any>>
      %c0_i32_68 = arith.constant 0 : i32
      %125 = tpu.memref_slice %arg5[%c0_i32_64, %c0_i32_65, %c0_i32_68] : memref<2x16x128xf32, #tpu.memory_space<vmem>> -> memref<1x1x128xf32, #tpu.memory_space<vmem>>
      %126 = tpu.memref_squeeze %125 : memref<1x1x128xf32, #tpu.memory_space<vmem>> -> memref<128xf32, #tpu.memory_space<vmem>>
      %127 = tpu.memref_slice %arg6[%c0_i32_66] : memref<2x!tpu.dma_semaphore, #tpu.memory_space<semaphore_mem>> -> memref<1x!tpu.dma_semaphore, #tpu.memory_space<semaphore_mem>>
      %128 = tpu.memref_squeeze %127 : memref<1x!tpu.dma_semaphore, #tpu.memory_space<semaphore_mem>> -> memref<!tpu.dma_semaphore, #tpu.memory_space<semaphore_mem>>
      tpu.enqueue_dma source(%124 : memref<128xf32, #tpu.memory_space<any>>) target(%126 : memref<128xf32, #tpu.memory_space<vmem>>) target_semaphore(%128 : memref<!tpu.dma_semaphore, #tpu.memory_space<semaphore_mem>>)
      %c1_i32_69 = arith.constant 1 : i32
      %129 = arith.addi %119, %c1_i32_69 : i32
      %130 = arith.index_cast %129 : i32 to index
      %131 = memref.load %arg2[%130] : memref<16xi32, #tpu.memory_space<smem>>
      %c0_i32_70 = arith.constant 0 : i32
      %c1_i32_71 = arith.constant 1 : i32
      %c0_i32_72 = arith.constant 0 : i32
      %c0_i32_73 = arith.constant 0 : i32
      %132 = tpu.memref_slice %arg3[%131, %c0_i32_73] : memref<256x128xf32, #tpu.memory_space<any>> -> memref<1x128xf32, #tpu.memory_space<any>>
      %133 = tpu.memref_squeeze %132 : memref<1x128xf32, #tpu.memory_space<any>> -> memref<128xf32, #tpu.memory_space<any>>
      %c0_i32_74 = arith.constant 0 : i32
      %134 = tpu.memref_slice %arg5[%c0_i32_70, %c1_i32_71, %c0_i32_74] : memref<2x16x128xf32, #tpu.memory_space<vmem>> -> memref<1x1x128xf32, #tpu.memory_space<vmem>>
      %135 = tpu.memref_squeeze %134 : memref<1x1x128xf32, #tpu.memory_space<vmem>> -> memref<128xf32, #tpu.memory_space<vmem>>
      %136 = tpu.memref_slice %arg6[%c0_i32_72] : memref<2x!tpu.dma_semaphore, #tpu.memory_space<semaphore_mem>> -> memref<1x!tpu.dma_semaphore, #tpu.memory_space<semaphore_mem>>
      %137 = tpu.memref_squeeze %136 : memref<1x!tpu.dma_semaphore, #tpu.memory_space<semaphore_mem>> -> memref<!tpu.dma_semaphore, #tpu.memory_space<semaphore_mem>>
      tpu.enqueue_dma source(%133 : memref<128xf32, #tpu.memory_space<any>>) target(%135 : memref<128xf32, #tpu.memory_space<vmem>>) target_semaphore(%137 : memref<!tpu.dma_semaphore, #tpu.memory_space<semaphore_mem>>)
      %c2_i32_75 = arith.constant 2 : i32
      %138 = arith.addi %119, %c2_i32_75 : i32
      %139 = arith.index_cast %138 : i32 to index
      %140 = memref.load %arg2[%139] : memref<16xi32, #tpu.memory_space<smem>>
      %c0_i32_76 = arith.constant 0 : i32
      %c2_i32_77 = arith.constant 2 : i32
      %c0_i32_78 = arith.constant 0 : i32
      %c0_i32_79 = arith.constant 0 : i32
      %141 = tpu.memref_slice %arg3[%140, %c0_i32_79] : memref<256x128xf32, #tpu.memory_space<any>> -> memref<1x128xf32, #tpu.memory_space<any>>
      %142 = tpu.memref_squeeze %141 : memref<1x128xf32, #tpu.memory_space<any>> -> memref<128xf32, #tpu.memory_space<any>>
      %c0_i32_80 = arith.constant 0 : i32
      %143 = tpu.memref_slice %arg5[%c0_i32_76, %c2_i32_77, %c0_i32_80] : memref<2x16x128xf32, #tpu.memory_space<vmem>> -> memref<1x1x128xf32, #tpu.memory_space<vmem>>
      %144 = tpu.memref_squeeze %143 : memref<1x1x128xf32, #tpu.memory_space<vmem>> -> memref<128xf32, #tpu.memory_space<vmem>>
      %145 = tpu.memref_slice %arg6[%c0_i32_78] : memref<2x!tpu.dma_semaphore, #tpu.memory_space<semaphore_mem>> -> memref<1x!tpu.dma_semaphore, #tpu.memory_space<semaphore_mem>>
      %146 = tpu.memref_squeeze %145 : memref<1x!tpu.dma_semaphore, #tpu.memory_space<semaphore_mem>> -> memref<!tpu.dma_semaphore, #tpu.memory_space<semaphore_mem>>
      tpu.enqueue_dma source(%142 : memref<128xf32, #tpu.memory_space<any>>) target(%144 : memref<128xf32, #tpu.memory_space<vmem>>) target_semaphore(%146 : memref<!tpu.dma_semaphore, #tpu.memory_space<semaphore_mem>>)
      %c3_i32_81 = arith.constant 3 : i32
      %147 = arith.addi %119, %c3_i32_81 : i32
      %148 = arith.index_cast %147 : i32 to index
      %149 = memref.load %arg2[%148] : memref<16xi32, #tpu.memory_space<smem>>
      %c0_i32_82 = arith.constant 0 : i32
      %c3_i32_83 = arith.constant 3 : i32
      %c0_i32_84 = arith.constant 0 : i32
      %c0_i32_85 = arith.constant 0 : i32
      %150 = tpu.memref_slice %arg3[%149, %c0_i32_85] : memref<256x128xf32, #tpu.memory_space<any>> -> memref<1x128xf32, #tpu.memory_space<any>>
      %151 = tpu.memref_squeeze %150 : memref<1x128xf32, #tpu.memory_space<any>> -> memref<128xf32, #tpu.memory_space<any>>
      %c0_i32_86 = arith.constant 0 : i32
      %152 = tpu.memref_slice %arg5[%c0_i32_82, %c3_i32_83, %c0_i32_86] : memref<2x16x128xf32, #tpu.memory_space<vmem>> -> memref<1x1x128xf32, #tpu.memory_space<vmem>>
      %153 = tpu.memref_squeeze %152 : memref<1x1x128xf32, #tpu.memory_space<vmem>> -> memref<128xf32, #tpu.memory_space<vmem>>
      %154 = tpu.memref_slice %arg6[%c0_i32_84] : memref<2x!tpu.dma_semaphore, #tpu.memory_space<semaphore_mem>> -> memref<1x!tpu.dma_semaphore, #tpu.memory_space<semaphore_mem>>
      %155 = tpu.memref_squeeze %154 : memref<1x!tpu.dma_semaphore, #tpu.memory_space<semaphore_mem>> -> memref<!tpu.dma_semaphore, #tpu.memory_space<semaphore_mem>>
      tpu.enqueue_dma source(%151 : memref<128xf32, #tpu.memory_space<any>>) target(%153 : memref<128xf32, #tpu.memory_space<vmem>>) target_semaphore(%155 : memref<!tpu.dma_semaphore, #tpu.memory_space<semaphore_mem>>)
      %c4_i32_87 = arith.constant 4 : i32
      %156 = arith.addi %119, %c4_i32_87 : i32
      %157 = arith.index_cast %156 : i32 to index
      %158 = memref.load %arg2[%157] : memref<16xi32, #tpu.memory_space<smem>>
      %c0_i32_88 = arith.constant 0 : i32
      %c4_i32_89 = arith.constant 4 : i32
      %c0_i32_90 = arith.constant 0 : i32
      %c0_i32_91 = arith.constant 0 : i32
      %159 = tpu.memref_slice %arg3[%158, %c0_i32_91] : memref<256x128xf32, #tpu.memory_space<any>> -> memref<1x128xf32, #tpu.memory_space<any>>
      %160 = tpu.memref_squeeze %159 : memref<1x128xf32, #tpu.memory_space<any>> -> memref<128xf32, #tpu.memory_space<any>>
      %c0_i32_92 = arith.constant 0 : i32
      %161 = tpu.memref_slice %arg5[%c0_i32_88, %c4_i32_89, %c0_i32_92] : memref<2x16x128xf32, #tpu.memory_space<vmem>> -> memref<1x1x128xf32, #tpu.memory_space<vmem>>
      %162 = tpu.memref_squeeze %161 : memref<1x1x128xf32, #tpu.memory_space<vmem>> -> memref<128xf32, #tpu.memory_space<vmem>>
      %163 = tpu.memref_slice %arg6[%c0_i32_90] : memref<2x!tpu.dma_semaphore, #tpu.memory_space<semaphore_mem>> -> memref<1x!tpu.dma_semaphore, #tpu.memory_space<semaphore_mem>>
      %164 = tpu.memref_squeeze %163 : memref<1x!tpu.dma_semaphore, #tpu.memory_space<semaphore_mem>> -> memref<!tpu.dma_semaphore, #tpu.memory_space<semaphore_mem>>
      tpu.enqueue_dma source(%160 : memref<128xf32, #tpu.memory_space<any>>) target(%162 : memref<128xf32, #tpu.memory_space<vmem>>) target_semaphore(%164 : memref<!tpu.dma_semaphore, #tpu.memory_space<semaphore_mem>>)
      %c5_i32_93 = arith.constant 5 : i32
      %165 = arith.addi %119, %c5_i32_93 : i32
      %166 = arith.index_cast %165 : i32 to index
      %167 = memref.load %arg2[%166] : memref<16xi32, #tpu.memory_space<smem>>
      %c0_i32_94 = arith.constant 0 : i32
      %c5_i32_95 = arith.constant 5 : i32
      %c0_i32_96 = arith.constant 0 : i32
      %c0_i32_97 = arith.constant 0 : i32
      %168 = tpu.memref_slice %arg3[%167, %c0_i32_97] : memref<256x128xf32, #tpu.memory_space<any>> -> memref<1x128xf32, #tpu.memory_space<any>>
      %169 = tpu.memref_squeeze %168 : memref<1x128xf32, #tpu.memory_space<any>> -> memref<128xf32, #tpu.memory_space<any>>
      %c0_i32_98 = arith.constant 0 : i32
      %170 = tpu.memref_slice %arg5[%c0_i32_94, %c5_i32_95, %c0_i32_98] : memref<2x16x128xf32, #tpu.memory_space<vmem>> -> memref<1x1x128xf32, #tpu.memory_space<vmem>>
      %171 = tpu.memref_squeeze %170 : memref<1x1x128xf32, #tpu.memory_space<vmem>> -> memref<128xf32, #tpu.memory_space<vmem>>
      %172 = tpu.memref_slice %arg6[%c0_i32_96] : memref<2x!tpu.dma_semaphore, #tpu.memory_space<semaphore_mem>> -> memref<1x!tpu.dma_semaphore, #tpu.memory_space<semaphore_mem>>
      %173 = tpu.memref_squeeze %172 : memref<1x!tpu.dma_semaphore, #tpu.memory_space<semaphore_mem>> -> memref<!tpu.dma_semaphore, #tpu.memory_space<semaphore_mem>>
      tpu.enqueue_dma source(%169 : memref<128xf32, #tpu.memory_space<any>>) target(%171 : memref<128xf32, #tpu.memory_space<vmem>>) target_semaphore(%173 : memref<!tpu.dma_semaphore, #tpu.memory_space<semaphore_mem>>)
      %c6_i32_99 = arith.constant 6 : i32
      %174 = arith.addi %119, %c6_i32_99 : i32
      %175 = arith.index_cast %174 : i32 to index
      %176 = memref.load %arg2[%175] : memref<16xi32, #tpu.memory_space<smem>>
      %c0_i32_100 = arith.constant 0 : i32
      %c6_i32_101 = arith.constant 6 : i32
      %c0_i32_102 = arith.constant 0 : i32
      %c0_i32_103 = arith.constant 0 : i32
      %177 = tpu.memref_slice %arg3[%176, %c0_i32_103] : memref<256x128xf32, #tpu.memory_space<any>> -> memref<1x128xf32, #tpu.memory_space<any>>
      %178 = tpu.memref_squeeze %177 : memref<1x128xf32, #tpu.memory_space<any>> -> memref<128xf32, #tpu.memory_space<any>>
      %c0_i32_104 = arith.constant 0 : i32
      %179 = tpu.memref_slice %arg5[%c0_i32_100, %c6_i32_101, %c0_i32_104] : memref<2x16x128xf32, #tpu.memory_space<vmem>> -> memref<1x1x128xf32, #tpu.memory_space<vmem>>
      %180 = tpu.memref_squeeze %179 : memref<1x1x128xf32, #tpu.memory_space<vmem>> -> memref<128xf32, #tpu.memory_space<vmem>>
      %181 = tpu.memref_slice %arg6[%c0_i32_102] : memref<2x!tpu.dma_semaphore, #tpu.memory_space<semaphore_mem>> -> memref<1x!tpu.dma_semaphore, #tpu.memory_space<semaphore_mem>>
      %182 = tpu.memref_squeeze %181 : memref<1x!tpu.dma_semaphore, #tpu.memory_space<semaphore_mem>> -> memref<!tpu.dma_semaphore, #tpu.memory_space<semaphore_mem>>
      tpu.enqueue_dma source(%178 : memref<128xf32, #tpu.memory_space<any>>) target(%180 : memref<128xf32, #tpu.memory_space<vmem>>) target_semaphore(%182 : memref<!tpu.dma_semaphore, #tpu.memory_space<semaphore_mem>>)
      %c7_i32_105 = arith.constant 7 : i32
      %183 = arith.addi %119, %c7_i32_105 : i32
      %184 = arith.index_cast %183 : i32 to index
      %185 = memref.load %arg2[%184] : memref<16xi32, #tpu.memory_space<smem>>
      %c0_i32_106 = arith.constant 0 : i32
      %c7_i32_107 = arith.constant 7 : i32
      %c0_i32_108 = arith.constant 0 : i32
      %c0_i32_109 = arith.constant 0 : i32
      %186 = tpu.memref_slice %arg3[%185, %c0_i32_109] : memref<256x128xf32, #tpu.memory_space<any>> -> memref<1x128xf32, #tpu.memory_space<any>>
      %187 = tpu.memref_squeeze %186 : memref<1x128xf32, #tpu.memory_space<any>> -> memref<128xf32, #tpu.memory_space<any>>
      %c0_i32_110 = arith.constant 0 : i32
      %188 = tpu.memref_slice %arg5[%c0_i32_106, %c7_i32_107, %c0_i32_110] : memref<2x16x128xf32, #tpu.memory_space<vmem>> -> memref<1x1x128xf32, #tpu.memory_space<vmem>>
      %189 = tpu.memref_squeeze %188 : memref<1x1x128xf32, #tpu.memory_space<vmem>> -> memref<128xf32, #tpu.memory_space<vmem>>
      %190 = tpu.memref_slice %arg6[%c0_i32_108] : memref<2x!tpu.dma_semaphore, #tpu.memory_space<semaphore_mem>> -> memref<1x!tpu.dma_semaphore, #tpu.memory_space<semaphore_mem>>
      %191 = tpu.memref_squeeze %190 : memref<1x!tpu.dma_semaphore, #tpu.memory_space<semaphore_mem>> -> memref<!tpu.dma_semaphore, #tpu.memory_space<semaphore_mem>>
      tpu.enqueue_dma source(%187 : memref<128xf32, #tpu.memory_space<any>>) target(%189 : memref<128xf32, #tpu.memory_space<vmem>>) target_semaphore(%191 : memref<!tpu.dma_semaphore, #tpu.memory_space<semaphore_mem>>)
      %c8_i32_111 = arith.constant 8 : i32
      %192 = arith.addi %119, %c8_i32_111 : i32
      %193 = arith.index_cast %192 : i32 to index
      %194 = memref.load %arg2[%193] : memref<16xi32, #tpu.memory_space<smem>>
      %c0_i32_112 = arith.constant 0 : i32
      %c8_i32_113 = arith.constant 8 : i32
      %c0_i32_114 = arith.constant 0 : i32
      %c0_i32_115 = arith.constant 0 : i32
      %195 = tpu.memref_slice %arg3[%194, %c0_i32_115] : memref<256x128xf32, #tpu.memory_space<any>> -> memref<1x128xf32, #tpu.memory_space<any>>
      %196 = tpu.memref_squeeze %195 : memref<1x128xf32, #tpu.memory_space<any>> -> memref<128xf32, #tpu.memory_space<any>>
      %c0_i32_116 = arith.constant 0 : i32
      %197 = tpu.memref_slice %arg5[%c0_i32_112, %c8_i32_113, %c0_i32_116] : memref<2x16x128xf32, #tpu.memory_space<vmem>> -> memref<1x1x128xf32, #tpu.memory_space<vmem>>
      %198 = tpu.memref_squeeze %197 : memref<1x1x128xf32, #tpu.memory_space<vmem>> -> memref<128xf32, #tpu.memory_space<vmem>>
      %199 = tpu.memref_slice %arg6[%c0_i32_114] : memref<2x!tpu.dma_semaphore, #tpu.memory_space<semaphore_mem>> -> memref<1x!tpu.dma_semaphore, #tpu.memory_space<semaphore_mem>>
      %200 = tpu.memref_squeeze %199 : memref<1x!tpu.dma_semaphore, #tpu.memory_space<semaphore_mem>> -> memref<!tpu.dma_semaphore, #tpu.memory_space<semaphore_mem>>
      tpu.enqueue_dma source(%196 : memref<128xf32, #tpu.memory_space<any>>) target(%198 : memref<128xf32, #tpu.memory_space<vmem>>) target_semaphore(%200 : memref<!tpu.dma_semaphore, #tpu.memory_space<semaphore_mem>>)
      %c9_i32_117 = arith.constant 9 : i32
      %201 = arith.addi %119, %c9_i32_117 : i32
      %202 = arith.index_cast %201 : i32 to index
      %203 = memref.load %arg2[%202] : memref<16xi32, #tpu.memory_space<smem>>
      %c0_i32_118 = arith.constant 0 : i32
      %c9_i32_119 = arith.constant 9 : i32
      %c0_i32_120 = arith.constant 0 : i32
      %c0_i32_121 = arith.constant 0 : i32
      %204 = tpu.memref_slice %arg3[%203, %c0_i32_121] : memref<256x128xf32, #tpu.memory_space<any>> -> memref<1x128xf32, #tpu.memory_space<any>>
      %205 = tpu.memref_squeeze %204 : memref<1x128xf32, #tpu.memory_space<any>> -> memref<128xf32, #tpu.memory_space<any>>
      %c0_i32_122 = arith.constant 0 : i32
      %206 = tpu.memref_slice %arg5[%c0_i32_118, %c9_i32_119, %c0_i32_122] : memref<2x16x128xf32, #tpu.memory_space<vmem>> -> memref<1x1x128xf32, #tpu.memory_space<vmem>>
      %207 = tpu.memref_squeeze %206 : memref<1x1x128xf32, #tpu.memory_space<vmem>> -> memref<128xf32, #tpu.memory_space<vmem>>
      %208 = tpu.memref_slice %arg6[%c0_i32_120] : memref<2x!tpu.dma_semaphore, #tpu.memory_space<semaphore_mem>> -> memref<1x!tpu.dma_semaphore, #tpu.memory_space<semaphore_mem>>
      %209 = tpu.memref_squeeze %208 : memref<1x!tpu.dma_semaphore, #tpu.memory_space<semaphore_mem>> -> memref<!tpu.dma_semaphore, #tpu.memory_space<semaphore_mem>>
      tpu.enqueue_dma source(%205 : memref<128xf32, #tpu.memory_space<any>>) target(%207 : memref<128xf32, #tpu.memory_space<vmem>>) target_semaphore(%209 : memref<!tpu.dma_semaphore, #tpu.memory_space<semaphore_mem>>)
      %c10_i32_123 = arith.constant 10 : i32
      %210 = arith.addi %119, %c10_i32_123 : i32
      %211 = arith.index_cast %210 : i32 to index
      %212 = memref.load %arg2[%211] : memref<16xi32, #tpu.memory_space<smem>>
      %c0_i32_124 = arith.constant 0 : i32
      %c10_i32_125 = arith.constant 10 : i32
      %c0_i32_126 = arith.constant 0 : i32
      %c0_i32_127 = arith.constant 0 : i32
      %213 = tpu.memref_slice %arg3[%212, %c0_i32_127] : memref<256x128xf32, #tpu.memory_space<any>> -> memref<1x128xf32, #tpu.memory_space<any>>
      %214 = tpu.memref_squeeze %213 : memref<1x128xf32, #tpu.memory_space<any>> -> memref<128xf32, #tpu.memory_space<any>>
      %c0_i32_128 = arith.constant 0 : i32
      %215 = tpu.memref_slice %arg5[%c0_i32_124, %c10_i32_125, %c0_i32_128] : memref<2x16x128xf32, #tpu.memory_space<vmem>> -> memref<1x1x128xf32, #tpu.memory_space<vmem>>
      %216 = tpu.memref_squeeze %215 : memref<1x1x128xf32, #tpu.memory_space<vmem>> -> memref<128xf32, #tpu.memory_space<vmem>>
      %217 = tpu.memref_slice %arg6[%c0_i32_126] : memref<2x!tpu.dma_semaphore, #tpu.memory_space<semaphore_mem>> -> memref<1x!tpu.dma_semaphore, #tpu.memory_space<semaphore_mem>>
      %218 = tpu.memref_squeeze %217 : memref<1x!tpu.dma_semaphore, #tpu.memory_space<semaphore_mem>> -> memref<!tpu.dma_semaphore, #tpu.memory_space<semaphore_mem>>
      tpu.enqueue_dma source(%214 : memref<128xf32, #tpu.memory_space<any>>) target(%216 : memref<128xf32, #tpu.memory_space<vmem>>) target_semaphore(%218 : memref<!tpu.dma_semaphore, #tpu.memory_space<semaphore_mem>>)
      %c11_i32_129 = arith.constant 11 : i32
      %219 = arith.addi %119, %c11_i32_129 : i32
      %220 = arith.index_cast %219 : i32 to index
      %221 = memref.load %arg2[%220] : memref<16xi32, #tpu.memory_space<smem>>
      %c0_i32_130 = arith.constant 0 : i32
      %c11_i32_131 = arith.constant 11 : i32
      %c0_i32_132 = arith.constant 0 : i32
      %c0_i32_133 = arith.constant 0 : i32
      %222 = tpu.memref_slice %arg3[%221, %c0_i32_133] : memref<256x128xf32, #tpu.memory_space<any>> -> memref<1x128xf32, #tpu.memory_space<any>>
      %223 = tpu.memref_squeeze %222 : memref<1x128xf32, #tpu.memory_space<any>> -> memref<128xf32, #tpu.memory_space<any>>
      %c0_i32_134 = arith.constant 0 : i32
      %224 = tpu.memref_slice %arg5[%c0_i32_130, %c11_i32_131, %c0_i32_134] : memref<2x16x128xf32, #tpu.memory_space<vmem>> -> memref<1x1x128xf32, #tpu.memory_space<vmem>>
      %225 = tpu.memref_squeeze %224 : memref<1x1x128xf32, #tpu.memory_space<vmem>> -> memref<128xf32, #tpu.memory_space<vmem>>
      %226 = tpu.memref_slice %arg6[%c0_i32_132] : memref<2x!tpu.dma_semaphore, #tpu.memory_space<semaphore_mem>> -> memref<1x!tpu.dma_semaphore, #tpu.memory_space<semaphore_mem>>
      %227 = tpu.memref_squeeze %226 : memref<1x!tpu.dma_semaphore, #tpu.memory_space<semaphore_mem>> -> memref<!tpu.dma_semaphore, #tpu.memory_space<semaphore_mem>>
      tpu.enqueue_dma source(%223 : memref<128xf32, #tpu.memory_space<any>>) target(%225 : memref<128xf32, #tpu.memory_space<vmem>>) target_semaphore(%227 : memref<!tpu.dma_semaphore, #tpu.memory_space<semaphore_mem>>)
      %c12_i32_135 = arith.constant 12 : i32
      %228 = arith.addi %119, %c12_i32_135 : i32
      %229 = arith.index_cast %228 : i32 to index
      %230 = memref.load %arg2[%229] : memref<16xi32, #tpu.memory_space<smem>>
      %c0_i32_136 = arith.constant 0 : i32
      %c12_i32_137 = arith.constant 12 : i32
      %c0_i32_138 = arith.constant 0 : i32
      %c0_i32_139 = arith.constant 0 : i32
      %231 = tpu.memref_slice %arg3[%230, %c0_i32_139] : memref<256x128xf32, #tpu.memory_space<any>> -> memref<1x128xf32, #tpu.memory_space<any>>
      %232 = tpu.memref_squeeze %231 : memref<1x128xf32, #tpu.memory_space<any>> -> memref<128xf32, #tpu.memory_space<any>>
      %c0_i32_140 = arith.constant 0 : i32
      %233 = tpu.memref_slice %arg5[%c0_i32_136, %c12_i32_137, %c0_i32_140] : memref<2x16x128xf32, #tpu.memory_space<vmem>> -> memref<1x1x128xf32, #tpu.memory_space<vmem>>
      %234 = tpu.memref_squeeze %233 : memref<1x1x128xf32, #tpu.memory_space<vmem>> -> memref<128xf32, #tpu.memory_space<vmem>>
      %235 = tpu.memref_slice %arg6[%c0_i32_138] : memref<2x!tpu.dma_semaphore, #tpu.memory_space<semaphore_mem>> -> memref<1x!tpu.dma_semaphore, #tpu.memory_space<semaphore_mem>>
      %236 = tpu.memref_squeeze %235 : memref<1x!tpu.dma_semaphore, #tpu.memory_space<semaphore_mem>> -> memref<!tpu.dma_semaphore, #tpu.memory_space<semaphore_mem>>
      tpu.enqueue_dma source(%232 : memref<128xf32, #tpu.memory_space<any>>) target(%234 : memref<128xf32, #tpu.memory_space<vmem>>) target_semaphore(%236 : memref<!tpu.dma_semaphore, #tpu.memory_space<semaphore_mem>>)
      %c13_i32_141 = arith.constant 13 : i32
      %237 = arith.addi %119, %c13_i32_141 : i32
      %238 = arith.index_cast %237 : i32 to index
      %239 = memref.load %arg2[%238] : memref<16xi32, #tpu.memory_space<smem>>
      %c0_i32_142 = arith.constant 0 : i32
      %c13_i32_143 = arith.constant 13 : i32
      %c0_i32_144 = arith.constant 0 : i32
      %c0_i32_145 = arith.constant 0 : i32
      %240 = tpu.memref_slice %arg3[%239, %c0_i32_145] : memref<256x128xf32, #tpu.memory_space<any>> -> memref<1x128xf32, #tpu.memory_space<any>>
      %241 = tpu.memref_squeeze %240 : memref<1x128xf32, #tpu.memory_space<any>> -> memref<128xf32, #tpu.memory_space<any>>
      %c0_i32_146 = arith.constant 0 : i32
      %242 = tpu.memref_slice %arg5[%c0_i32_142, %c13_i32_143, %c0_i32_146] : memref<2x16x128xf32, #tpu.memory_space<vmem>> -> memref<1x1x128xf32, #tpu.memory_space<vmem>>
      %243 = tpu.memref_squeeze %242 : memref<1x1x128xf32, #tpu.memory_space<vmem>> -> memref<128xf32, #tpu.memory_space<vmem>>
      %244 = tpu.memref_slice %arg6[%c0_i32_144] : memref<2x!tpu.dma_semaphore, #tpu.memory_space<semaphore_mem>> -> memref<1x!tpu.dma_semaphore, #tpu.memory_space<semaphore_mem>>
      %245 = tpu.memref_squeeze %244 : memref<1x!tpu.dma_semaphore, #tpu.memory_space<semaphore_mem>> -> memref<!tpu.dma_semaphore, #tpu.memory_space<semaphore_mem>>
      tpu.enqueue_dma source(%241 : memref<128xf32, #tpu.memory_space<any>>) target(%243 : memref<128xf32, #tpu.memory_space<vmem>>) target_semaphore(%245 : memref<!tpu.dma_semaphore, #tpu.memory_space<semaphore_mem>>)
      %c14_i32_147 = arith.constant 14 : i32
      %246 = arith.addi %119, %c14_i32_147 : i32
      %247 = arith.index_cast %246 : i32 to index
      %248 = memref.load %arg2[%247] : memref<16xi32, #tpu.memory_space<smem>>
      %c0_i32_148 = arith.constant 0 : i32
      %c14_i32_149 = arith.constant 14 : i32
      %c0_i32_150 = arith.constant 0 : i32
      %c0_i32_151 = arith.constant 0 : i32
      %249 = tpu.memref_slice %arg3[%248, %c0_i32_151] : memref<256x128xf32, #tpu.memory_space<any>> -> memref<1x128xf32, #tpu.memory_space<any>>
      %250 = tpu.memref_squeeze %249 : memref<1x128xf32, #tpu.memory_space<any>> -> memref<128xf32, #tpu.memory_space<any>>
      %c0_i32_152 = arith.constant 0 : i32
      %251 = tpu.memref_slice %arg5[%c0_i32_148, %c14_i32_149, %c0_i32_152] : memref<2x16x128xf32, #tpu.memory_space<vmem>> -> memref<1x1x128xf32, #tpu.memory_space<vmem>>
      %252 = tpu.memref_squeeze %251 : memref<1x1x128xf32, #tpu.memory_space<vmem>> -> memref<128xf32, #tpu.memory_space<vmem>>
      %253 = tpu.memref_slice %arg6[%c0_i32_150] : memref<2x!tpu.dma_semaphore, #tpu.memory_space<semaphore_mem>> -> memref<1x!tpu.dma_semaphore, #tpu.memory_space<semaphore_mem>>
      %254 = tpu.memref_squeeze %253 : memref<1x!tpu.dma_semaphore, #tpu.memory_space<semaphore_mem>> -> memref<!tpu.dma_semaphore, #tpu.memory_space<semaphore_mem>>
      tpu.enqueue_dma source(%250 : memref<128xf32, #tpu.memory_space<any>>) target(%252 : memref<128xf32, #tpu.memory_space<vmem>>) target_semaphore(%254 : memref<!tpu.dma_semaphore, #tpu.memory_space<semaphore_mem>>)
      %c15_i32_153 = arith.constant 15 : i32
      %255 = arith.addi %119, %c15_i32_153 : i32
      %256 = arith.index_cast %255 : i32 to index
      %257 = memref.load %arg2[%256] : memref<16xi32, #tpu.memory_space<smem>>
      %c0_i32_154 = arith.constant 0 : i32
      %c15_i32_155 = arith.constant 15 : i32
      %c0_i32_156 = arith.constant 0 : i32
      %c0_i32_157 = arith.constant 0 : i32
      %258 = tpu.memref_slice %arg3[%257, %c0_i32_157] : memref<256x128xf32, #tpu.memory_space<any>> -> memref<1x128xf32, #tpu.memory_space<any>>
      %259 = tpu.memref_squeeze %258 : memref<1x128xf32, #tpu.memory_space<any>> -> memref<128xf32, #tpu.memory_space<any>>
      %c0_i32_158 = arith.constant 0 : i32
      %260 = tpu.memref_slice %arg5[%c0_i32_154, %c15_i32_155, %c0_i32_158] : memref<2x16x128xf32, #tpu.memory_space<vmem>> -> memref<1x1x128xf32, #tpu.memory_space<vmem>>
      %261 = tpu.memref_squeeze %260 : memref<1x1x128xf32, #tpu.memory_space<vmem>> -> memref<128xf32, #tpu.memory_space<vmem>>
      %262 = tpu.memref_slice %arg6[%c0_i32_156] : memref<2x!tpu.dma_semaphore, #tpu.memory_space<semaphore_mem>> -> memref<1x!tpu.dma_semaphore, #tpu.memory_space<semaphore_mem>>
      %263 = tpu.memref_squeeze %262 : memref<1x!tpu.dma_semaphore, #tpu.memory_space<semaphore_mem>> -> memref<!tpu.dma_semaphore, #tpu.memory_space<semaphore_mem>>
      tpu.enqueue_dma source(%259 : memref<128xf32, #tpu.memory_space<any>>) target(%261 : memref<128xf32, #tpu.memory_space<vmem>>) target_semaphore(%263 : memref<!tpu.dma_semaphore, #tpu.memory_space<semaphore_mem>>)
    } else {
    }
    %c1_i32_1 = arith.constant 1 : i32
    %5 = arith.addi %arg1, %c1_i32_1 : i32
    %c1_i32_2 = arith.constant 1 : i32
    %6 = arith.cmpi slt, %5, %c1_i32_2 : i32
    %7 = arith.extui %6 : i1 to i32
    %c0_i32_3 = arith.constant 0 : i32
    %8 = arith.cmpi ne, %7, %c0_i32_3 : i32
    scf.if %8 {
      %c1_i32_63 = arith.constant 1 : i32
      %119 = arith.addi %1, %c1_i32_63 : i32
      %c1_i32_64 = arith.constant 1 : i32
      %120 = arith.addi %arg1, %c1_i32_64 : i32
      %c2_i32_65 = arith.constant 2 : i32
      %c0_i32_66 = arith.constant 0 : i32
      %121 = arith.cmpi eq, %c2_i32_65, %c0_i32_66 : i32
      %c1_i32_67 = arith.constant 1 : i32
      %122 = arith.select %121, %c1_i32_67, %c2_i32_65 : i32
      %123 = arith.remsi %120, %122 : i32
      %c0_i32_68 = arith.constant 0 : i32
      %124 = arith.cmpi ne, %123, %c0_i32_68 : i32
      %c0_i32_69 = arith.constant 0 : i32
      %125 = arith.cmpi slt, %123, %c0_i32_69 : i32
      %c0_i32_70 = arith.constant 0 : i32
      %126 = arith.cmpi slt, %122, %c0_i32_70 : i32
      %127 = arith.xori %125, %126 : i1
      %128 = arith.andi %127, %124 : i1
      %129 = arith.addi %123, %122 : i32
      %130 = arith.select %128, %129, %123 : i32
      %c16_i32 = arith.constant 16 : i32
      %131 = arith.muli %119, %c16_i32 : i32
      %c0_i32_71 = arith.constant 0 : i32
      %132 = arith.addi %131, %c0_i32_71 : i32
      %133 = arith.index_cast %132 : i32 to index
      %134 = memref.load %arg2[%133] : memref<16xi32, #tpu.memory_space<smem>>
      %c0_i32_72 = arith.constant 0 : i32
      %c0_i32_73 = arith.constant 0 : i32
      %135 = tpu.memref_slice %arg3[%134, %c0_i32_73] : memref<256x128xf32, #tpu.memory_space<any>> -> memref<1x128xf32, #tpu.memory_space<any>>
      %136 = tpu.memref_squeeze %135 : memref<1x128xf32, #tpu.memory_space<any>> -> memref<128xf32, #tpu.memory_space<any>>
      %c0_i32_74 = arith.constant 0 : i32
      %137 = tpu.memref_slice %arg5[%130, %c0_i32_72, %c0_i32_74] : memref<2x16x128xf32, #tpu.memory_space<vmem>> -> memref<1x1x128xf32, #tpu.memory_space<vmem>>
      %138 = tpu.memref_squeeze %137 : memref<1x1x128xf32, #tpu.memory_space<vmem>> -> memref<128xf32, #tpu.memory_space<vmem>>
      %139 = tpu.memref_slice %arg6[%130] : memref<2x!tpu.dma_semaphore, #tpu.memory_space<semaphore_mem>> -> memref<1x!tpu.dma_semaphore, #tpu.memory_space<semaphore_mem>>
      %140 = tpu.memref_squeeze %139 : memref<1x!tpu.dma_semaphore, #tpu.memory_space<semaphore_mem>> -> memref<!tpu.dma_semaphore, #tpu.memory_space<semaphore_mem>>
      tpu.enqueue_dma source(%136 : memref<128xf32, #tpu.memory_space<any>>) target(%138 : memref<128xf32, #tpu.memory_space<vmem>>) target_semaphore(%140 : memref<!tpu.dma_semaphore, #tpu.memory_space<semaphore_mem>>)
      %c1_i32_75 = arith.constant 1 : i32
      %141 = arith.addi %131, %c1_i32_75 : i32
      %142 = arith.index_cast %141 : i32 to index
      %143 = memref.load %arg2[%142] : memref<16xi32, #tpu.memory_space<smem>>
      %c1_i32_76 = arith.constant 1 : i32
      %c0_i32_77 = arith.constant 0 : i32
      %144 = tpu.memref_slice %arg3[%143, %c0_i32_77] : memref<256x128xf32, #tpu.memory_space<any>> -> memref<1x128xf32, #tpu.memory_space<any>>
      %145 = tpu.memref_squeeze %144 : memref<1x128xf32, #tpu.memory_space<any>> -> memref<128xf32, #tpu.memory_space<any>>
      %c0_i32_78 = arith.constant 0 : i32
      %146 = tpu.memref_slice %arg5[%130, %c1_i32_76, %c0_i32_78] : memref<2x16x128xf32, #tpu.memory_space<vmem>> -> memref<1x1x128xf32, #tpu.memory_space<vmem>>
      %147 = tpu.memref_squeeze %146 : memref<1x1x128xf32, #tpu.memory_space<vmem>> -> memref<128xf32, #tpu.memory_space<vmem>>
      %148 = tpu.memref_slice %arg6[%130] : memref<2x!tpu.dma_semaphore, #tpu.memory_space<semaphore_mem>> -> memref<1x!tpu.dma_semaphore, #tpu.memory_space<semaphore_mem>>
      %149 = tpu.memref_squeeze %148 : memref<1x!tpu.dma_semaphore, #tpu.memory_space<semaphore_mem>> -> memref<!tpu.dma_semaphore, #tpu.memory_space<semaphore_mem>>
      tpu.enqueue_dma source(%145 : memref<128xf32, #tpu.memory_space<any>>) target(%147 : memref<128xf32, #tpu.memory_space<vmem>>) target_semaphore(%149 : memref<!tpu.dma_semaphore, #tpu.memory_space<semaphore_mem>>)
      %c2_i32_79 = arith.constant 2 : i32
      %150 = arith.addi %131, %c2_i32_79 : i32
      %151 = arith.index_cast %150 : i32 to index
      %152 = memref.load %arg2[%151] : memref<16xi32, #tpu.memory_space<smem>>
      %c2_i32_80 = arith.constant 2 : i32
      %c0_i32_81 = arith.constant 0 : i32
      %153 = tpu.memref_slice %arg3[%152, %c0_i32_81] : memref<256x128xf32, #tpu.memory_space<any>> -> memref<1x128xf32, #tpu.memory_space<any>>
      %154 = tpu.memref_squeeze %153 : memref<1x128xf32, #tpu.memory_space<any>> -> memref<128xf32, #tpu.memory_space<any>>
      %c0_i32_82 = arith.constant 0 : i32
      %155 = tpu.memref_slice %arg5[%130, %c2_i32_80, %c0_i32_82] : memref<2x16x128xf32, #tpu.memory_space<vmem>> -> memref<1x1x128xf32, #tpu.memory_space<vmem>>
      %156 = tpu.memref_squeeze %155 : memref<1x1x128xf32, #tpu.memory_space<vmem>> -> memref<128xf32, #tpu.memory_space<vmem>>
      %157 = tpu.memref_slice %arg6[%130] : memref<2x!tpu.dma_semaphore, #tpu.memory_space<semaphore_mem>> -> memref<1x!tpu.dma_semaphore, #tpu.memory_space<semaphore_mem>>
      %158 = tpu.memref_squeeze %157 : memref<1x!tpu.dma_semaphore, #tpu.memory_space<semaphore_mem>> -> memref<!tpu.dma_semaphore, #tpu.memory_space<semaphore_mem>>
      tpu.enqueue_dma source(%154 : memref<128xf32, #tpu.memory_space<any>>) target(%156 : memref<128xf32, #tpu.memory_space<vmem>>) target_semaphore(%158 : memref<!tpu.dma_semaphore, #tpu.memory_space<semaphore_mem>>)
      %c3_i32_83 = arith.constant 3 : i32
      %159 = arith.addi %131, %c3_i32_83 : i32
      %160 = arith.index_cast %159 : i32 to index
      %161 = memref.load %arg2[%160] : memref<16xi32, #tpu.memory_space<smem>>
      %c3_i32_84 = arith.constant 3 : i32
      %c0_i32_85 = arith.constant 0 : i32
      %162 = tpu.memref_slice %arg3[%161, %c0_i32_85] : memref<256x128xf32, #tpu.memory_space<any>> -> memref<1x128xf32, #tpu.memory_space<any>>
      %163 = tpu.memref_squeeze %162 : memref<1x128xf32, #tpu.memory_space<any>> -> memref<128xf32, #tpu.memory_space<any>>
      %c0_i32_86 = arith.constant 0 : i32
      %164 = tpu.memref_slice %arg5[%130, %c3_i32_84, %c0_i32_86] : memref<2x16x128xf32, #tpu.memory_space<vmem>> -> memref<1x1x128xf32, #tpu.memory_space<vmem>>
      %165 = tpu.memref_squeeze %164 : memref<1x1x128xf32, #tpu.memory_space<vmem>> -> memref<128xf32, #tpu.memory_space<vmem>>
      %166 = tpu.memref_slice %arg6[%130] : memref<2x!tpu.dma_semaphore, #tpu.memory_space<semaphore_mem>> -> memref<1x!tpu.dma_semaphore, #tpu.memory_space<semaphore_mem>>
      %167 = tpu.memref_squeeze %166 : memref<1x!tpu.dma_semaphore, #tpu.memory_space<semaphore_mem>> -> memref<!tpu.dma_semaphore, #tpu.memory_space<semaphore_mem>>
      tpu.enqueue_dma source(%163 : memref<128xf32, #tpu.memory_space<any>>) target(%165 : memref<128xf32, #tpu.memory_space<vmem>>) target_semaphore(%167 : memref<!tpu.dma_semaphore, #tpu.memory_space<semaphore_mem>>)
      %c4_i32_87 = arith.constant 4 : i32
      %168 = arith.addi %131, %c4_i32_87 : i32
      %169 = arith.index_cast %168 : i32 to index
      %170 = memref.load %arg2[%169] : memref<16xi32, #tpu.memory_space<smem>>
      %c4_i32_88 = arith.constant 4 : i32
      %c0_i32_89 = arith.constant 0 : i32
      %171 = tpu.memref_slice %arg3[%170, %c0_i32_89] : memref<256x128xf32, #tpu.memory_space<any>> -> memref<1x128xf32, #tpu.memory_space<any>>
      %172 = tpu.memref_squeeze %171 : memref<1x128xf32, #tpu.memory_space<any>> -> memref<128xf32, #tpu.memory_space<any>>
      %c0_i32_90 = arith.constant 0 : i32
      %173 = tpu.memref_slice %arg5[%130, %c4_i32_88, %c0_i32_90] : memref<2x16x128xf32, #tpu.memory_space<vmem>> -> memref<1x1x128xf32, #tpu.memory_space<vmem>>
      %174 = tpu.memref_squeeze %173 : memref<1x1x128xf32, #tpu.memory_space<vmem>> -> memref<128xf32, #tpu.memory_space<vmem>>
      %175 = tpu.memref_slice %arg6[%130] : memref<2x!tpu.dma_semaphore, #tpu.memory_space<semaphore_mem>> -> memref<1x!tpu.dma_semaphore, #tpu.memory_space<semaphore_mem>>
      %176 = tpu.memref_squeeze %175 : memref<1x!tpu.dma_semaphore, #tpu.memory_space<semaphore_mem>> -> memref<!tpu.dma_semaphore, #tpu.memory_space<semaphore_mem>>
      tpu.enqueue_dma source(%172 : memref<128xf32, #tpu.memory_space<any>>) target(%174 : memref<128xf32, #tpu.memory_space<vmem>>) target_semaphore(%176 : memref<!tpu.dma_semaphore, #tpu.memory_space<semaphore_mem>>)
      %c5_i32_91 = arith.constant 5 : i32
      %177 = arith.addi %131, %c5_i32_91 : i32
      %178 = arith.index_cast %177 : i32 to index
      %179 = memref.load %arg2[%178] : memref<16xi32, #tpu.memory_space<smem>>
      %c5_i32_92 = arith.constant 5 : i32
      %c0_i32_93 = arith.constant 0 : i32
      %180 = tpu.memref_slice %arg3[%179, %c0_i32_93] : memref<256x128xf32, #tpu.memory_space<any>> -> memref<1x128xf32, #tpu.memory_space<any>>
      %181 = tpu.memref_squeeze %180 : memref<1x128xf32, #tpu.memory_space<any>> -> memref<128xf32, #tpu.memory_space<any>>
      %c0_i32_94 = arith.constant 0 : i32
      %182 = tpu.memref_slice %arg5[%130, %c5_i32_92, %c0_i32_94] : memref<2x16x128xf32, #tpu.memory_space<vmem>> -> memref<1x1x128xf32, #tpu.memory_space<vmem>>
      %183 = tpu.memref_squeeze %182 : memref<1x1x128xf32, #tpu.memory_space<vmem>> -> memref<128xf32, #tpu.memory_space<vmem>>
      %184 = tpu.memref_slice %arg6[%130] : memref<2x!tpu.dma_semaphore, #tpu.memory_space<semaphore_mem>> -> memref<1x!tpu.dma_semaphore, #tpu.memory_space<semaphore_mem>>
      %185 = tpu.memref_squeeze %184 : memref<1x!tpu.dma_semaphore, #tpu.memory_space<semaphore_mem>> -> memref<!tpu.dma_semaphore, #tpu.memory_space<semaphore_mem>>
      tpu.enqueue_dma source(%181 : memref<128xf32, #tpu.memory_space<any>>) target(%183 : memref<128xf32, #tpu.memory_space<vmem>>) target_semaphore(%185 : memref<!tpu.dma_semaphore, #tpu.memory_space<semaphore_mem>>)
      %c6_i32_95 = arith.constant 6 : i32
      %186 = arith.addi %131, %c6_i32_95 : i32
      %187 = arith.index_cast %186 : i32 to index
      %188 = memref.load %arg2[%187] : memref<16xi32, #tpu.memory_space<smem>>
      %c6_i32_96 = arith.constant 6 : i32
      %c0_i32_97 = arith.constant 0 : i32
      %189 = tpu.memref_slice %arg3[%188, %c0_i32_97] : memref<256x128xf32, #tpu.memory_space<any>> -> memref<1x128xf32, #tpu.memory_space<any>>
      %190 = tpu.memref_squeeze %189 : memref<1x128xf32, #tpu.memory_space<any>> -> memref<128xf32, #tpu.memory_space<any>>
      %c0_i32_98 = arith.constant 0 : i32
      %191 = tpu.memref_slice %arg5[%130, %c6_i32_96, %c0_i32_98] : memref<2x16x128xf32, #tpu.memory_space<vmem>> -> memref<1x1x128xf32, #tpu.memory_space<vmem>>
      %192 = tpu.memref_squeeze %191 : memref<1x1x128xf32, #tpu.memory_space<vmem>> -> memref<128xf32, #tpu.memory_space<vmem>>
      %193 = tpu.memref_slice %arg6[%130] : memref<2x!tpu.dma_semaphore, #tpu.memory_space<semaphore_mem>> -> memref<1x!tpu.dma_semaphore, #tpu.memory_space<semaphore_mem>>
      %194 = tpu.memref_squeeze %193 : memref<1x!tpu.dma_semaphore, #tpu.memory_space<semaphore_mem>> -> memref<!tpu.dma_semaphore, #tpu.memory_space<semaphore_mem>>
      tpu.enqueue_dma source(%190 : memref<128xf32, #tpu.memory_space<any>>) target(%192 : memref<128xf32, #tpu.memory_space<vmem>>) target_semaphore(%194 : memref<!tpu.dma_semaphore, #tpu.memory_space<semaphore_mem>>)
      %c7_i32_99 = arith.constant 7 : i32
      %195 = arith.addi %131, %c7_i32_99 : i32
      %196 = arith.index_cast %195 : i32 to index
      %197 = memref.load %arg2[%196] : memref<16xi32, #tpu.memory_space<smem>>
      %c7_i32_100 = arith.constant 7 : i32
      %c0_i32_101 = arith.constant 0 : i32
      %198 = tpu.memref_slice %arg3[%197, %c0_i32_101] : memref<256x128xf32, #tpu.memory_space<any>> -> memref<1x128xf32, #tpu.memory_space<any>>
      %199 = tpu.memref_squeeze %198 : memref<1x128xf32, #tpu.memory_space<any>> -> memref<128xf32, #tpu.memory_space<any>>
      %c0_i32_102 = arith.constant 0 : i32
      %200 = tpu.memref_slice %arg5[%130, %c7_i32_100, %c0_i32_102] : memref<2x16x128xf32, #tpu.memory_space<vmem>> -> memref<1x1x128xf32, #tpu.memory_space<vmem>>
      %201 = tpu.memref_squeeze %200 : memref<1x1x128xf32, #tpu.memory_space<vmem>> -> memref<128xf32, #tpu.memory_space<vmem>>
      %202 = tpu.memref_slice %arg6[%130] : memref<2x!tpu.dma_semaphore, #tpu.memory_space<semaphore_mem>> -> memref<1x!tpu.dma_semaphore, #tpu.memory_space<semaphore_mem>>
      %203 = tpu.memref_squeeze %202 : memref<1x!tpu.dma_semaphore, #tpu.memory_space<semaphore_mem>> -> memref<!tpu.dma_semaphore, #tpu.memory_space<semaphore_mem>>
      tpu.enqueue_dma source(%199 : memref<128xf32, #tpu.memory_space<any>>) target(%201 : memref<128xf32, #tpu.memory_space<vmem>>) target_semaphore(%203 : memref<!tpu.dma_semaphore, #tpu.memory_space<semaphore_mem>>)
      %c8_i32_103 = arith.constant 8 : i32
      %204 = arith.addi %131, %c8_i32_103 : i32
      %205 = arith.index_cast %204 : i32 to index
      %206 = memref.load %arg2[%205] : memref<16xi32, #tpu.memory_space<smem>>
      %c8_i32_104 = arith.constant 8 : i32
      %c0_i32_105 = arith.constant 0 : i32
      %207 = tpu.memref_slice %arg3[%206, %c0_i32_105] : memref<256x128xf32, #tpu.memory_space<any>> -> memref<1x128xf32, #tpu.memory_space<any>>
      %208 = tpu.memref_squeeze %207 : memref<1x128xf32, #tpu.memory_space<any>> -> memref<128xf32, #tpu.memory_space<any>>
      %c0_i32_106 = arith.constant 0 : i32
      %209 = tpu.memref_slice %arg5[%130, %c8_i32_104, %c0_i32_106] : memref<2x16x128xf32, #tpu.memory_space<vmem>> -> memref<1x1x128xf32, #tpu.memory_space<vmem>>
      %210 = tpu.memref_squeeze %209 : memref<1x1x128xf32, #tpu.memory_space<vmem>> -> memref<128xf32, #tpu.memory_space<vmem>>
      %211 = tpu.memref_slice %arg6[%130] : memref<2x!tpu.dma_semaphore, #tpu.memory_space<semaphore_mem>> -> memref<1x!tpu.dma_semaphore, #tpu.memory_space<semaphore_mem>>
      %212 = tpu.memref_squeeze %211 : memref<1x!tpu.dma_semaphore, #tpu.memory_space<semaphore_mem>> -> memref<!tpu.dma_semaphore, #tpu.memory_space<semaphore_mem>>
      tpu.enqueue_dma source(%208 : memref<128xf32, #tpu.memory_space<any>>) target(%210 : memref<128xf32, #tpu.memory_space<vmem>>) target_semaphore(%212 : memref<!tpu.dma_semaphore, #tpu.memory_space<semaphore_mem>>)
      %c9_i32_107 = arith.constant 9 : i32
      %213 = arith.addi %131, %c9_i32_107 : i32
      %214 = arith.index_cast %213 : i32 to index
      %215 = memref.load %arg2[%214] : memref<16xi32, #tpu.memory_space<smem>>
      %c9_i32_108 = arith.constant 9 : i32
      %c0_i32_109 = arith.constant 0 : i32
      %216 = tpu.memref_slice %arg3[%215, %c0_i32_109] : memref<256x128xf32, #tpu.memory_space<any>> -> memref<1x128xf32, #tpu.memory_space<any>>
      %217 = tpu.memref_squeeze %216 : memref<1x128xf32, #tpu.memory_space<any>> -> memref<128xf32, #tpu.memory_space<any>>
      %c0_i32_110 = arith.constant 0 : i32
      %218 = tpu.memref_slice %arg5[%130, %c9_i32_108, %c0_i32_110] : memref<2x16x128xf32, #tpu.memory_space<vmem>> -> memref<1x1x128xf32, #tpu.memory_space<vmem>>
      %219 = tpu.memref_squeeze %218 : memref<1x1x128xf32, #tpu.memory_space<vmem>> -> memref<128xf32, #tpu.memory_space<vmem>>
      %220 = tpu.memref_slice %arg6[%130] : memref<2x!tpu.dma_semaphore, #tpu.memory_space<semaphore_mem>> -> memref<1x!tpu.dma_semaphore, #tpu.memory_space<semaphore_mem>>
      %221 = tpu.memref_squeeze %220 : memref<1x!tpu.dma_semaphore, #tpu.memory_space<semaphore_mem>> -> memref<!tpu.dma_semaphore, #tpu.memory_space<semaphore_mem>>
      tpu.enqueue_dma source(%217 : memref<128xf32, #tpu.memory_space<any>>) target(%219 : memref<128xf32, #tpu.memory_space<vmem>>) target_semaphore(%221 : memref<!tpu.dma_semaphore, #tpu.memory_space<semaphore_mem>>)
      %c10_i32_111 = arith.constant 10 : i32
      %222 = arith.addi %131, %c10_i32_111 : i32
      %223 = arith.index_cast %222 : i32 to index
      %224 = memref.load %arg2[%223] : memref<16xi32, #tpu.memory_space<smem>>
      %c10_i32_112 = arith.constant 10 : i32
      %c0_i32_113 = arith.constant 0 : i32
      %225 = tpu.memref_slice %arg3[%224, %c0_i32_113] : memref<256x128xf32, #tpu.memory_space<any>> -> memref<1x128xf32, #tpu.memory_space<any>>
      %226 = tpu.memref_squeeze %225 : memref<1x128xf32, #tpu.memory_space<any>> -> memref<128xf32, #tpu.memory_space<any>>
      %c0_i32_114 = arith.constant 0 : i32
      %227 = tpu.memref_slice %arg5[%130, %c10_i32_112, %c0_i32_114] : memref<2x16x128xf32, #tpu.memory_space<vmem>> -> memref<1x1x128xf32, #tpu.memory_space<vmem>>
      %228 = tpu.memref_squeeze %227 : memref<1x1x128xf32, #tpu.memory_space<vmem>> -> memref<128xf32, #tpu.memory_space<vmem>>
      %229 = tpu.memref_slice %arg6[%130] : memref<2x!tpu.dma_semaphore, #tpu.memory_space<semaphore_mem>> -> memref<1x!tpu.dma_semaphore, #tpu.memory_space<semaphore_mem>>
      %230 = tpu.memref_squeeze %229 : memref<1x!tpu.dma_semaphore, #tpu.memory_space<semaphore_mem>> -> memref<!tpu.dma_semaphore, #tpu.memory_space<semaphore_mem>>
      tpu.enqueue_dma source(%226 : memref<128xf32, #tpu.memory_space<any>>) target(%228 : memref<128xf32, #tpu.memory_space<vmem>>) target_semaphore(%230 : memref<!tpu.dma_semaphore, #tpu.memory_space<semaphore_mem>>)
      %c11_i32_115 = arith.constant 11 : i32
      %231 = arith.addi %131, %c11_i32_115 : i32
      %232 = arith.index_cast %231 : i32 to index
      %233 = memref.load %arg2[%232] : memref<16xi32, #tpu.memory_space<smem>>
      %c11_i32_116 = arith.constant 11 : i32
      %c0_i32_117 = arith.constant 0 : i32
      %234 = tpu.memref_slice %arg3[%233, %c0_i32_117] : memref<256x128xf32, #tpu.memory_space<any>> -> memref<1x128xf32, #tpu.memory_space<any>>
      %235 = tpu.memref_squeeze %234 : memref<1x128xf32, #tpu.memory_space<any>> -> memref<128xf32, #tpu.memory_space<any>>
      %c0_i32_118 = arith.constant 0 : i32
      %236 = tpu.memref_slice %arg5[%130, %c11_i32_116, %c0_i32_118] : memref<2x16x128xf32, #tpu.memory_space<vmem>> -> memref<1x1x128xf32, #tpu.memory_space<vmem>>
      %237 = tpu.memref_squeeze %236 : memref<1x1x128xf32, #tpu.memory_space<vmem>> -> memref<128xf32, #tpu.memory_space<vmem>>
      %238 = tpu.memref_slice %arg6[%130] : memref<2x!tpu.dma_semaphore, #tpu.memory_space<semaphore_mem>> -> memref<1x!tpu.dma_semaphore, #tpu.memory_space<semaphore_mem>>
      %239 = tpu.memref_squeeze %238 : memref<1x!tpu.dma_semaphore, #tpu.memory_space<semaphore_mem>> -> memref<!tpu.dma_semaphore, #tpu.memory_space<semaphore_mem>>
      tpu.enqueue_dma source(%235 : memref<128xf32, #tpu.memory_space<any>>) target(%237 : memref<128xf32, #tpu.memory_space<vmem>>) target_semaphore(%239 : memref<!tpu.dma_semaphore, #tpu.memory_space<semaphore_mem>>)
      %c12_i32_119 = arith.constant 12 : i32
      %240 = arith.addi %131, %c12_i32_119 : i32
      %241 = arith.index_cast %240 : i32 to index
      %242 = memref.load %arg2[%241] : memref<16xi32, #tpu.memory_space<smem>>
      %c12_i32_120 = arith.constant 12 : i32
      %c0_i32_121 = arith.constant 0 : i32
      %243 = tpu.memref_slice %arg3[%242, %c0_i32_121] : memref<256x128xf32, #tpu.memory_space<any>> -> memref<1x128xf32, #tpu.memory_space<any>>
      %244 = tpu.memref_squeeze %243 : memref<1x128xf32, #tpu.memory_space<any>> -> memref<128xf32, #tpu.memory_space<any>>
      %c0_i32_122 = arith.constant 0 : i32
      %245 = tpu.memref_slice %arg5[%130, %c12_i32_120, %c0_i32_122] : memref<2x16x128xf32, #tpu.memory_space<vmem>> -> memref<1x1x128xf32, #tpu.memory_space<vmem>>
      %246 = tpu.memref_squeeze %245 : memref<1x1x128xf32, #tpu.memory_space<vmem>> -> memref<128xf32, #tpu.memory_space<vmem>>
      %247 = tpu.memref_slice %arg6[%130] : memref<2x!tpu.dma_semaphore, #tpu.memory_space<semaphore_mem>> -> memref<1x!tpu.dma_semaphore, #tpu.memory_space<semaphore_mem>>
      %248 = tpu.memref_squeeze %247 : memref<1x!tpu.dma_semaphore, #tpu.memory_space<semaphore_mem>> -> memref<!tpu.dma_semaphore, #tpu.memory_space<semaphore_mem>>
      tpu.enqueue_dma source(%244 : memref<128xf32, #tpu.memory_space<any>>) target(%246 : memref<128xf32, #tpu.memory_space<vmem>>) target_semaphore(%248 : memref<!tpu.dma_semaphore, #tpu.memory_space<semaphore_mem>>)
      %c13_i32_123 = arith.constant 13 : i32
      %249 = arith.addi %131, %c13_i32_123 : i32
      %250 = arith.index_cast %249 : i32 to index
      %251 = memref.load %arg2[%250] : memref<16xi32, #tpu.memory_space<smem>>
      %c13_i32_124 = arith.constant 13 : i32
      %c0_i32_125 = arith.constant 0 : i32
      %252 = tpu.memref_slice %arg3[%251, %c0_i32_125] : memref<256x128xf32, #tpu.memory_space<any>> -> memref<1x128xf32, #tpu.memory_space<any>>
      %253 = tpu.memref_squeeze %252 : memref<1x128xf32, #tpu.memory_space<any>> -> memref<128xf32, #tpu.memory_space<any>>
      %c0_i32_126 = arith.constant 0 : i32
      %254 = tpu.memref_slice %arg5[%130, %c13_i32_124, %c0_i32_126] : memref<2x16x128xf32, #tpu.memory_space<vmem>> -> memref<1x1x128xf32, #tpu.memory_space<vmem>>
      %255 = tpu.memref_squeeze %254 : memref<1x1x128xf32, #tpu.memory_space<vmem>> -> memref<128xf32, #tpu.memory_space<vmem>>
      %256 = tpu.memref_slice %arg6[%130] : memref<2x!tpu.dma_semaphore, #tpu.memory_space<semaphore_mem>> -> memref<1x!tpu.dma_semaphore, #tpu.memory_space<semaphore_mem>>
      %257 = tpu.memref_squeeze %256 : memref<1x!tpu.dma_semaphore, #tpu.memory_space<semaphore_mem>> -> memref<!tpu.dma_semaphore, #tpu.memory_space<semaphore_mem>>
      tpu.enqueue_dma source(%253 : memref<128xf32, #tpu.memory_space<any>>) target(%255 : memref<128xf32, #tpu.memory_space<vmem>>) target_semaphore(%257 : memref<!tpu.dma_semaphore, #tpu.memory_space<semaphore_mem>>)
      %c14_i32_127 = arith.constant 14 : i32
      %258 = arith.addi %131, %c14_i32_127 : i32
      %259 = arith.index_cast %258 : i32 to index
      %260 = memref.load %arg2[%259] : memref<16xi32, #tpu.memory_space<smem>>
      %c14_i32_128 = arith.constant 14 : i32
      %c0_i32_129 = arith.constant 0 : i32
      %261 = tpu.memref_slice %arg3[%260, %c0_i32_129] : memref<256x128xf32, #tpu.memory_space<any>> -> memref<1x128xf32, #tpu.memory_space<any>>
      %262 = tpu.memref_squeeze %261 : memref<1x128xf32, #tpu.memory_space<any>> -> memref<128xf32, #tpu.memory_space<any>>
      %c0_i32_130 = arith.constant 0 : i32
      %263 = tpu.memref_slice %arg5[%130, %c14_i32_128, %c0_i32_130] : memref<2x16x128xf32, #tpu.memory_space<vmem>> -> memref<1x1x128xf32, #tpu.memory_space<vmem>>
      %264 = tpu.memref_squeeze %263 : memref<1x1x128xf32, #tpu.memory_space<vmem>> -> memref<128xf32, #tpu.memory_space<vmem>>
      %265 = tpu.memref_slice %arg6[%130] : memref<2x!tpu.dma_semaphore, #tpu.memory_space<semaphore_mem>> -> memref<1x!tpu.dma_semaphore, #tpu.memory_space<semaphore_mem>>
      %266 = tpu.memref_squeeze %265 : memref<1x!tpu.dma_semaphore, #tpu.memory_space<semaphore_mem>> -> memref<!tpu.dma_semaphore, #tpu.memory_space<semaphore_mem>>
      tpu.enqueue_dma source(%262 : memref<128xf32, #tpu.memory_space<any>>) target(%264 : memref<128xf32, #tpu.memory_space<vmem>>) target_semaphore(%266 : memref<!tpu.dma_semaphore, #tpu.memory_space<semaphore_mem>>)
      %c15_i32_131 = arith.constant 15 : i32
      %267 = arith.addi %131, %c15_i32_131 : i32
      %268 = arith.index_cast %267 : i32 to index
      %269 = memref.load %arg2[%268] : memref<16xi32, #tpu.memory_space<smem>>
      %c15_i32_132 = arith.constant 15 : i32
      %c0_i32_133 = arith.constant 0 : i32
      %270 = tpu.memref_slice %arg3[%269, %c0_i32_133] : memref<256x128xf32, #tpu.memory_space<any>> -> memref<1x128xf32, #tpu.memory_space<any>>
      %271 = tpu.memref_squeeze %270 : memref<1x128xf32, #tpu.memory_space<any>> -> memref<128xf32, #tpu.memory_space<any>>
      %c0_i32_134 = arith.constant 0 : i32
      %272 = tpu.memref_slice %arg5[%130, %c15_i32_132, %c0_i32_134] : memref<2x16x128xf32, #tpu.memory_space<vmem>> -> memref<1x1x128xf32, #tpu.memory_space<vmem>>
      %273 = tpu.memref_squeeze %272 : memref<1x1x128xf32, #tpu.memory_space<vmem>> -> memref<128xf32, #tpu.memory_space<vmem>>
      %274 = tpu.memref_slice %arg6[%130] : memref<2x!tpu.dma_semaphore, #tpu.memory_space<semaphore_mem>> -> memref<1x!tpu.dma_semaphore, #tpu.memory_space<semaphore_mem>>
      %275 = tpu.memref_squeeze %274 : memref<1x!tpu.dma_semaphore, #tpu.memory_space<semaphore_mem>> -> memref<!tpu.dma_semaphore, #tpu.memory_space<semaphore_mem>>
      tpu.enqueue_dma source(%271 : memref<128xf32, #tpu.memory_space<any>>) target(%273 : memref<128xf32, #tpu.memory_space<vmem>>) target_semaphore(%275 : memref<!tpu.dma_semaphore, #tpu.memory_space<semaphore_mem>>)
    } else {
    }
    %c2_i32 = arith.constant 2 : i32
    %c0_i32_4 = arith.constant 0 : i32
    %9 = arith.cmpi eq, %c2_i32, %c0_i32_4 : i32
    %c1_i32_5 = arith.constant 1 : i32
    %10 = arith.select %9, %c1_i32_5, %c2_i32 : i32
    %11 = arith.remsi %arg1, %10 : i32
    %c0_i32_6 = arith.constant 0 : i32
    %12 = arith.cmpi ne, %11, %c0_i32_6 : i32
    %c0_i32_7 = arith.constant 0 : i32
    %13 = arith.cmpi slt, %11, %c0_i32_7 : i32
    %c0_i32_8 = arith.constant 0 : i32
    %14 = arith.cmpi slt, %10, %c0_i32_8 : i32
    %15 = arith.xori %13, %14 : i1
    %16 = arith.andi %15, %12 : i1
    %17 = arith.addi %11, %10 : i32
    %18 = arith.select %16, %17, %11 : i32
    %c0_i32_9 = arith.constant 0 : i32
    %c0_i32_10 = arith.constant 0 : i32
    %c0_i32_11 = arith.constant 0 : i32
    %19 = tpu.memref_slice %arg3[%c0_i32_9, %c0_i32_11] : memref<256x128xf32, #tpu.memory_space<any>> -> memref<1x128xf32, #tpu.memory_space<any>>
    %20 = tpu.memref_squeeze %19 : memref<1x128xf32, #tpu.memory_space<any>> -> memref<128xf32, #tpu.memory_space<any>>
    %c0_i32_12 = arith.constant 0 : i32
    %21 = tpu.memref_slice %arg5[%18, %c0_i32_10, %c0_i32_12] : memref<2x16x128xf32, #tpu.memory_space<vmem>> -> memref<1x1x128xf32, #tpu.memory_space<vmem>>
    %22 = tpu.memref_squeeze %21 : memref<1x1x128xf32, #tpu.memory_space<vmem>> -> memref<128xf32, #tpu.memory_space<vmem>>
    %23 = tpu.memref_slice %arg6[%18] : memref<2x!tpu.dma_semaphore, #tpu.memory_space<semaphore_mem>> -> memref<1x!tpu.dma_semaphore, #tpu.memory_space<semaphore_mem>>
    %24 = tpu.memref_squeeze %23 : memref<1x!tpu.dma_semaphore, #tpu.memory_space<semaphore_mem>> -> memref<!tpu.dma_semaphore, #tpu.memory_space<semaphore_mem>>
    tpu.wait_dma2 semaphore(%24 : memref<!tpu.dma_semaphore, #tpu.memory_space<semaphore_mem>>) src(%20 : memref<128xf32, #tpu.memory_space<any>>) dst(%22 : memref<128xf32, #tpu.memory_space<vmem>>)
    %c0_i32_13 = arith.constant 0 : i32
    %c1_i32_14 = arith.constant 1 : i32
    %c0_i32_15 = arith.constant 0 : i32
    %25 = tpu.memref_slice %arg3[%c0_i32_13, %c0_i32_15] : memref<256x128xf32, #tpu.memory_space<any>> -> memref<1x128xf32, #tpu.memory_space<any>>
    %26 = tpu.memref_squeeze %25 : memref<1x128xf32, #tpu.memory_space<any>> -> memref<128xf32, #tpu.memory_space<any>>
    %c0_i32_16 = arith.constant 0 : i32
    %27 = tpu.memref_slice %arg5[%18, %c1_i32_14, %c0_i32_16] : memref<2x16x128xf32, #tpu.memory_space<vmem>> -> memref<1x1x128xf32, #tpu.memory_space<vmem>>
    %28 = tpu.memref_squeeze %27 : memref<1x1x128xf32, #tpu.memory_space<vmem>> -> memref<128xf32, #tpu.memory_space<vmem>>
    %29 = tpu.memref_slice %arg6[%18] : memref<2x!tpu.dma_semaphore, #tpu.memory_space<semaphore_mem>> -> memref<1x!tpu.dma_semaphore, #tpu.memory_space<semaphore_mem>>
    %30 = tpu.memref_squeeze %29 : memref<1x!tpu.dma_semaphore, #tpu.memory_space<semaphore_mem>> -> memref<!tpu.dma_semaphore, #tpu.memory_space<semaphore_mem>>
    tpu.wait_dma2 semaphore(%30 : memref<!tpu.dma_semaphore, #tpu.memory_space<semaphore_mem>>) src(%26 : memref<128xf32, #tpu.memory_space<any>>) dst(%28 : memref<128xf32, #tpu.memory_space<vmem>>)
    %c0_i32_17 = arith.constant 0 : i32
    %c2_i32_18 = arith.constant 2 : i32
    %c0_i32_19 = arith.constant 0 : i32
    %31 = tpu.memref_slice %arg3[%c0_i32_17, %c0_i32_19] : memref<256x128xf32, #tpu.memory_space<any>> -> memref<1x128xf32, #tpu.memory_space<any>>
    %32 = tpu.memref_squeeze %31 : memref<1x128xf32, #tpu.memory_space<any>> -> memref<128xf32, #tpu.memory_space<any>>
    %c0_i32_20 = arith.constant 0 : i32
    %33 = tpu.memref_slice %arg5[%18, %c2_i32_18, %c0_i32_20] : memref<2x16x128xf32, #tpu.memory_space<vmem>> -> memref<1x1x128xf32, #tpu.memory_space<vmem>>
    %34 = tpu.memref_squeeze %33 : memref<1x1x128xf32, #tpu.memory_space<vmem>> -> memref<128xf32, #tpu.memory_space<vmem>>
    %35 = tpu.memref_slice %arg6[%18] : memref<2x!tpu.dma_semaphore, #tpu.memory_space<semaphore_mem>> -> memref<1x!tpu.dma_semaphore, #tpu.memory_space<semaphore_mem>>
    %36 = tpu.memref_squeeze %35 : memref<1x!tpu.dma_semaphore, #tpu.memory_space<semaphore_mem>> -> memref<!tpu.dma_semaphore, #tpu.memory_space<semaphore_mem>>
    tpu.wait_dma2 semaphore(%36 : memref<!tpu.dma_semaphore, #tpu.memory_space<semaphore_mem>>) src(%32 : memref<128xf32, #tpu.memory_space<any>>) dst(%34 : memref<128xf32, #tpu.memory_space<vmem>>)
    %c0_i32_21 = arith.constant 0 : i32
    %c3_i32 = arith.constant 3 : i32
    %c0_i32_22 = arith.constant 0 : i32
    %37 = tpu.memref_slice %arg3[%c0_i32_21, %c0_i32_22] : memref<256x128xf32, #tpu.memory_space<any>> -> memref<1x128xf32, #tpu.memory_space<any>>
    %38 = tpu.memref_squeeze %37 : memref<1x128xf32, #tpu.memory_space<any>> -> memref<128xf32, #tpu.memory_space<any>>
    %c0_i32_23 = arith.constant 0 : i32
    %39 = tpu.memref_slice %arg5[%18, %c3_i32, %c0_i32_23] : memref<2x16x128xf32, #tpu.memory_space<vmem>> -> memref<1x1x128xf32, #tpu.memory_space<vmem>>
    %40 = tpu.memref_squeeze %39 : memref<1x1x128xf32, #tpu.memory_space<vmem>> -> memref<128xf32, #tpu.memory_space<vmem>>
    %41 = tpu.memref_slice %arg6[%18] : memref<2x!tpu.dma_semaphore, #tpu.memory_space<semaphore_mem>> -> memref<1x!tpu.dma_semaphore, #tpu.memory_space<semaphore_mem>>
    %42 = tpu.memref_squeeze %41 : memref<1x!tpu.dma_semaphore, #tpu.memory_space<semaphore_mem>> -> memref<!tpu.dma_semaphore, #tpu.memory_space<semaphore_mem>>
    tpu.wait_dma2 semaphore(%42 : memref<!tpu.dma_semaphore, #tpu.memory_space<semaphore_mem>>) src(%38 : memref<128xf32, #tpu.memory_space<any>>) dst(%40 : memref<128xf32, #tpu.memory_space<vmem>>)
    %c0_i32_24 = arith.constant 0 : i32
    %c4_i32 = arith.constant 4 : i32
    %c0_i32_25 = arith.constant 0 : i32
    %43 = tpu.memref_slice %arg3[%c0_i32_24, %c0_i32_25] : memref<256x128xf32, #tpu.memory_space<any>> -> memref<1x128xf32, #tpu.memory_space<any>>
    %44 = tpu.memref_squeeze %43 : memref<1x128xf32, #tpu.memory_space<any>> -> memref<128xf32, #tpu.memory_space<any>>
    %c0_i32_26 = arith.constant 0 : i32
    %45 = tpu.memref_slice %arg5[%18, %c4_i32, %c0_i32_26] : memref<2x16x128xf32, #tpu.memory_space<vmem>> -> memref<1x1x128xf32, #tpu.memory_space<vmem>>
    %46 = tpu.memref_squeeze %45 : memref<1x1x128xf32, #tpu.memory_space<vmem>> -> memref<128xf32, #tpu.memory_space<vmem>>
    %47 = tpu.memref_slice %arg6[%18] : memref<2x!tpu.dma_semaphore, #tpu.memory_space<semaphore_mem>> -> memref<1x!tpu.dma_semaphore, #tpu.memory_space<semaphore_mem>>
    %48 = tpu.memref_squeeze %47 : memref<1x!tpu.dma_semaphore, #tpu.memory_space<semaphore_mem>> -> memref<!tpu.dma_semaphore, #tpu.memory_space<semaphore_mem>>
    tpu.wait_dma2 semaphore(%48 : memref<!tpu.dma_semaphore, #tpu.memory_space<semaphore_mem>>) src(%44 : memref<128xf32, #tpu.memory_space<any>>) dst(%46 : memref<128xf32, #tpu.memory_space<vmem>>)
    %c0_i32_27 = arith.constant 0 : i32
    %c5_i32 = arith.constant 5 : i32
    %c0_i32_28 = arith.constant 0 : i32
    %49 = tpu.memref_slice %arg3[%c0_i32_27, %c0_i32_28] : memref<256x128xf32, #tpu.memory_space<any>> -> memref<1x128xf32, #tpu.memory_space<any>>
    %50 = tpu.memref_squeeze %49 : memref<1x128xf32, #tpu.memory_space<any>> -> memref<128xf32, #tpu.memory_space<any>>
    %c0_i32_29 = arith.constant 0 : i32
    %51 = tpu.memref_slice %arg5[%18, %c5_i32, %c0_i32_29] : memref<2x16x128xf32, #tpu.memory_space<vmem>> -> memref<1x1x128xf32, #tpu.memory_space<vmem>>
    %52 = tpu.memref_squeeze %51 : memref<1x1x128xf32, #tpu.memory_space<vmem>> -> memref<128xf32, #tpu.memory_space<vmem>>
    %53 = tpu.memref_slice %arg6[%18] : memref<2x!tpu.dma_semaphore, #tpu.memory_space<semaphore_mem>> -> memref<1x!tpu.dma_semaphore, #tpu.memory_space<semaphore_mem>>
    %54 = tpu.memref_squeeze %53 : memref<1x!tpu.dma_semaphore, #tpu.memory_space<semaphore_mem>> -> memref<!tpu.dma_semaphore, #tpu.memory_space<semaphore_mem>>
    tpu.wait_dma2 semaphore(%54 : memref<!tpu.dma_semaphore, #tpu.memory_space<semaphore_mem>>) src(%50 : memref<128xf32, #tpu.memory_space<any>>) dst(%52 : memref<128xf32, #tpu.memory_space<vmem>>)
    %c0_i32_30 = arith.constant 0 : i32
    %c6_i32 = arith.constant 6 : i32
    %c0_i32_31 = arith.constant 0 : i32
    %55 = tpu.memref_slice %arg3[%c0_i32_30, %c0_i32_31] : memref<256x128xf32, #tpu.memory_space<any>> -> memref<1x128xf32, #tpu.memory_space<any>>
    %56 = tpu.memref_squeeze %55 : memref<1x128xf32, #tpu.memory_space<any>> -> memref<128xf32, #tpu.memory_space<any>>
    %c0_i32_32 = arith.constant 0 : i32
    %57 = tpu.memref_slice %arg5[%18, %c6_i32, %c0_i32_32] : memref<2x16x128xf32, #tpu.memory_space<vmem>> -> memref<1x1x128xf32, #tpu.memory_space<vmem>>
    %58 = tpu.memref_squeeze %57 : memref<1x1x128xf32, #tpu.memory_space<vmem>> -> memref<128xf32, #tpu.memory_space<vmem>>
    %59 = tpu.memref_slice %arg6[%18] : memref<2x!tpu.dma_semaphore, #tpu.memory_space<semaphore_mem>> -> memref<1x!tpu.dma_semaphore, #tpu.memory_space<semaphore_mem>>
    %60 = tpu.memref_squeeze %59 : memref<1x!tpu.dma_semaphore, #tpu.memory_space<semaphore_mem>> -> memref<!tpu.dma_semaphore, #tpu.memory_space<semaphore_mem>>
    tpu.wait_dma2 semaphore(%60 : memref<!tpu.dma_semaphore, #tpu.memory_space<semaphore_mem>>) src(%56 : memref<128xf32, #tpu.memory_space<any>>) dst(%58 : memref<128xf32, #tpu.memory_space<vmem>>)
    %c0_i32_33 = arith.constant 0 : i32
    %c7_i32 = arith.constant 7 : i32
    %c0_i32_34 = arith.constant 0 : i32
    %61 = tpu.memref_slice %arg3[%c0_i32_33, %c0_i32_34] : memref<256x128xf32, #tpu.memory_space<any>> -> memref<1x128xf32, #tpu.memory_space<any>>
    %62 = tpu.memref_squeeze %61 : memref<1x128xf32, #tpu.memory_space<any>> -> memref<128xf32, #tpu.memory_space<any>>
    %c0_i32_35 = arith.constant 0 : i32
    %63 = tpu.memref_slice %arg5[%18, %c7_i32, %c0_i32_35] : memref<2x16x128xf32, #tpu.memory_space<vmem>> -> memref<1x1x128xf32, #tpu.memory_space<vmem>>
    %64 = tpu.memref_squeeze %63 : memref<1x1x128xf32, #tpu.memory_space<vmem>> -> memref<128xf32, #tpu.memory_space<vmem>>
    %65 = tpu.memref_slice %arg6[%18] : memref<2x!tpu.dma_semaphore, #tpu.memory_space<semaphore_mem>> -> memref<1x!tpu.dma_semaphore, #tpu.memory_space<semaphore_mem>>
    %66 = tpu.memref_squeeze %65 : memref<1x!tpu.dma_semaphore, #tpu.memory_space<semaphore_mem>> -> memref<!tpu.dma_semaphore, #tpu.memory_space<semaphore_mem>>
    tpu.wait_dma2 semaphore(%66 : memref<!tpu.dma_semaphore, #tpu.memory_space<semaphore_mem>>) src(%62 : memref<128xf32, #tpu.memory_space<any>>) dst(%64 : memref<128xf32, #tpu.memory_space<vmem>>)
    %c0_i32_36 = arith.constant 0 : i32
    %c8_i32 = arith.constant 8 : i32
    %c0_i32_37 = arith.constant 0 : i32
    %67 = tpu.memref_slice %arg3[%c0_i32_36, %c0_i32_37] : memref<256x128xf32, #tpu.memory_space<any>> -> memref<1x128xf32, #tpu.memory_space<any>>
    %68 = tpu.memref_squeeze %67 : memref<1x128xf32, #tpu.memory_space<any>> -> memref<128xf32, #tpu.memory_space<any>>
    %c0_i32_38 = arith.constant 0 : i32
    %69 = tpu.memref_slice %arg5[%18, %c8_i32, %c0_i32_38] : memref<2x16x128xf32, #tpu.memory_space<vmem>> -> memref<1x1x128xf32, #tpu.memory_space<vmem>>
    %70 = tpu.memref_squeeze %69 : memref<1x1x128xf32, #tpu.memory_space<vmem>> -> memref<128xf32, #tpu.memory_space<vmem>>
    %71 = tpu.memref_slice %arg6[%18] : memref<2x!tpu.dma_semaphore, #tpu.memory_space<semaphore_mem>> -> memref<1x!tpu.dma_semaphore, #tpu.memory_space<semaphore_mem>>
    %72 = tpu.memref_squeeze %71 : memref<1x!tpu.dma_semaphore, #tpu.memory_space<semaphore_mem>> -> memref<!tpu.dma_semaphore, #tpu.memory_space<semaphore_mem>>
    tpu.wait_dma2 semaphore(%72 : memref<!tpu.dma_semaphore, #tpu.memory_space<semaphore_mem>>) src(%68 : memref<128xf32, #tpu.memory_space<any>>) dst(%70 : memref<128xf32, #tpu.memory_space<vmem>>)
    %c0_i32_39 = arith.constant 0 : i32
    %c9_i32 = arith.constant 9 : i32
    %c0_i32_40 = arith.constant 0 : i32
    %73 = tpu.memref_slice %arg3[%c0_i32_39, %c0_i32_40] : memref<256x128xf32, #tpu.memory_space<any>> -> memref<1x128xf32, #tpu.memory_space<any>>
    %74 = tpu.memref_squeeze %73 : memref<1x128xf32, #tpu.memory_space<any>> -> memref<128xf32, #tpu.memory_space<any>>
    %c0_i32_41 = arith.constant 0 : i32
    %75 = tpu.memref_slice %arg5[%18, %c9_i32, %c0_i32_41] : memref<2x16x128xf32, #tpu.memory_space<vmem>> -> memref<1x1x128xf32, #tpu.memory_space<vmem>>
    %76 = tpu.memref_squeeze %75 : memref<1x1x128xf32, #tpu.memory_space<vmem>> -> memref<128xf32, #tpu.memory_space<vmem>>
    %77 = tpu.memref_slice %arg6[%18] : memref<2x!tpu.dma_semaphore, #tpu.memory_space<semaphore_mem>> -> memref<1x!tpu.dma_semaphore, #tpu.memory_space<semaphore_mem>>
    %78 = tpu.memref_squeeze %77 : memref<1x!tpu.dma_semaphore, #tpu.memory_space<semaphore_mem>> -> memref<!tpu.dma_semaphore, #tpu.memory_space<semaphore_mem>>
    tpu.wait_dma2 semaphore(%78 : memref<!tpu.dma_semaphore, #tpu.memory_space<semaphore_mem>>) src(%74 : memref<128xf32, #tpu.memory_space<any>>) dst(%76 : memref<128xf32, #tpu.memory_space<vmem>>)
    %c0_i32_42 = arith.constant 0 : i32
    %c10_i32 = arith.constant 10 : i32
    %c0_i32_43 = arith.constant 0 : i32
    %79 = tpu.memref_slice %arg3[%c0_i32_42, %c0_i32_43] : memref<256x128xf32, #tpu.memory_space<any>> -> memref<1x128xf32, #tpu.memory_space<any>>
    %80 = tpu.memref_squeeze %79 : memref<1x128xf32, #tpu.memory_space<any>> -> memref<128xf32, #tpu.memory_space<any>>
    %c0_i32_44 = arith.constant 0 : i32
    %81 = tpu.memref_slice %arg5[%18, %c10_i32, %c0_i32_44] : memref<2x16x128xf32, #tpu.memory_space<vmem>> -> memref<1x1x128xf32, #tpu.memory_space<vmem>>
    %82 = tpu.memref_squeeze %81 : memref<1x1x128xf32, #tpu.memory_space<vmem>> -> memref<128xf32, #tpu.memory_space<vmem>>
    %83 = tpu.memref_slice %arg6[%18] : memref<2x!tpu.dma_semaphore, #tpu.memory_space<semaphore_mem>> -> memref<1x!tpu.dma_semaphore, #tpu.memory_space<semaphore_mem>>
    %84 = tpu.memref_squeeze %83 : memref<1x!tpu.dma_semaphore, #tpu.memory_space<semaphore_mem>> -> memref<!tpu.dma_semaphore, #tpu.memory_space<semaphore_mem>>
    tpu.wait_dma2 semaphore(%84 : memref<!tpu.dma_semaphore, #tpu.memory_space<semaphore_mem>>) src(%80 : memref<128xf32, #tpu.memory_space<any>>) dst(%82 : memref<128xf32, #tpu.memory_space<vmem>>)
    %c0_i32_45 = arith.constant 0 : i32
    %c11_i32 = arith.constant 11 : i32
    %c0_i32_46 = arith.constant 0 : i32
    %85 = tpu.memref_slice %arg3[%c0_i32_45, %c0_i32_46] : memref<256x128xf32, #tpu.memory_space<any>> -> memref<1x128xf32, #tpu.memory_space<any>>
    %86 = tpu.memref_squeeze %85 : memref<1x128xf32, #tpu.memory_space<any>> -> memref<128xf32, #tpu.memory_space<any>>
    %c0_i32_47 = arith.constant 0 : i32
    %87 = tpu.memref_slice %arg5[%18, %c11_i32, %c0_i32_47] : memref<2x16x128xf32, #tpu.memory_space<vmem>> -> memref<1x1x128xf32, #tpu.memory_space<vmem>>
    %88 = tpu.memref_squeeze %87 : memref<1x1x128xf32, #tpu.memory_space<vmem>> -> memref<128xf32, #tpu.memory_space<vmem>>
    %89 = tpu.memref_slice %arg6[%18] : memref<2x!tpu.dma_semaphore, #tpu.memory_space<semaphore_mem>> -> memref<1x!tpu.dma_semaphore, #tpu.memory_space<semaphore_mem>>
    %90 = tpu.memref_squeeze %89 : memref<1x!tpu.dma_semaphore, #tpu.memory_space<semaphore_mem>> -> memref<!tpu.dma_semaphore, #tpu.memory_space<semaphore_mem>>
    tpu.wait_dma2 semaphore(%90 : memref<!tpu.dma_semaphore, #tpu.memory_space<semaphore_mem>>) src(%86 : memref<128xf32, #tpu.memory_space<any>>) dst(%88 : memref<128xf32, #tpu.memory_space<vmem>>)
    %c0_i32_48 = arith.constant 0 : i32
    %c12_i32 = arith.constant 12 : i32
    %c0_i32_49 = arith.constant 0 : i32
    %91 = tpu.memref_slice %arg3[%c0_i32_48, %c0_i32_49] : memref<256x128xf32, #tpu.memory_space<any>> -> memref<1x128xf32, #tpu.memory_space<any>>
    %92 = tpu.memref_squeeze %91 : memref<1x128xf32, #tpu.memory_space<any>> -> memref<128xf32, #tpu.memory_space<any>>
    %c0_i32_50 = arith.constant 0 : i32
    %93 = tpu.memref_slice %arg5[%18, %c12_i32, %c0_i32_50] : memref<2x16x128xf32, #tpu.memory_space<vmem>> -> memref<1x1x128xf32, #tpu.memory_space<vmem>>
    %94 = tpu.memref_squeeze %93 : memref<1x1x128xf32, #tpu.memory_space<vmem>> -> memref<128xf32, #tpu.memory_space<vmem>>
    %95 = tpu.memref_slice %arg6[%18] : memref<2x!tpu.dma_semaphore, #tpu.memory_space<semaphore_mem>> -> memref<1x!tpu.dma_semaphore, #tpu.memory_space<semaphore_mem>>
    %96 = tpu.memref_squeeze %95 : memref<1x!tpu.dma_semaphore, #tpu.memory_space<semaphore_mem>> -> memref<!tpu.dma_semaphore, #tpu.memory_space<semaphore_mem>>
    tpu.wait_dma2 semaphore(%96 : memref<!tpu.dma_semaphore, #tpu.memory_space<semaphore_mem>>) src(%92 : memref<128xf32, #tpu.memory_space<any>>) dst(%94 : memref<128xf32, #tpu.memory_space<vmem>>)
    %c0_i32_51 = arith.constant 0 : i32
    %c13_i32 = arith.constant 13 : i32
    %c0_i32_52 = arith.constant 0 : i32
    %97 = tpu.memref_slice %arg3[%c0_i32_51, %c0_i32_52] : memref<256x128xf32, #tpu.memory_space<any>> -> memref<1x128xf32, #tpu.memory_space<any>>
    %98 = tpu.memref_squeeze %97 : memref<1x128xf32, #tpu.memory_space<any>> -> memref<128xf32, #tpu.memory_space<any>>
    %c0_i32_53 = arith.constant 0 : i32
    %99 = tpu.memref_slice %arg5[%18, %c13_i32, %c0_i32_53] : memref<2x16x128xf32, #tpu.memory_space<vmem>> -> memref<1x1x128xf32, #tpu.memory_space<vmem>>
    %100 = tpu.memref_squeeze %99 : memref<1x1x128xf32, #tpu.memory_space<vmem>> -> memref<128xf32, #tpu.memory_space<vmem>>
    %101 = tpu.memref_slice %arg6[%18] : memref<2x!tpu.dma_semaphore, #tpu.memory_space<semaphore_mem>> -> memref<1x!tpu.dma_semaphore, #tpu.memory_space<semaphore_mem>>
    %102 = tpu.memref_squeeze %101 : memref<1x!tpu.dma_semaphore, #tpu.memory_space<semaphore_mem>> -> memref<!tpu.dma_semaphore, #tpu.memory_space<semaphore_mem>>
    tpu.wait_dma2 semaphore(%102 : memref<!tpu.dma_semaphore, #tpu.memory_space<semaphore_mem>>) src(%98 : memref<128xf32, #tpu.memory_space<any>>) dst(%100 : memref<128xf32, #tpu.memory_space<vmem>>)
    %c0_i32_54 = arith.constant 0 : i32
    %c14_i32 = arith.constant 14 : i32
    %c0_i32_55 = arith.constant 0 : i32
    %103 = tpu.memref_slice %arg3[%c0_i32_54, %c0_i32_55] : memref<256x128xf32, #tpu.memory_space<any>> -> memref<1x128xf32, #tpu.memory_space<any>>
    %104 = tpu.memref_squeeze %103 : memref<1x128xf32, #tpu.memory_space<any>> -> memref<128xf32, #tpu.memory_space<any>>
    %c0_i32_56 = arith.constant 0 : i32
    %105 = tpu.memref_slice %arg5[%18, %c14_i32, %c0_i32_56] : memref<2x16x128xf32, #tpu.memory_space<vmem>> -> memref<1x1x128xf32, #tpu.memory_space<vmem>>
    %106 = tpu.memref_squeeze %105 : memref<1x1x128xf32, #tpu.memory_space<vmem>> -> memref<128xf32, #tpu.memory_space<vmem>>
    %107 = tpu.memref_slice %arg6[%18] : memref<2x!tpu.dma_semaphore, #tpu.memory_space<semaphore_mem>> -> memref<1x!tpu.dma_semaphore, #tpu.memory_space<semaphore_mem>>
    %108 = tpu.memref_squeeze %107 : memref<1x!tpu.dma_semaphore, #tpu.memory_space<semaphore_mem>> -> memref<!tpu.dma_semaphore, #tpu.memory_space<semaphore_mem>>
    tpu.wait_dma2 semaphore(%108 : memref<!tpu.dma_semaphore, #tpu.memory_space<semaphore_mem>>) src(%104 : memref<128xf32, #tpu.memory_space<any>>) dst(%106 : memref<128xf32, #tpu.memory_space<vmem>>)
    %c0_i32_57 = arith.constant 0 : i32
    %c15_i32 = arith.constant 15 : i32
    %c0_i32_58 = arith.constant 0 : i32
    %109 = tpu.memref_slice %arg3[%c0_i32_57, %c0_i32_58] : memref<256x128xf32, #tpu.memory_space<any>> -> memref<1x128xf32, #tpu.memory_space<any>>
    %110 = tpu.memref_squeeze %109 : memref<1x128xf32, #tpu.memory_space<any>> -> memref<128xf32, #tpu.memory_space<any>>
    %c0_i32_59 = arith.constant 0 : i32
    %111 = tpu.memref_slice %arg5[%18, %c15_i32, %c0_i32_59] : memref<2x16x128xf32, #tpu.memory_space<vmem>> -> memref<1x1x128xf32, #tpu.memory_space<vmem>>
    %112 = tpu.memref_squeeze %111 : memref<1x1x128xf32, #tpu.memory_space<vmem>> -> memref<128xf32, #tpu.memory_space<vmem>>
    %113 = tpu.memref_slice %arg6[%18] : memref<2x!tpu.dma_semaphore, #tpu.memory_space<semaphore_mem>> -> memref<1x!tpu.dma_semaphore, #tpu.memory_space<semaphore_mem>>
    %114 = tpu.memref_squeeze %113 : memref<1x!tpu.dma_semaphore, #tpu.memory_space<semaphore_mem>> -> memref<!tpu.dma_semaphore, #tpu.memory_space<semaphore_mem>>
    tpu.wait_dma2 semaphore(%114 : memref<!tpu.dma_semaphore, #tpu.memory_space<semaphore_mem>>) src(%110 : memref<128xf32, #tpu.memory_space<any>>) dst(%112 : memref<128xf32, #tpu.memory_space<vmem>>)
    %115 = arith.index_cast %18 : i32 to index
    %c0 = arith.constant 0 : index
    %c0_60 = arith.constant 0 : index
    %116 = vector.load %arg5[%115, %c0, %c0_60] : memref<2x16x128xf32, #tpu.memory_space<vmem>>, vector<1x16x128xf32>
    %117 = vector.shape_cast %116 : vector<1x16x128xf32> to vector<16x128xf32>
    %c0_61 = arith.constant 0 : index
    %c0_62 = arith.constant 0 : index
    %118 = vector.load %arg4[%c0_61, %c0_62] : memref<16x128xf32, #tpu.memory_space<vmem>>, vector<16x128xf32>
    tpu.vector_store %arg4[%c0_61, %c0_62], %117 {strides = array<i32>} : memref<16x128xf32, #tpu.memory_space<vmem>>, vector<16x128xf32>,
    return
  }
  func.func @transform_1(%arg0: i32, %arg1: i32, %arg2: memref<16xi32, #tpu.memory_space<smem>>) -> (i32, i32) {
    %c1_i32 = arith.constant 1 : i32
    %0 = arith.muli %arg0, %c1_i32 : i32
    %1 = arith.addi %0, %arg1 : i32
    %c0_i32 = arith.constant 0 : i32
    %c0_i32_0 = arith.constant 0 : i32
    return %1, %c0_i32 : i32, i32
  }
}

</mosaic_0001>

<bundles_post_ra>
// kernel: _lambda_.3
= control target key start
LH: loop header
LB: loop body
LE: loop exit
PB: predicated region body
PF: predicated region fallthrough
CT: control target
= control target key end

     0   :  { %s2316_s0 = inlined_call_operand.vmem [shape: s32[16], index: 0, kind: input, shape index: {}]   ;;  %s2317_s1 = inlined_call_operand.vmem [shape: f32[256,128], index: 1, kind: input, shape index: {}]   ;;  %s2318_s2 = inlined_call_operand.hbm [shape: f32[16,128], index: 2, kind: output, shape index: {}]  }
   0x1   :  { %s7_s11 = sshll.u32 %s2316_s0, 4  ;;  %s8_s11 = int_to_ptr.vmem [resolvable:$true] %s7_s11 }
   0x2   :  { %s2205_s12 = scalar_lea.vmem %s8_s11, 16  ;;  %p2210_p1 = scmp.lt.s32.totalorder %s8_s11, %s8_s11 }
   0x3   :  { %p2206_p0 = scmp.ne.s32.totalorder %s8_s11, %s2205_s12  ;;  %p2211_p2 = scmp.lt.s32.totalorder %s2205_s12, %s2205_s12 }
   0x5   :  { %p2212_p3 = por %p2211_p2, %p2210_p1 }
   0x7   :  { %p2213_p4 = pnand %p2212_p3, %p2206_p0 }
   0x9   :  { %2216 = shalt.err (!%p2213_p4)  }
   0xa   :  { %s2243_s13 = smov [#allocation5]  }
   0xb   :  { %10 = dma.vmem_to_smem %s8_s11, 16, %s2243_s13, [#allocation4] }
   0xc   :  { %2237 = dma.done.wait [#allocation4], 16 }
   0xd   :  { %2238 = vsyncadd [#allocation4], 4294967280 }
   0xe   :  { %12 = sfence }
   0xf   :  { %13 = vsyncpa [#allocation7], 0  ;;  %s22_s14 = sld [smem:[#allocation5]] }
  0x15   :  { %s23_s17 = scalar_lea.vmem %s2317_s1, %s22_s14 }
  0x16   :  { %v42_v0 = vld [vmem:[%s23_s17] sm:$0x1] }
  0x17   :  { %43 = vst [vmem:[#allocation2] sm:$0x1] %v42_v0 }
  0x18   :  { %69 = vsyncadd [#allocation3], 16  ;;  %s2168_s0 = sld [smem:[#allocation5 + $0x1]] }
  0x1e   :  { %s72_s20 = scalar_lea.vmem %s2317_s1, %s2168_s0 }
  0x1f   :  { %v92_v1 = vld [vmem:[%s72_s20] sm:$0x1] }
  0x20   :  { %93 = vst [vmem:[#allocation2 + $0x1] sm:$0x1] %v92_v1 }
  0x21   :  { %119 = vsyncadd [#allocation3], 16  ;;  %s2169_s21 = sld [smem:[#allocation5 + $0x2]] }
  0x27   :  { %s122_s24 = scalar_lea.vmem %s2317_s1, %s2169_s21 }
  0x28   :  { %v142_v2 = vld [vmem:[%s122_s24] sm:$0x1] }
  0x29   :  { %143 = vst [vmem:[#allocation2 + $0x2] sm:$0x1] %v142_v2 }
  0x2a   :  { %169 = vsyncadd [#allocation3], 16  ;;  %s2170_s25 = sld [smem:[#allocation5 + $0x3]] }
  0x30   :  { %s172_s28 = scalar_lea.vmem %s2317_s1, %s2170_s25 }
  0x31   :  { %v192_v3 = vld [vmem:[%s172_s28] sm:$0x1] }
  0x32   :  { %193 = vst [vmem:[#allocation2 + $0x3] sm:$0x1] %v192_v3 }
  0x33   :  { %219 = vsyncadd [#allocation3], 16  ;;  %s2171_s29 = sld [smem:[#allocation5 + $0x4]] }
  0x39   :  { %s222_s4 = scalar_lea.vmem %s2317_s1, %s2171_s29 }
  0x3a   :  { %v242_v4 = vld [vmem:[%s222_s4] sm:$0x1] }
  0x3b   :  { %243 = vst [vmem:[#allocation2 + $0x4] sm:$0x1] %v242_v4 }
  0x3c   :  { %269 = vsyncadd [#allocation3], 16  ;;  %s2172_s5 = sld [smem:[#allocation5 + $0x5]] }
  0x42   :  { %s272_s8 = scalar_lea.vmem %s2317_s1, %s2172_s5 }
  0x43   :  { %v292_v5 = vld [vmem:[%s272_s8] sm:$0x1] }
  0x44   :  { %293 = vst [vmem:[#allocation2 + $0x5] sm:$0x1] %v292_v5 }
  0x45   :  { %319 = vsyncadd [#allocation3], 16  ;;  %s2173_s9 = sld [smem:[#allocation5 + $0x6]] }
  0x4b   :  { %s322_s12 = scalar_lea.vmem %s2317_s1, %s2173_s9 }
  0x4c   :  { %v342_v6 = vld [vmem:[%s322_s12] sm:$0x1] }
  0x4d   :  { %343 = vst [vmem:[#allocation2 + $0x6] sm:$0x1] %v342_v6 }
  0x4e   :  { %369 = vsyncadd [#allocation3], 16  ;;  %s2174_s13 = sld [smem:[#allocation5 + $0x7]] }
  0x54   :  { %s372_s16 = scalar_lea.vmem %s2317_s1, %s2174_s13 }
  0x55   :  { %v392_v7 = vld [vmem:[%s372_s16] sm:$0x1] }
  0x56   :  { %393 = vst [vmem:[#allocation2 + $0x7] sm:$0x1] %v392_v7 }
  0x57   :  { %419 = vsyncadd [#allocation3], 16  ;;  %s2175_s17 = sld [smem:[#allocation5 + $0x8]] }
  0x5d   :  { %s422_s19 = scalar_lea.vmem %s2317_s1, %s2175_s17 }
  0x5e   :  { %v442_v8 = vld [vmem:[%s422_s19] sm:$0x1] }
  0x5f   :  { %443 = vst [vmem:[#allocation2 + $0x8] sm:$0x1] %v442_v8 }
  0x60   :  { %469 = vsyncadd [#allocation3], 16  ;;  %s2176_s20 = sld [smem:[#allocation5 + $0x9]] }
  0x66   :  { %s472_s23 = scalar_lea.vmem %s2317_s1, %s2176_s20 }
  0x67   :  { %v492_v9 = vld [vmem:[%s472_s23] sm:$0x1] }
  0x68   :  { %493 = vst [vmem:[#allocation2 + $0x9] sm:$0x1] %v492_v9 }
  0x69   :  { %519 = vsyncadd [#allocation3], 16  ;;  %s2177_s24 = sld [smem:[#allocation5 + $0xa]] }
  0x6f   :  { %s522_s27 = scalar_lea.vmem %s2317_s1, %s2177_s24 }
  0x70   :  { %v542_v10 = vld [vmem:[%s522_s27] sm:$0x1] }
  0x71   :  { %543 = vst [vmem:[#allocation2 + $0xa] sm:$0x1] %v542_v10 }
  0x72   :  { %569 = vsyncadd [#allocation3], 16  ;;  %s2178_s28 = sld [smem:[#allocation5 + $0xb]] }
  0x78   :  { %s572_s3 = scalar_lea.vmem %s2317_s1, %s2178_s28 }
  0x79   :  { %v592_v11 = vld [vmem:[%s572_s3] sm:$0x1] }
  0x7a   :  { %593 = vst [vmem:[#allocation2 + $0xb] sm:$0x1] %v592_v11 }
  0x7b   :  { %619 = vsyncadd [#allocation3], 16  ;;  %s2179_s4 = sld [smem:[#allocation5 + $0xc]] }
  0x81   :  { %s622_s7 = scalar_lea.vmem %s2317_s1, %s2179_s4 }
  0x82   :  { %v642_v12 = vld [vmem:[%s622_s7] sm:$0x1] }
  0x83   :  { %643 = vst [vmem:[#allocation2 + $0xc] sm:$0x1] %v642_v12 }
  0x84   :  { %669 = vsyncadd [#allocation3], 16  ;;  %s2180_s8 = sld [smem:[#allocation5 + $0xd]] }
  0x8a   :  { %s672_s11 = scalar_lea.vmem %s2317_s1, %s2180_s8 }
  0x8b   :  { %v692_v13 = vld [vmem:[%s672_s11] sm:$0x1] }
  0x8c   :  { %693 = vst [vmem:[#allocation2 + $0xd] sm:$0x1] %v692_v13 }
  0x8d   :  { %719 = vsyncadd [#allocation3], 16  ;;  %s2181_s12 = sld [smem:[#allocation5 + $0xe]] }
  0x93   :  { %s722_s15 = scalar_lea.vmem %s2317_s1, %s2181_s12 }
  0x94   :  { %v742_v14 = vld [vmem:[%s722_s15] sm:$0x1] }
  0x95   :  { %743 = vst [vmem:[#allocation2 + $0xe] sm:$0x1] %v742_v14 }
  0x96   :  { %769 = vsyncadd [#allocation3], 16  ;;  %s2182_s16 = sld [smem:[#allocation5 + $0xf]] }
  0x9c   :  { %s772_s18 = scalar_lea.vmem %s2317_s1, %s2182_s16 }
  0x9d   :  { %v792_v15 = vld [vmem:[%s772_s18] sm:$0x1] }
  0x9e   :  { %793 = vst [vmem:[#allocation2 + $0xf] sm:$0x1] %v792_v15 }
  0x9f   :  { %819 = vsyncadd [#allocation3], 16 }
  0xa0   :  { %2239 = dma.done.wait [#allocation3], 256 }
  0xa1   :  { %2240 = vsyncadd [#allocation3], 4294967040  ;;  %s2244_s19 = smov [#allocation6]   ;;  %v1698_v16 = vld [vmem:[#allocation2] sm:$0xff] }
  0xa2   :  { %s1711_s20 = sshll.u32 %s2244_s19, 4  ;;  %1700 = vst [vmem:[#allocation6] sm:$0xff] %v1698_v16  ;;  %s1712_s20 = int_to_ptr.vmem [resolvable:$true] %s1711_s20 }
  0xa3   :  { %s2217_s21 = scalar_lea.vmem %s1712_s20, 256  ;;  %p2222_p6 = scmp.lt.s32.totalorder %s1712_s20, %s1712_s20 }
  0xa4   :  { %p2218_p5 = scmp.ne.s32.totalorder %s1712_s20, %s2217_s21  ;;  %p2223_p7 = scmp.lt.s32.totalorder %s2217_s21, %s2217_s21 }
  0xa5   :  { %v1699_v17 = vld [vmem:[#allocation2 + $0x8] sm:$0xff] }
  0xa6   :  { %1701 = vst [vmem:[#allocation6 + $0x8] sm:$0xff] %v1699_v17  ;;  %p2224_p8 = por %p2223_p7, %p2222_p6 }
  0xa8   :  { %p2225_p9 = pnand %p2224_p8, %p2218_p5 }
  0xaa   :  { %2228 = shalt.err (!%p2225_p9)
}
  0xab   :  { %s2245_s1 = smov 128   ;;  %s2246_s22 = smov 8  }
  0xac   :  { %1717 = dma.vmem_to_hbm [thread:$0]  %s1712_s20, 256, %s2318_s2, [#allocation7], %s2245_s1, %s2245_s1, %s2246_s22  }
  0xad   :  { %2241 = dma.done.wait [#allocation7], 256  }
  0xae   :  { %2242 = vsyncadd [#allocation7], 4294967040 }
  0xaf   :  { %1721 = vsyncpa [#allocation7], 1 }
  0xb0   :  { %1722 = vsyncmov [#allocation3] }
  0xb3   :  { %s1723_s25 = vpop.sfrf %1722 }
  0xb4   :  { %p2199_p10 = scmp.ne.s32.totalorder %s1723_s25, 0 }
  0xb6   :  { %1727 = shalt.err (%p2199_p10)  }
  0xb7   :  { %1729 = vsyncmov [#allocation3 + $0x1] }
  0xba   :  { %s1730_s26 = vpop.sfrf %1729 }
  0xbb   :  { %p2200_p11 = scmp.ne.s32.totalorder %s1730_s26, 0 }
  0xbd   :  { %1734 = shalt.err (%p2200_p11)  }

// kernel: _lambda_.2
= control target key start
LH: loop header
LB: loop body
LE: loop exit
PB: predicated region body
PF: predicated region fallthrough
CT: control target
= control target key end

     0   :  { %8 = vsyncpa [#allocation3], 0  ;;  %s2465_s0 = inlined_call_operand.vmem [shape: f32[4,128], index: 0, kind: input, shape index: {}]   ;;  %s2466_s1 = inlined_call_operand.hbm [shape: f32[256,128], index: 1, kind: input, shape index: {}]   ;;  %s2467_s2 = inlined_call_operand.hbm [shape: bf16[256,128], index: 2, kind: input, shape index: {}]   ;;  %s2468_s3 = inlined_call_operand.vmem [shape: f32[256,128], index: 3, kind: output, shape index: {}]  }
   0x1   :  { %9 = vsyncpa [#allocation5], 0  ;;  %s1691_s12 = smov [#allocation2]  }
   0x2   :  { %s17_s13 = sshll.u32 %s1691_s12, 4  ;;  %s18_s13 = int_to_ptr.vmem [resolvable:$true] %s17_s13 }
   0x3   :  { %s1655_s14 = scalar_lea.vmem %s18_s13, 4096  ;;  %p1660_p1 = scmp.lt.s32.totalorder %s18_s13, %s18_s13 }
   0x4   :  { %p1656_p0 = scmp.ne.s32.totalorder %s18_s13, %s1655_s14  ;;  %p1661_p2 = scmp.lt.s32.totalorder %s1655_s14, %s1655_s14 }
   0x6   :  { %p1662_p3 = por %p1661_p2, %p1660_p1 }
   0x8   :  { %p1663_p4 = pnand %p1662_p3, %p1656_p0 }
   0xa   :  { %1666 = shalt.err (!%p1663_p4)
}
   0xb   :  { %s1692_s15 = smov 128   ;;  %s1693_s16 = smov 8  }
   0xc   :  { %23 = dma.hbm_to_vmem [thread:$0]  %s2466_s1, 4096, %s18_s13, [#allocation3], %s1692_s15, %s1692_s15, %s1693_s16  }
   0xd   :  { %s1694_s19 = smov [#allocation4]  }
   0xe   :  { %s29_s20 = sshll.u32 %s1694_s19, 4  ;;  %s30_s20 = int_to_ptr.vmem [resolvable:$true] %s29_s20 }
   0xf   :  { %s1675_s21 = scalar_lea.vmem %s30_s20, 2048  ;;  %p1680_p6 = scmp.lt.s32.totalorder %s30_s20, %s30_s20 }
  0x10   :  { %p1676_p5 = scmp.ne.s32.totalorder %s30_s20, %s1675_s21  ;;  %p1681_p7 = scmp.lt.s32.totalorder %s1675_s21, %s1675_s21 }
  0x12   :  { %p1682_p8 = por %p1681_p7, %p1680_p6 }
  0x14   :  { %p1683_p9 = pnand %p1682_p8, %p1676_p5 }
  0x16   :  { %1686 = shalt.err (!%p1683_p9)
}
  0x17   :  { %s1695_s22 = smov 64   ;;  %s1696_s23 = smov 4  }
  0x18   :  { %35 = dma.hbm_to_vmem [thread:$0]  %s2467_s2, 2048, %s30_s20, [#allocation5], %s1695_s22, %s1695_s22, %s1696_s23  }
  0x19   :  { %1687 = dma.done.wait [#allocation3], 4096  }
  0x1a   :  { %1688 = vsyncadd [#allocation3], 4294963200 }
  0x1b   :  { %1689 = dma.done.wait [#allocation5], 2048  }
  0x1c   :  { %1690 = vsyncadd [#allocation5], 4294965248  ;;  %v1375_v0 = vld [vmem:[#allocation4 + $0x78] sm:$0xff]   ;;  %v1377_v2 = vld [vmem:[#allocation4 + $0x70] sm:$0xff]  }
  0x1d   :  { %v1376_v1 = vld [vmem:[#allocation4 + $0x38] sm:$0xff]   ;;  %1209 = vmatprep.subr.bf16.mxu0 %v1375_v0  ;;  %1257 = vmatprep.subr.bf16.mxu1 %v1375_v0  ;;  %v1378_v3 = vld [vmem:[#allocation4 + $0x30] sm:$0xff]   ;;  %v1379_v4 = vld [vmem:[#allocation4 + $0x68] sm:$0xff]  }
  0x1e   :  { %1210 = vmatpush3.bf16.xpose.msra.mxu0 %v1376_v1  ;;  %1258 = vmatpush3.bf16.msra.mxu1 %v1376_v1  ;;  %v1380_v5 = vld [vmem:[#allocation4 + $0x28] sm:$0xff]   ;;  %v1381_v6 = vld [vmem:[#allocation4 + $0x60] sm:$0xff]   ;;  %v1383_v8 = vld [vmem:[#allocation4 + $0x58] sm:$0xff]  }
  0x1f   :  { %1211 = vmatprep.subr.bf16.mxu0 %v1377_v2  ;;  %1259 = vmatprep.subr.bf16.mxu1 %v1377_v2  ;;  %v1382_v7 = vld [vmem:[#allocation4 + $0x20] sm:$0xff]   ;;  %v44_v10 = vld [vmem:[#allocation2 + $0x8] sm:$0xff]  ;;  %v1384_v11 = vld [vmem:[#allocation4 + $0x18] sm:$0xff]  }
  0x20   :  { %v43_v9 = vld [vmem:[#allocation2] sm:$0xff]  ;;  %v1385_v12 = vld [vmem:[#allocation4 + $0x50] sm:$0xff]   ;;  %v1387_v14 = vld [vmem:[#allocation4 + $0x48] sm:$0xff]  }
  0x21   :  { %1391 = vtanh.f32 %v43_v9  ;;  %v1386_v13 = vld [vmem:[#allocation4 + $0x10] sm:$0xff]   ;;  %v1388_v15 = vld [vmem:[#allocation4 + $0x8] sm:$0xff]   ;;  %v1389_v16 = vld [vmem:[#allocation4 + $0x40] sm:$0xff]  }
  0x22   :  { %1260 = vmatpush3.bf16.msra.mxu1 %v1378_v3  ;;  %1393 = vtanh.f32 %v44_v10  ;;  %v1390_v17 = vld [vmem:[#allocation4] sm:$0xff]   ;;  %v45_v21 = vld [vmem:[#allocation2 + $0x10] sm:$0xff]  ;;  %v46_v22 = vld [vmem:[#allocation2 + $0x18] sm:$0xff] }
  0x23   :  { %1261 = vmatprep.subr.bf16.mxu1 %v1379_v4  ;;  %1395 = vtanh.f32 %v45_v21  ;;  %v47_v23 = vld [vmem:[#allocation2 + $0x20] sm:$0xff]  ;;  %v48_v24 = vld [vmem:[#allocation2 + $0x28] sm:$0xff]  ;;  %v49_v26 = vld [vmem:[#allocation2 + $0x30] sm:$0xff] }
  0x24   :  { %1397 = vtanh.f32 %v46_v22  ;;  %v50_v28 = vld [vmem:[#allocation2 + $0x38] sm:$0xff]  ;;  %v51_v31 = vld [vmem:[#allocation2 + $0x40] sm:$0xff]  ;;  %v52_v33 = vld [vmem:[#allocation2 + $0x48] sm:$0xff] }
  0x25   :  { %1399 = vtanh.f32 %v47_v23  ;;  %v53_v36 = vld [vmem:[#allocation2 + $0x50] sm:$0xff]  ;;  %v54_v38 = vld [vmem:[#allocation2 + $0x58] sm:$0xff]  ;;  %v55_v41 = vld [vmem:[#allocation2 + $0x60] sm:$0xff] }
  0x26   :  { %1212 = vmatpush3.bf16.xpose.msra.mxu0 %v1378_v3  ;;  %1262 = vmatpush3.bf16.msra.mxu1 %v1380_v5  ;;  %1401 = vtanh.f32 %v48_v24  ;;  %v56_v43 = vld [vmem:[#allocation2 + $0x68] sm:$0xff]  ;;  %v57_v46 = vld [vmem:[#allocation2 + $0x70] sm:$0xff]  ;;  %v58_v48 = vld [vmem:[#allocation2 + $0x78] sm:$0xff] }
  0x27   :  { %1213 = vmatprep.subr.bf16.mxu0 %v1379_v4  ;;  %1263 = vmatprep.subr.bf16.mxu1 %v1381_v6  ;;  %1403 = vtanh.f32 %v49_v26  ;;  %v59_v51 = vld [vmem:[#allocation2 + $0x80] sm:$0xff]  ;;  %v60_v53 = vld [vmem:[#allocation2 + $0x88] sm:$0xff]  ;;  %v61_v56 = vld [vmem:[#allocation2 + $0x90] sm:$0xff] }
  0x28   :  { %1405 = vtanh.f32 %v50_v28  ;;  %v62_v58 = vld [vmem:[#allocation2 + $0x98] sm:$0xff]  ;;  %v63_v61 = vld [vmem:[#allocation2 + $0xa0] sm:$0xff]  ;;  %v64_v63 = vld [vmem:[#allocation2 + $0xa8] sm:$0xff] }
  0x29   :  { %1407 = vtanh.f32 %v51_v31  ;;  %v65_v2 = vld [vmem:[#allocation2 + $0xb0] sm:$0xff]  ;;  %v66_v4 = vld [vmem:[#allocation2 + $0xb8] sm:$0xff]  ;;  %v68_v9 = vld [vmem:[#allocation2 + $0xc8] sm:$0xff] }
  0x2a   :  { %1264 = vmatpush3.bf16.msra.mxu1 %v1382_v7  ;;  %1409 = vtanh.f32 %v52_v33  ;;  %v72_v21 = vld [vmem:[#allocation2 + $0xe8] sm:$0xff]  ;;  %v73_v24 = vld [vmem:[#allocation2 + $0xf0] sm:$0xff]  ;;  %v74_v28 = vld [vmem:[#allocation2 + $0xf8] sm:$0xff] }
  0x2b   :  { %1265 = vmatprep.subr.bf16.mxu1 %v1383_v8  ;;  %1411 = vtanh.f32 %v53_v36 }
  0x2c   :  { %1413 = vtanh.f32 %v54_v38 }
  0x2d   :  { %1415 = vtanh.f32 %v55_v41 }
  0x2e   :  { %1214 = vmatpush3.bf16.xpose.msra.mxu0 %v1380_v5  ;;  %1266 = vmatpush3.bf16.msra.mxu1 %v1384_v11  ;;  %v1723_v18 = vpop.eup %1391  ;;  %1417 = vtanh.f32 %v56_v43 }
  0x2f   :  { %1215 = vmatprep.subr.bf16.mxu0 %v1381_v6  ;;  %1267 = vmatprep.subr.bf16.mxu1 %v1385_v12  ;;  %2515 = vst [vmem:[#allocation8_spill] sm:$0xff] %v1723_v18  ;;  %v1725_v19 = vpop.eup %1393  ;;  %1419 = vtanh.f32 %v57_v46 }
  0x30   :  { %2516 = vst [vmem:[#allocation9_spill] sm:$0xff] %v1725_v19  ;;  %v139_v20 = vpack.c.bf16 %v1725_v19, %v1723_v18  ;;  %v1729_v25 = vpop.eup %1395  ;;  %1421 = vtanh.f32 %v58_v48 }
  0x31   :  { %2517 = vst [vmem:[#allocation10_spill] sm:$0xff] %v1729_v25  ;;  %v1731_v27 = vpop.eup %1397  ;;  %1423 = vtanh.f32 %v59_v51 }
  0x32   :  { %1268 = vmatpush3.bf16.msra.mxu1 %v1386_v13  ;;  %1225 = vmatprep.mubr.bf16.mxu0 %v139_v20  ;;  %2518 = vst [vmem:[#allocation11_spill] sm:$0xff] %v1731_v27  ;;  %v140_v29 = vpack.c.bf16 %v1731_v27, %v1729_v25  ;;  %v1735_v30 = vpop.eup %1399  ;;  %1425 = vtanh.f32 %v60_v53 }
  0x33   :  { %1269 = vmatprep.subr.bf16.mxu1 %v1387_v14  ;;  %2519 = vst [vmem:[#allocation12_spill] sm:$0xff] %v1735_v30  ;;  %v1737_v32 = vpop.eup %1401  ;;  %1427 = vtanh.f32 %v61_v56 }
  0x34   :  { %2520 = vst [vmem:[#allocation13_spill] sm:$0xff] %v1737_v32  ;;  %v141_v34 = vpack.c.bf16 %v1737_v32, %v1735_v30  ;;  %v1741_v35 = vpop.eup %1403  ;;  %1429 = vtanh.f32 %v62_v58 }
  0x35   :  { %2521 = vst [vmem:[#allocation14_spill] sm:$0xff] %v1741_v35  ;;  %v1743_v37 = vpop.eup %1405  ;;  %1431 = vtanh.f32 %v63_v61 }
  0x36   :  { %1216 = vmatpush3.bf16.xpose.msra.mxu0 %v1382_v7  ;;  %1270 = vmatpush3.bf16.msra.mxu1 %v1388_v15  ;;  %2522 = vst [vmem:[#allocation15_spill] sm:$0xff] %v1743_v37  ;;  %v142_v39 = vpack.c.bf16 %v1743_v37, %v1741_v35  ;;  %v1747_v40 = vpop.eup %1407  ;;  %1433 = vtanh.f32 %v64_v63  ;;  %v67_v7 = vld [vmem:[#allocation2 + $0xc0] sm:$0xff] }
  0x37   :  { %1217 = vmatprep.subr.bf16.mxu0 %v1383_v8  ;;  %1271 = vmatprep.subr.bf16.mxu1 %v1389_v16  ;;  %2523 = vst [vmem:[#allocation16_spill] sm:$0xff] %v1747_v40  ;;  %v1749_v42 = vpop.eup %1409  ;;  %1435 = vtanh.f32 %v65_v2 }
  0x38   :  { %2524 = vst [vmem:[#allocation17_spill] sm:$0xff] %v1749_v42  ;;  %v143_v44 = vpack.c.bf16 %v1749_v42, %v1747_v40  ;;  %v1753_v45 = vpop.eup %1411  ;;  %1437 = vtanh.f32 %v66_v4 }
  0x39   :  { %2525 = vst [vmem:[#allocation18_spill] sm:$0xff] %v1753_v45  ;;  %v1755_v47 = vpop.eup %1413  ;;  %1439 = vtanh.f32 %v67_v7 }
  0x3a   :  { %1272 = vmatpush3.bf16.msra.mxu1 %v1390_v17  ;;  %2526 = vst [vmem:[#allocation19_spill] sm:$0xff] %v1755_v47  ;;  %v144_v49 = vpack.c.bf16 %v1755_v47, %v1753_v45  ;;  %v1759_v50 = vpop.eup %1415  ;;  %1441 = vtanh.f32 %v68_v9 }
  0x3b   :  { %2527 = vst [vmem:[#allocation20_spill] sm:$0xff] %v1759_v50  ;;  %v1761_v52 = vpop.eup %1417 }
  0x3c   :  { %2528 = vst [vmem:[#allocation21_spill] sm:$0xff] %v1761_v52  ;;  %v145_v54 = vpack.c.bf16 %v1761_v52, %v1759_v50  ;;  %v1765_v55 = vpop.eup %1419 }
  0x3d   :  { %2529 = vst [vmem:[#allocation22_spill] sm:$0xff] %v1765_v55  ;;  %v1767_v57 = vpop.eup %1421 }
  0x3e   :  { %1218 = vmatpush3.bf16.xpose.msra.mxu0 %v1384_v11  ;;  %2530 = vst [vmem:[#allocation23_spill] sm:$0xff] %v1767_v57  ;;  %v146_v59 = vpack.c.bf16 %v1767_v57, %v1765_v55  ;;  %v1771_v60 = vpop.eup %1423 }
  0x3f   :  { %1219 = vmatprep.subr.bf16.mxu0 %v1385_v12  ;;  %2531 = vst [vmem:[#allocation24_spill] sm:$0xff] %v1771_v60  ;;  %v1773_v62 = vpop.eup %1425  ;;  %v69_v12 = vld [vmem:[#allocation2 + $0xd0] sm:$0xff] }
  0x40   :  { %2532 = vst [vmem:[#allocation25_spill] sm:$0xff] %v1773_v62  ;;  %v147_v0 = vpack.c.bf16 %v1773_v62, %v1771_v60  ;;  %v1777_v1 = vpop.eup %1427  ;;  %1443 = vtanh.f32 %v69_v12 }
  0x41   :  { %2533 = vst [vmem:[#allocation26_spill] sm:$0xff] %v1777_v1  ;;  %v1779_v3 = vpop.eup %1429 }
  0x42   :  { %2534 = vst [vmem:[#allocation27_spill] sm:$0xff] %v1779_v3  ;;  %v148_v5 = vpack.c.bf16 %v1779_v3, %v1777_v1  ;;  %v1783_v6 = vpop.eup %1431 }
  0x43   :  { %2535 = vst [vmem:[#allocation28_spill] sm:$0xff] %v1783_v6  ;;  %v1785_v8 = vpop.eup %1433 }
  0x44   :  { %2536 = vst [vmem:[#allocation29_spill] sm:$0xff] %v1785_v8  ;;  %v149_v10 = vpack.c.bf16 %v1785_v8, %v1783_v6  ;;  %v1789_v11 = vpop.eup %1435 }
  0x45   :  { %2537 = vst [vmem:[#allocation30_spill] sm:$0xff] %v1789_v11 }
  0x46   :  { %1220 = vmatpush3.bf16.xpose.msra.mxu0 %v1386_v13  ;;  %v1791_v13 = vpop.eup %1437 }
  0x47   :  { %1221 = vmatprep.subr.bf16.mxu0 %v1387_v14  ;;  %2538 = vst [vmem:[#allocation31_spill] sm:$0xff] %v1791_v13  ;;  %v70_v14 = vld [vmem:[#allocation2 + $0xd8] sm:$0xff] }
  0x48   :  { %1445 = vtanh.f32 %v70_v14 }
  0x4e   :  { %1222 = vmatpush3.bf16.xpose.msra.mxu0 %v1388_v15  ;;  %v150_v15 = vpack.c.bf16 %v1791_v13, %v1789_v11 }
  0x4f   :  { %1223 = vmatprep.subr.bf16.mxu0 %v1389_v16  ;;  %v1795_v16 = vpop.eup %1439 }
  0x50   :  { %2539 = vst [vmem:[#allocation32_spill] sm:$0xff] %v1795_v16 }
  0x56   :  { %1224 = vmatpush3.bf16.xpose.msra.mxu0 %v1390_v17  ;;  %v71_v17 = vld [vmem:[#allocation2 + $0xe0] sm:$0xff] }
  0x57   :  { %1447 = vtanh.f32 %v71_v17 }
  0x58   :  { %1449 = vtanh.f32 %v72_v21 }
  0x59   :  { %1451 = vtanh.f32 %v73_v24 }
  0x5a   :  { %1453 = vtanh.f32 %v74_v28 }
  0x5d   :  { %1226 = vmatmul.mubr.bf16.vlgmr.msra.gmra.mxu0 %v139_v20  ;;  %v1797_v20 = vpop.eup %1441 }
  0x5e   :  { %1227 = vmatprep.mubr.bf16.mxu0 %v140_v29  ;;  %2540 = vst [vmem:[#allocation33_spill] sm:$0xff] %v1797_v20  ;;  %v151_v22 = vpack.c.bf16 %v1797_v20, %v1795_v16  ;;  %v1801_v23 = vpop.eup %1443 }
  0x5f   :  { %2541 = vst [vmem:[#allocation34_spill] sm:$0xff] %v1801_v23  ;;  %v1803_v26 = vpop.eup %1445 }
  0x60   :  { %2542 = vst [vmem:[#allocation35_spill] sm:$0xff] %v1803_v26 }
  0x64   :  { %v1807_v31 = vpop.eup %1447 }
  0x65   :  { %1228 = vmatmul.mubr.bf16.gmra.mxu0 %v140_v29  ;;  %v152_v29 = vpack.c.bf16 %v1803_v26, %v1801_v23  ;;  %2543 = vst [vmem:[#allocation36_spill] sm:$0xff] %v1807_v31  ;;  %v1809_v33 = vpop.eup %1449 }
  0x66   :  { %1229 = vmatprep.mubr.bf16.mxu0 %v141_v34  ;;  %2544 = vst [vmem:[#allocation37_spill] sm:$0xff] %v1809_v33  ;;  %v1813_v36 = vpop.eup %1451 }
  0x67   :  { %2545 = vst [vmem:[#allocation38_spill] sm:$0xff] %v1813_v36  ;;  %v1815_v38 = vpop.eup %1453 }
  0x68   :  { %2546 = vst [vmem:[#allocation39_spill] sm:$0xff] %v1815_v38 }
  0x6d   :  { %1230 = vmatmul.mubr.bf16.gmra.mxu0 %v141_v34  ;;  %v153_v34 = vpack.c.bf16 %v1809_v33, %v1807_v31 }
  0x6e   :  { %1231 = vmatprep.mubr.bf16.mxu0 %v142_v39 }
  0x75   :  { %1232 = vmatmul.mubr.bf16.gmra.mxu0 %v142_v39  ;;  %v154_v39 = vpack.c.bf16 %v1815_v38, %v1813_v36 }
  0x76   :  { %1233 = vmatprep.mubr.bf16.mxu0 %v143_v44 }
  0x7d   :  { %1234 = vmatmul.mubr.bf16.gmra.mxu0 %v143_v44 }
  0x7e   :  { %1235 = vmatprep.mubr.bf16.mxu0 %v144_v49 }
  0x85   :  { %1236 = vmatmul.mubr.bf16.gmra.mxu0 %v144_v49 }
  0x86   :  { %1237 = vmatprep.mubr.bf16.mxu0 %v145_v54 }
  0x8d   :  { %1238 = vmatmul.mubr.bf16.gmra.mxu0 %v145_v54 }
  0x8e   :  { %1239 = vmatprep.mubr.bf16.mxu0 %v146_v59 }
  0x95   :  { %1240 = vmatmul.mubr.bf16.gmra.mxu0 %v146_v59 }
  0x96   :  { %1241 = vmatprep.mubr.bf16.mxu0 %v147_v0 }
  0x9d   :  { %1242 = vmatmul.mubr.bf16.gmra.mxu0 %v147_v0 }
  0x9e   :  { %1243 = vmatprep.mubr.bf16.mxu0 %v148_v5 }
  0xa5   :  { %1244 = vmatmul.mubr.bf16.gmra.mxu0 %v148_v5 }
  0xa6   :  { %1245 = vmatprep.mubr.bf16.mxu0 %v149_v10 }
  0xad   :  { %1246 = vmatmul.mubr.bf16.gmra.mxu0 %v149_v10 }
  0xae   :  { %1247 = vmatprep.mubr.bf16.mxu0 %v150_v15 }
  0xb5   :  { %1248 = vmatmul.mubr.bf16.gmra.mxu0 %v150_v15 }
  0xb6   :  { %1249 = vmatprep.mubr.bf16.mxu0 %v151_v22 }
  0xbd   :  { %1250 = vmatmul.mubr.bf16.gmra.mxu0 %v151_v22 }
  0xbe   :  { %1251 = vmatprep.mubr.bf16.mxu0 %v152_v29 }
  0xc5   :  { %1252 = vmatmul.mubr.bf16.gmra.mxu0 %v152_v29 }
  0xc6   :  { %1253 = vmatprep.mubr.bf16.mxu0 %v153_v34 }
  0xcd   :  { %1254 = vmatmul.mubr.bf16.gmra.mxu0 %v153_v34 }
  0xce   :  { %1255 = vmatprep.mubr.bf16.mxu0 %v154_v39 }
  0xd5   :  { %1256 = vmatmul.mubr.bf16.gmra.mxu0 %v154_v39 }
 0x11d   :  { %v1819_v41 = vpop.f32.mrf.mxu0 }
 0x11f   :  { %v1821_v43 = vpop.f32.mrf.mxu0 }
 0x120   :  { %v444_v44 = vmax.f32 %v1819_v41, %v1821_v43 }
 0x121   :  { %v1825_v46 = vpop.f32.mrf.mxu0 }
 0x122   :  { %445 = vmax.xlane.f32.xlu0 %v444_v44 }
 0x123   :  { %v1827_v48 = vpop.f32.mrf.mxu0 }
 0x124   :  { %v447_v49 = vmax.f32 %v1825_v46, %v1827_v48 }
 0x125   :  { %v1831_v51 = vpop.f32.mrf.mxu0 }
 0x126   :  { %448 = vmax.xlane.f32.xlu0 %v447_v49 }
 0x127   :  { %v1833_v53 = vpop.f32.mrf.mxu0 }
 0x128   :  { %v450_v54 = vmax.f32 %v1831_v51, %v1833_v53 }
 0x129   :  { %v1837_v56 = vpop.f32.mrf.mxu0 }
 0x12a   :  { %451 = vmax.xlane.f32.xlu1 %v450_v54 }
 0x12b   :  { %v1839_v58 = vpop.f32.mrf.mxu0 }
 0x12c   :  { %v453_v59 = vmax.f32 %v1837_v56, %v1839_v58 }
 0x12d   :  { %v1843_v61 = vpop.f32.mrf.mxu0 }
 0x12e   :  { %454 = vmax.xlane.f32.xlu1 %v453_v59 }
 0x12f   :  { %v1845_v63 = vpop.f32.mrf.mxu0 }
 0x130   :  { %v456_v0 = vmax.f32 %v1843_v61, %v1845_v63 }
 0x131   :  { %v1849_v2 = vpop.f32.mrf.mxu0 }
 0x132   :  { %457 = vmax.xlane.f32.xlu0 %v456_v0 }
 0x133   :  { %v1851_v4 = vpop.f32.mrf.mxu0 }
 0x134   :  { %v459_v5 = vmax.f32 %v1849_v2, %v1851_v4 }
 0x135   :  { %v1855_v7 = vpop.f32.mrf.mxu0 }
 0x136   :  { %460 = vmax.xlane.f32.xlu1 %v459_v5 }
 0x137   :  { %v1857_v9 = vpop.f32.mrf.mxu0 }
 0x138   :  { %v462_v10 = vmax.f32 %v1855_v7, %v1857_v9 }
 0x139   :  { %v1861_v12 = vpop.f32.mrf.mxu0 }
 0x13a   :  { %463 = vmax.xlane.f32.xlu0 %v462_v10 }
 0x13b   :  { %v1863_v14 = vpop.f32.mrf.mxu0 }
 0x13c   :  { %v465_v15 = vmax.f32 %v1861_v12, %v1863_v14 }
 0x13d   :  { %v1867_v17 = vpop.f32.mrf.mxu0 }
 0x13e   :  { %466 = vmax.xlane.f32.xlu1 %v465_v15 }
 0x13f   :  { %v1869_v21 = vpop.f32.mrf.mxu0 }
 0x140   :  { %v468_v22 = vmax.f32 %v1867_v17, %v1869_v21 }
 0x141   :  { %v1873_v24 = vpop.f32.mrf.mxu0 }
 0x142   :  { %469 = vmax.xlane.f32.xlu0 %v468_v22 }
 0x143   :  { %v1875_v28 = vpop.f32.mrf.mxu0 }
 0x144   :  { %v471_v29 = vmax.f32 %v1873_v24, %v1875_v28 }
 0x145   :  { %v1879_v34 = vpop.f32.mrf.mxu0 }
 0x146   :  { %472 = vmax.xlane.f32.xlu1 %v471_v29 }
 0x147   :  { %v1881_v39 = vpop.f32.mrf.mxu0 }
 0x148   :  { %v474_v44 = vmax.f32 %v1879_v34, %v1881_v39 }
 0x149   :  { %v1885_v49 = vpop.f32.mrf.mxu0 }
 0x14a   :  { %475 = vmax.xlane.f32.xlu0 %v474_v44 }
 0x14b   :  { %v1887_v54 = vpop.f32.mrf.mxu0 }
 0x14c   :  { %v477_v59 = vmax.f32 %v1885_v49, %v1887_v54 }
 0x14d   :  { %v1891_v0 = vpop.f32.mrf.mxu0 }
 0x14e   :  { %478 = vmax.xlane.f32.xlu1 %v477_v59 }
 0x14f   :  { %v1893_v5 = vpop.f32.mrf.mxu0 }
 0x150   :  { %v480_v10 = vmax.f32 %v1891_v0, %v1893_v5 }
 0x151   :  { %v1897_v15 = vpop.f32.mrf.mxu0 }
 0x152   :  { %481 = vmax.xlane.f32.xlu0 %v480_v10 }
 0x153   :  { %v1899_v22 = vpop.f32.mrf.mxu0 }
 0x154   :  { %v483_v29 = vmax.f32 %v1897_v15, %v1899_v22 }
 0x155   :  { %v1903_v44 = vpop.f32.mrf.mxu0 }
 0x156   :  { %484 = vmax.xlane.f32.xlu1 %v483_v29 }
 0x157   :  { %v1905_v38 = vpop.f32.mrf.mxu0 }
 0x158   :  { %v486_v59 = vmax.f32 %v1903_v44, %v1905_v38 }
 0x159   :  { %v1909_v36 = vpop.f32.mrf.mxu0 }
 0x15a   :  { %487 = vmax.xlane.f32.xlu0 %v486_v59 }
 0x15b   :  { %v1911_v33 = vpop.f32.mrf.mxu0 }
 0x15c   :  { %v489_v10 = vmax.f32 %v1909_v36, %v1911_v33 }
 0x15d   :  { %v1915_v31 = vpop.f32.mrf.mxu0 }
 0x15e   :  { %490 = vmax.xlane.f32.xlu1 %v489_v10 }
 0x15f   :  { %v1917_v26 = vpop.f32.mrf.mxu0 }
 0x160   :  { %v492_v29 = vmax.f32 %v1915_v31, %v1917_v26 }
 0x161   :  { %v1921_v23 = vpop.f32.mrf.mxu0 }
 0x162   :  { %493 = vmax.xlane.f32.xlu0 %v492_v29 }
 0x163   :  { %v1923_v20 = vpop.f32.mrf.mxu0 }
 0x164   :  { %v495_v59 = vmax.f32 %v1921_v23, %v1923_v20 }
 0x165   :  { %v1927_v16 = vpop.f32.mrf.mxu0 }
 0x166   :  { %496 = vmax.xlane.f32.xlu1 %v495_v59 }
 0x167   :  { %v1929_v13 = vpop.f32.mrf.mxu0 }
 0x168   :  { %v498_v10 = vmax.f32 %v1927_v16, %v1929_v13 }
 0x169   :  { %v1933_v11 = vpop.f32.mrf.mxu0 }
 0x16a   :  { %499 = vmax.xlane.f32.xlu0 %v498_v10 }
 0x16b   :  { %v1935_v8 = vpop.f32.mrf.mxu0 }
 0x16c   :  { %v501_v29 = vmax.f32 %v1933_v11, %v1935_v8 }
 0x16d   :  { %v1939_v6 = vpop.f32.mrf.mxu0 }
 0x16e   :  { %502 = vmax.xlane.f32.xlu1 %v501_v29 }
 0x16f   :  { %v1941_v3 = vpop.f32.mrf.mxu0 }
 0x170   :  { %v504_v59 = vmax.f32 %v1939_v6, %v1941_v3 }
 0x171   :  { %v1945_v1 = vpop.f32.mrf.mxu0 }
 0x172   :  { %505 = vmax.xlane.f32.xlu0 %v504_v59 }
 0x173   :  { %v1947_v62 = vpop.f32.mrf.mxu0 }
 0x174   :  { %v507_v10 = vmax.f32 %v1945_v1, %v1947_v62 }
 0x175   :  { %v1951_v60 = vpop.f32.mrf.mxu0 }
 0x176   :  { %508 = vmax.xlane.f32.xlu1 %v507_v10 }
 0x177   :  { %v1953_v57 = vpop.f32.mrf.mxu0 }
 0x178   :  { %v510_v29 = vmax.f32 %v1951_v60, %v1953_v57 }
 0x179   :  { %v1957_v55 = vpop.f32.mrf.mxu0 }
 0x17a   :  { %511 = vmax.xlane.f32.xlu0 %v510_v29 }
 0x17b   :  { %v1959_v52 = vpop.f32.mrf.mxu0 }
 0x17c   :  { %v513_v59 = vmax.f32 %v1957_v55, %v1959_v52 }
 0x17d   :  { %v1963_v50 = vpop.f32.mrf.mxu0 }
 0x17e   :  { %514 = vmax.xlane.f32.xlu1 %v513_v59 }
 0x17f   :  { %v1965_v47 = vpop.f32.mrf.mxu0 }
 0x181   :  { %v1967_v45 = vpop.f32.mrf.mxu0 }
 0x183   :  { %v1971_v37 = vpop.f32.mrf.mxu0 }
 0x185   :  { %v1975_v27 = vpop.f32.mrf.mxu0 }
 0x1ab   :  { %v446_v10 = vpop.xlane.xlu0 %445 }
 0x1ac   :  { %v540_v42 = vsub.f32 %v1819_v41, %v446_v10  ;;  %v541_v40 = vsub.f32 %v1821_v43, %v446_v10  ;;  %v1979_v10 = vpop.f32.mrf.mxu0 }
 0x1ae   :  { %v604_v29 = vmul.f32 1.442695, %v540_v42  ;;  %v606_v35 = vmul.f32 1.442695, %v541_v40 }
 0x1af   :  { %v449_v32 = vpop.xlane.xlu0 %448 }
 0x1b0   :  { %1455 = vpow2.f32 %v604_v29  ;;  %v542_v30 = vsub.f32 %v1825_v46, %v449_v32  ;;  %v543_v59 = vsub.f32 %v1827_v48, %v449_v32 }
 0x1b1   :  { %1457 = vpow2.f32 %v606_v35  ;;  %v1983_v35 = vpop.f32.mrf.mxu0 }
 0x1b2   :  { %v608_v25 = vmul.f32 1.442695, %v542_v30  ;;  %v610_v19 = vmul.f32 1.442695, %v543_v59 }
 0x1b3   :  { %v452_v18 = vpop.xlane.xlu1 %451 }
 0x1b4   :  { %1459 = vpow2.f32 %v608_v25  ;;  %v544_v41 = vsub.f32 %v1831_v51, %v452_v18  ;;  %v545_v43 = vsub.f32 %v1833_v53, %v452_v18 }
 0x1b5   :  { %1461 = vpow2.f32 %v610_v19  ;;  %v1987_v19 = vpop.f32.mrf.mxu0 }
 0x1b6   :  { %v612_v40 = vmul.f32 1.442695, %v544_v41  ;;  %v614_v42 = vmul.f32 1.442695, %v545_v43 }
 0x1b7   :  { %v455_v29 = vpop.xlane.xlu1 %454 }
 0x1b8   :  { %1463 = vpow2.f32 %v612_v40  ;;  %v546_v32 = vsub.f32 %v1837_v56, %v455_v29  ;;  %v547_v46 = vsub.f32 %v1839_v58, %v455_v29 }
 0x1b9   :  { %1465 = vpow2.f32 %v614_v42  ;;  %v1997_v42 = vpop.f32.mrf.mxu0 }
 0x1ba   :  { %v616_v30 = vmul.f32 1.442695, %v546_v32  ;;  %v618_v25 = vmul.f32 1.442695, %v547_v46 }
 0x1bb   :  { %v458_v48 = vpop.xlane.xlu0 %457 }
 0x1bc   :  { %1467 = vpow2.f32 %v616_v30  ;;  %v548_v18 = vsub.f32 %v1843_v61, %v458_v48  ;;  %v549_v51 = vsub.f32 %v1845_v63, %v458_v48  ;;  %v516_v48 = vmax.f32 %v1963_v50, %v1965_v47 }
 0x1bd   :  { %v1989_v53 = vpop.eup %1455  ;;  %1469 = vpow2.f32 %v618_v25 }
 0x1be   :  { %v1991_v59 = vpop.eup %1457  ;;  %v620_v56 = vmul.f32 1.442695, %v548_v18  ;;  %v622_v58 = vmul.f32 1.442695, %v549_v51  ;;  %v2009_v18 = vpop.f32.mrf.mxu0 }
 0x1bf   :  { %v461_v41 = vpop.xlane.xlu1 %460  ;;  %v732_v43 = vadd.f32 %v1991_v59, %v1989_v53 }
 0x1c0   :  { %1471 = vpow2.f32 %v620_v56  ;;  %v550_v40 = vsub.f32 %v1849_v2, %v461_v41  ;;  %v551_v61 = vsub.f32 %v1851_v4, %v461_v41 }
 0x1c1   :  { %v1999_v63 = vpop.eup %1459  ;;  %1473 = vpow2.f32 %v622_v58  ;;  %733 = vadd.xlane.f32.xlu0 %v732_v43 }
 0x1c2   :  { %v2001_v29 = vpop.eup %1461  ;;  %v624_v32 = vmul.f32 1.442695, %v550_v40  ;;  %v626_v46 = vmul.f32 1.442695, %v551_v61 }
 0x1c3   :  { %v464_v30 = vpop.xlane.xlu0 %463  ;;  %v735_v25 = vadd.f32 %v2001_v29, %v1999_v63 }
 0x1c4   :  { %1475 = vpow2.f32 %v624_v32  ;;  %v552_v2 = vsub.f32 %v1855_v7, %v464_v30  ;;  %v553_v4 = vsub.f32 %v1857_v9, %v464_v30  ;;  %v519_v7 = vmax.f32 %v1967_v45, %v1971_v37  ;;  %v2021_v32 = vpop.f32.mrf.mxu0 }
 0x1c5   :  { %v2011_v51 = vpop.eup %1463  ;;  %1477 = vpow2.f32 %v626_v46  ;;  %736 = vadd.xlane.f32.xlu1 %v735_v25  ;;  %517 = vmax.xlane.f32.xlu0 %v516_v48 }
 0x1c6   :  { %v2013_v56 = vpop.eup %1465  ;;  %v628_v58 = vmul.f32 1.442695, %v552_v2  ;;  %v630_v41 = vmul.f32 1.442695, %v553_v4 }
 0x1c7   :  { %v467_v43 = vpop.xlane.xlu1 %466  ;;  %v738_v40 = vadd.f32 %v2013_v56, %v2011_v51 }
 0x1c8   :  { %1479 = vpow2.f32 %v628_v58  ;;  %v554_v9 = vsub.f32 %v1861_v12, %v467_v43  ;;  %v555_v61 = vsub.f32 %v1863_v14, %v467_v43  ;;  %v522_v12 = vmax.f32 %v1975_v27, %v1979_v10  ;;  %v2033_v43 = vpop.f32.mrf.mxu0 }
 0x1c9   :  { %v2023_v46 = vpop.eup %1467  ;;  %1481 = vpow2.f32 %v630_v41  ;;  %739 = vadd.xlane.f32.xlu0 %v738_v40  ;;  %520 = vmax.xlane.f32.xlu1 %v519_v7 }
 0x1ca   :  { %2547 = vst [vmem:[#allocation40_spill] sm:$0xff] %v2023_v46  ;;  %v2025_v30 = vpop.eup %1469  ;;  %v632_v25 = vmul.f32 1.442695, %v554_v9  ;;  %v634_v48 = vmul.f32 1.442695, %v555_v61 }
 0x1cb   :  { %v470_v2 = vpop.xlane.xlu0 %469  ;;  %v741_v4 = vadd.f32 %v2025_v30, %v2023_v46 }
 0x1cc   :  { %1483 = vpow2.f32 %v632_v25  ;;  %v556_v14 = vsub.f32 %v1867_v17, %v470_v2  ;;  %v557_v58 = vsub.f32 %v1869_v21, %v470_v2  ;;  %v525_v17 = vmax.f32 %v1983_v35, %v1987_v19  ;;  %v2045_v2 = vpop.f32.mrf.mxu0 }
 0x1cd   :  { %v2035_v41 = vpop.eup %1471  ;;  %1485 = vpow2.f32 %v634_v48  ;;  %742 = vadd.xlane.f32.xlu1 %v741_v4  ;;  %523 = vmax.xlane.f32.xlu0 %v522_v12 }
 0x1ce   :  { %2548 = vst [vmem:[#allocation41_spill] sm:$0xff] %v2035_v41  ;;  %v2037_v40 = vpop.eup %1473  ;;  %v636_v7 = vmul.f32 1.442695, %v556_v14  ;;  %v638_v9 = vmul.f32 1.442695, %v557_v58 }
 0x1cf   :  { %v473_v61 = vpop.xlane.xlu1 %472  ;;  %v744_v46 = vadd.f32 %v2037_v40, %v2035_v41 }
 0x1d0   :  { %1487 = vpow2.f32 %v636_v7  ;;  %v558_v21 = vsub.f32 %v1873_v24, %v473_v61  ;;  %v559_v25 = vsub.f32 %v1875_v28, %v473_v61  ;;  %v528_v24 = vmax.f32 %v1997_v42, %v2009_v18  ;;  %v2057_v61 = vpop.f32.mrf.mxu0 }
 0x1d1   :  { %v2047_v48 = vpop.eup %1475  ;;  %1489 = vpow2.f32 %v638_v9  ;;  %745 = vadd.xlane.f32.xlu0 %v744_v46  ;;  %526 = vmax.xlane.f32.xlu1 %v525_v17 }
 0x1d2   :  { %2549 = vst [vmem:[#allocation42_spill] sm:$0xff] %v2047_v48  ;;  %v2049_v4 = vpop.eup %1477  ;;  %v640_v12 = vmul.f32 1.442695, %v558_v21  ;;  %v642_v14 = vmul.f32 1.442695, %v559_v25 }
 0x1d3   :  { %v476_v58 = vpop.xlane.xlu0 %475  ;;  %v747_v41 = vadd.f32 %v2049_v4, %v2047_v48 }
 0x1d4   :  { %1491 = vpow2.f32 %v640_v12  ;;  %v560_v28 = vsub.f32 %v1879_v34, %v476_v58  ;;  %v561_v7 = vsub.f32 %v1881_v39, %v476_v58  ;;  %v531_v34 = vmax.f32 %v2021_v32, %v2033_v43  ;;  %v2067_v39 = vpop.f32.mrf.mxu0 }
 0x1d5   :  { %v2059_v46 = vpop.eup %1479  ;;  %1493 = vpow2.f32 %v642_v14  ;;  %748 = vadd.xlane.f32.xlu1 %v747_v41  ;;  %529 = vmax.xlane.f32.xlu0 %v528_v24 }
 0x1d6   :  { %2550 = vst [vmem:[#allocation43_spill] sm:$0xff] %v2059_v46  ;;  %v2061_v9 = vpop.eup %1481  ;;  %v644_v17 = vmul.f32 1.442695, %v560_v28  ;;  %v646_v21 = vmul.f32 1.442695, %v561_v7 }
 0x1d7   :  { %v479_v25 = vpop.xlane.xlu1 %478  ;;  %v750_v48 = vadd.f32 %v2061_v9, %v2059_v46 }
 0x1d8   :  { %1495 = vpow2.f32 %v644_v17  ;;  %v562_v12 = vsub.f32 %v1885_v49, %v479_v25  ;;  %v563_v14 = vsub.f32 %v1887_v54, %v479_v25  ;;  %v534_v17 = vmax.f32 %v2045_v2, %v2057_v61  ;;  %v2079_v49 = vpop.f32.mrf.mxu0 }
 0x1d9   :  { %v2071_v41 = vpop.eup %1483  ;;  %1497 = vpow2.f32 %v646_v21  ;;  %751 = vadd.xlane.f32.xlu0 %v750_v48  ;;  %532 = vmax.xlane.f32.xlu1 %v531_v34 }
 0x1da   :  { %2551 = vst [vmem:[#allocation44_spill] sm:$0xff] %v2071_v41  ;;  %v2073_v58 = vpop.eup %1485  ;;  %v648_v24 = vmul.f32 1.442695, %v562_v12  ;;  %v650_v28 = vmul.f32 1.442695, %v563_v14  ;;  %v537_v14 = vmax.f32 %v2067_v39, %v2079_v49 }
 0x1db   :  { %v482_v7 = vpop.xlane.xlu0 %481  ;;  %v753_v46 = vadd.f32 %v2073_v58, %v2071_v41 }
 0x1dc   :  { %1499 = vpow2.f32 %v648_v24  ;;  %v564_v54 = vsub.f32 %v1891_v0, %v482_v7  ;;  %v565_v21 = vsub.f32 %v1893_v5, %v482_v7 }
 0x1dd   :  { %v2083_v48 = vpop.eup %1487  ;;  %1501 = vpow2.f32 %v650_v28  ;;  %754 = vadd.xlane.f32.xlu1 %v753_v46  ;;  %535 = vmax.xlane.f32.xlu0 %v534_v17 }
 0x1de   :  { %2552 = vst [vmem:[#allocation45_spill] sm:$0xff] %v2083_v48  ;;  %v2085_v25 = vpop.eup %1489  ;;  %v652_v34 = vmul.f32 1.442695, %v564_v54  ;;  %v654_v12 = vmul.f32 1.442695, %v565_v21 }
 0x1df   :  { %v485_v41 = vpop.xlane.xlu1 %484  ;;  %v756_v24 = vadd.f32 %v2085_v25, %v2083_v48 }
 0x1e0   :  { %1503 = vpow2.f32 %v652_v34  ;;  %v566_v0 = vsub.f32 %v1897_v15, %v485_v41  ;;  %v567_v5 = vsub.f32 %v1899_v22, %v485_v41 }
 0x1e1   :  { %v2093_v7 = vpop.eup %1491  ;;  %1505 = vpow2.f32 %v654_v12  ;;  %757 = vadd.xlane.f32.xlu0 %v756_v24  ;;  %538 = vmax.xlane.f32.xlu1 %v537_v14 }
 0x1e2   :  { %v2095_v46 = vpop.eup %1493  ;;  %v656_v28 = vmul.f32 1.442695, %v566_v0  ;;  %v658_v17 = vmul.f32 1.442695, %v567_v5 }
 0x1e3   :  { %v488_v54 = vpop.xlane.xlu0 %487  ;;  %v759_v21 = vadd.f32 %v2095_v46, %v2093_v7 }
 0x1e4   :  { %1507 = vpow2.f32 %v656_v28  ;;  %v568_v34 = vsub.f32 %v1903_v44, %v488_v54  ;;  %v569_v15 = vsub.f32 %v1905_v38, %v488_v54 }
 0x1e5   :  { %v2101_v48 = vpop.eup %1495  ;;  %1509 = vpow2.f32 %v658_v17  ;;  %760 = vadd.xlane.f32.xlu1 %v759_v21 }
 0x1e6   :  { %v2103_v22 = vpop.eup %1497  ;;  %v660_v41 = vmul.f32 1.442695, %v568_v34  ;;  %v662_v12 = vmul.f32 1.442695, %v569_v15 }
 0x1e7   :  { %v491_v14 = vpop.xlane.xlu1 %490  ;;  %v762_v24 = vadd.f32 %v2103_v22, %v2101_v48 }
 0x1e8   :  { %1511 = vpow2.f32 %v660_v41  ;;  %v570_v0 = vsub.f32 %v1909_v36, %v491_v14  ;;  %v571_v5 = vsub.f32 %v1911_v33, %v491_v14 }
 0x1e9   :  { %v2109_v44 = vpop.eup %1499  ;;  %1513 = vpow2.f32 %v662_v12  ;;  %763 = vadd.xlane.f32.xlu0 %v762_v24 }
 0x1ea   :  { %v2111_v38 = vpop.eup %1501  ;;  %v664_v28 = vmul.f32 1.442695, %v570_v0  ;;  %v666_v17 = vmul.f32 1.442695, %v571_v5 }
 0x1eb   :  { %v494_v54 = vpop.xlane.xlu0 %493  ;;  %v765_v21 = vadd.f32 %v2111_v38, %v2109_v44 }
 0x1ec   :  { %1515 = vpow2.f32 %v664_v28  ;;  %v572_v34 = vsub.f32 %v1915_v31, %v494_v54  ;;  %v573_v15 = vsub.f32 %v1917_v26, %v494_v54 }
 0x1ed   :  { %v2117_v36 = vpop.eup %1503  ;;  %1517 = vpow2.f32 %v666_v17  ;;  %766 = vadd.xlane.f32.xlu1 %v765_v21 }
 0x1ee   :  { %v2119_v33 = vpop.eup %1505  ;;  %v668_v41 = vmul.f32 1.442695, %v572_v34  ;;  %v670_v12 = vmul.f32 1.442695, %v573_v15 }
 0x1ef   :  { %v497_v14 = vpop.xlane.xlu1 %496  ;;  %v768_v24 = vadd.f32 %v2119_v33, %v2117_v36 }
 0x1f0   :  { %1519 = vpow2.f32 %v668_v41  ;;  %v574_v0 = vsub.f32 %v1921_v23, %v497_v14  ;;  %v575_v5 = vsub.f32 %v1923_v20, %v497_v14 }
 0x1f1   :  { %v2125_v31 = vpop.eup %1507  ;;  %1521 = vpow2.f32 %v670_v12  ;;  %769 = vadd.xlane.f32.xlu0 %v768_v24 }
 0x1f2   :  { %v2127_v26 = vpop.eup %1509  ;;  %v672_v28 = vmul.f32 1.442695, %v574_v0  ;;  %v674_v17 = vmul.f32 1.442695, %v575_v5 }
 0x1f3   :  { %v500_v54 = vpop.xlane.xlu0 %499  ;;  %v771_v21 = vadd.f32 %v2127_v26, %v2125_v31 }
 0x1f4   :  { %1523 = vpow2.f32 %v672_v28  ;;  %v576_v34 = vsub.f32 %v1927_v16, %v500_v54  ;;  %v577_v15 = vsub.f32 %v1929_v13, %v500_v54 }
 0x1f5   :  { %v2133_v23 = vpop.eup %1511  ;;  %1525 = vpow2.f32 %v674_v17  ;;  %772 = vadd.xlane.f32.xlu1 %v771_v21 }
 0x1f6   :  { %v2135_v20 = vpop.eup %1513  ;;  %v676_v41 = vmul.f32 1.442695, %v576_v34  ;;  %v678_v12 = vmul.f32 1.442695, %v577_v15 }
 0x1f7   :  { %v503_v14 = vpop.xlane.xlu1 %502  ;;  %v774_v24 = vadd.f32 %v2135_v20, %v2133_v23 }
 0x1f8   :  { %1527 = vpow2.f32 %v676_v41  ;;  %v578_v0 = vsub.f32 %v1933_v11, %v503_v14  ;;  %v579_v5 = vsub.f32 %v1935_v8, %v503_v14 }
 0x1f9   :  { %v2141_v16 = vpop.eup %1515  ;;  %1529 = vpow2.f32 %v678_v12  ;;  %775 = vadd.xlane.f32.xlu0 %v774_v24 }
 0x1fa   :  { %v2143_v13 = vpop.eup %1517  ;;  %v680_v28 = vmul.f32 1.442695, %v578_v0  ;;  %v682_v17 = vmul.f32 1.442695, %v579_v5 }
 0x1fb   :  { %v506_v54 = vpop.xlane.xlu0 %505  ;;  %v777_v21 = vadd.f32 %v2143_v13, %v2141_v16 }
 0x1fc   :  { %1531 = vpow2.f32 %v680_v28  ;;  %v580_v34 = vsub.f32 %v1939_v6, %v506_v54  ;;  %v581_v15 = vsub.f32 %v1941_v3, %v506_v54 }
 0x1fd   :  { %v2149_v11 = vpop.eup %1519  ;;  %1533 = vpow2.f32 %v682_v17  ;;  %778 = vadd.xlane.f32.xlu1 %v777_v21 }
 0x1fe   :  { %v2151_v8 = vpop.eup %1521  ;;  %v684_v41 = vmul.f32 1.442695, %v580_v34  ;;  %v686_v12 = vmul.f32 1.442695, %v581_v15 }
 0x1ff   :  { %v509_v14 = vpop.xlane.xlu1 %508  ;;  %v780_v24 = vadd.f32 %v2151_v8, %v2149_v11 }
 0x200   :  { %1535 = vpow2.f32 %v684_v41  ;;  %v582_v0 = vsub.f32 %v1945_v1, %v509_v14  ;;  %v583_v5 = vsub.f32 %v1947_v62, %v509_v14 }
 0x201   :  { %v2157_v6 = vpop.eup %1523  ;;  %1537 = vpow2.f32 %v686_v12  ;;  %781 = vadd.xlane.f32.xlu0 %v780_v24 }
 0x202   :  { %v2159_v3 = vpop.eup %1525  ;;  %v688_v28 = vmul.f32 1.442695, %v582_v0  ;;  %v690_v17 = vmul.f32 1.442695, %v583_v5 }
 0x203   :  { %v512_v54 = vpop.xlane.xlu0 %511  ;;  %v783_v21 = vadd.f32 %v2159_v3, %v2157_v6 }
 0x204   :  { %1539 = vpow2.f32 %v688_v28  ;;  %v584_v34 = vsub.f32 %v1951_v60, %v512_v54  ;;  %v585_v15 = vsub.f32 %v1953_v57, %v512_v54 }
 0x205   :  { %v2165_v1 = vpop.eup %1527  ;;  %1541 = vpow2.f32 %v690_v17  ;;  %784 = vadd.xlane.f32.xlu1 %v783_v21 }
 0x206   :  { %v2167_v62 = vpop.eup %1529  ;;  %v692_v41 = vmul.f32 1.442695, %v584_v34  ;;  %v694_v12 = vmul.f32 1.442695, %v585_v15 }
 0x207   :  { %v515_v14 = vpop.xlane.xlu1 %514  ;;  %v786_v24 = vadd.f32 %v2167_v62, %v2165_v1 }
 0x208   :  { %1543 = vpow2.f32 %v692_v41  ;;  %v586_v0 = vsub.f32 %v1957_v55, %v515_v14  ;;  %v587_v5 = vsub.f32 %v1959_v52, %v515_v14 }
 0x209   :  { %v2173_v60 = vpop.eup %1531  ;;  %1545 = vpow2.f32 %v694_v12  ;;  %787 = vadd.xlane.f32.xlu0 %v786_v24 }
 0x20a   :  { %v2175_v57 = vpop.eup %1533  ;;  %v696_v28 = vmul.f32 1.442695, %v586_v0  ;;  %v698_v17 = vmul.f32 1.442695, %v587_v5 }
 0x20b   :  { %v789_v54 = vadd.f32 %v2175_v57, %v2173_v60 }
 0x20c   :  { %1547 = vpow2.f32 %v696_v28 }
 0x20d   :  { %v2179_v21 = vpop.eup %1535  ;;  %1549 = vpow2.f32 %v698_v17  ;;  %790 = vadd.xlane.f32.xlu1 %v789_v54 }
 0x20e   :  { %2553 = vst [vmem:[#allocation46_spill] sm:$0xff] %v2179_v21  ;;  %v2181_v34 = vpop.eup %1537 }
 0x20f   :  { %2554 = vst [vmem:[#allocation47_spill] sm:$0xff] %v2181_v34  ;;  %v792_v52 = vadd.f32 %v2181_v34, %v2179_v21 }
 0x211   :  { %v2185_v55 = vpop.eup %1539  ;;  %793 = vadd.xlane.f32.xlu0 %v792_v52 }
 0x212   :  { %2555 = vst [vmem:[#allocation48_spill] sm:$0xff] %v2185_v55  ;;  %v2187_v15 = vpop.eup %1541 }
 0x213   :  { %2556 = vst [vmem:[#allocation49_spill] sm:$0xff] %v2187_v15  ;;  %v795_v41 = vadd.f32 %v2187_v15, %v2185_v55 }
 0x215   :  { %v2191_v12 = vpop.eup %1543  ;;  %796 = vadd.xlane.f32.xlu1 %v795_v41 }
 0x216   :  { %2557 = vst [vmem:[#allocation50_spill] sm:$0xff] %v2191_v12  ;;  %v2193_v14 = vpop.eup %1545 }
 0x217   :  { %2558 = vst [vmem:[#allocation51_spill] sm:$0xff] %v2193_v14  ;;  %v798_v24 = vadd.f32 %v2193_v14, %v2191_v12 }
 0x219   :  { %v2197_v0 = vpop.eup %1547  ;;  %799 = vadd.xlane.f32.xlu0 %v798_v24 }
 0x21a   :  { %2559 = vst [vmem:[#allocation52_spill] sm:$0xff] %v2197_v0  ;;  %v2199_v5 = vpop.eup %1549 }
 0x21b   :  { %2560 = vst [vmem:[#allocation53_spill] sm:$0xff] %v2199_v5  ;;  %v801_v28 = vadd.f32 %v2199_v5, %v2197_v0 }
 0x21d   :  { %802 = vadd.xlane.f32.xlu1 %v801_v28 }
 0x24a   :  { %v734_v17 = vpop.xlane.xlu0 %733 }
 0x24b   :  { %1551 = vrcp.f32 %v734_v17 }
 0x24e   :  { %v737_v54 = vpop.xlane.xlu1 %736  ;;  %v518_v52 = vpop.xlane.xlu0 %517 }
 0x24f   :  { %1553 = vrcp.f32 %v737_v54  ;;  %v588_v41 = vsub.f32 %v1963_v50, %v518_v52  ;;  %v589_v21 = vsub.f32 %v1965_v47, %v518_v52 }
 0x251   :  { %v700_v55 = vmul.f32 1.442695, %v588_v41  ;;  %v702_v12 = vmul.f32 1.442695, %v589_v21 }
 0x252   :  { %v740_v14 = vpop.xlane.xlu0 %739  ;;  %v521_v15 = vpop.xlane.xlu1 %520 }
 0x253   :  { %1555 = vpow2.f32 %v700_v55  ;;  %v590_v24 = vsub.f32 %v1967_v45, %v521_v15  ;;  %v591_v34 = vsub.f32 %v1971_v37, %v521_v15 }
 0x254   :  { %1557 = vpow2.f32 %v702_v12 }
 0x255   :  { %v704_v28 = vmul.f32 1.442695, %v590_v24  ;;  %v706_v0 = vmul.f32 1.442695, %v591_v34  ;;  %1559 = vrcp.f32 %v740_v14 }
 0x256   :  { %v743_v17 = vpop.xlane.xlu1 %742  ;;  %v524_v5 = vpop.xlane.xlu0 %523 }
 0x257   :  { %1561 = vpow2.f32 %v704_v28  ;;  %v592_v50 = vsub.f32 %v1975_v27, %v524_v5  ;;  %v593_v47 = vsub.f32 %v1979_v10, %v524_v5 }
 0x258   :  { %1563 = vpow2.f32 %v706_v0  ;;  %v1552_v55 = vpop.eup %1551 }
 0x259   :  { %1565 = vrcp.f32 %v743_v17  ;;  %v708_v21 = vmul.f32 1.442695, %v592_v50  ;;  %v710_v54 = vmul.f32 1.442695, %v593_v47  ;;  %v861_v27 = vmul.f32 %v1552_v55, %v1991_v59 }
 0x25a   :  { %v746_v52 = vpop.xlane.xlu0 %745  ;;  %v527_v45 = vpop.xlane.xlu1 %526  ;;  %v860_v41 = vmul.f32 %v1552_v55, %v1989_v53 }
 0x25b   :  { %1567 = vpow2.f32 %v708_v21  ;;  %v594_v37 = vsub.f32 %v1983_v35, %v527_v45  ;;  %v595_v34 = vsub.f32 %v1987_v19, %v527_v45 }
 0x25c   :  { %v1554_v15 = vpop.eup %1553  ;;  %1569 = vpow2.f32 %v710_v54 }
 0x25d   :  { %v712_v12 = vmul.f32 1.442695, %v594_v37  ;;  %v714_v14 = vmul.f32 1.442695, %v595_v34  ;;  %v863_v10 = vmul.f32 %v1554_v15, %v2001_v29  ;;  %1571 = vrcp.f32 %v746_v52 }
 0x25e   :  { %v749_v0 = vpop.xlane.xlu1 %748  ;;  %v530_v5 = vpop.xlane.xlu0 %529  ;;  %v862_v24 = vmul.f32 %v1554_v15, %v1999_v63 }
 0x25f   :  { %1573 = vpow2.f32 %v712_v12  ;;  %v596_v35 = vsub.f32 %v1997_v42, %v530_v5  ;;  %v597_v19 = vsub.f32 %v2009_v18, %v530_v5  ;;  %v925_v28 = vpack.c.bf16 %v863_v10, %v861_v27 }
 0x260   :  { %v2217_v17 = vpop.eup %1555  ;;  %1575 = vpow2.f32 %v714_v14  ;;  %v924_v50 = vpack.c.bf16 %v862_v24, %v860_v41  ;;  %v2561_v41 = vld [vmem:[#allocation40_spill] sm:$0xff] }
 0x261   :  { %v2219_v59 = vpop.eup %1557  ;;  %1577 = vrcp.f32 %v749_v0  ;;  %v716_v29 = vmul.f32 1.442695, %v596_v35  ;;  %v718_v47 = vmul.f32 1.442695, %v597_v19  ;;  %988 = vmatprep.mubr.bf16.mxu1 %v925_v28 }
 0x262   :  { %989 = vmatmul.mubr.bf16.vlgmr.msra.gmra.mxu1 %v924_v50  ;;  %v752_v53 = vpop.xlane.xlu0 %751  ;;  %v533_v21 = vpop.xlane.xlu1 %532  ;;  %v804_v63 = vadd.f32 %v2219_v59, %v2217_v17 }
 0x263   :  { %v1560_v42 = vpop.eup %1559  ;;  %1579 = vpow2.f32 %v716_v29  ;;  %v598_v18 = vsub.f32 %v2021_v32, %v533_v21  ;;  %v599_v54 = vsub.f32 %v2033_v43, %v533_v21 }
 0x264   :  { %v2225_v55 = vpop.eup %1561  ;;  %1581 = vpow2.f32 %v718_v47  ;;  %805 = vadd.xlane.f32.xlu0 %v804_v63  ;;  %v865_v27 = vmul.f32 %v1560_v42, %v2013_v56  ;;  %v864_v5 = vmul.f32 %v1560_v42, %v2011_v51 }
 0x265   :  { %v2227_v52 = vpop.eup %1563  ;;  %v720_v45 = vmul.f32 1.442695, %v598_v18  ;;  %v722_v37 = vmul.f32 1.442695, %v599_v54  ;;  %1583 = vrcp.f32 %v752_v53 }
 0x266   :  { %v1566_v34 = vpop.eup %1565  ;;  %v755_v15 = vpop.xlane.xlu1 %754  ;;  %v807_v14 = vadd.f32 %v2227_v52, %v2225_v55 }
 0x267   :  { %v536_v12 = vpop.xlane.xlu0 %535  ;;  %1585 = vpow2.f32 %v720_v45  ;;  %v867_v10 = vmul.f32 %v1566_v34, %v2025_v30  ;;  %v866_v24 = vmul.f32 %v1566_v34, %v2561_v41 }
 0x268   :  { %v600_v32 = vsub.f32 %v2045_v2, %v536_v12  ;;  %v601_v43 = vsub.f32 %v2057_v61, %v536_v12  ;;  %v2235_v0 = vpop.eup %1567  ;;  %1587 = vpow2.f32 %v722_v37  ;;  %808 = vadd.xlane.f32.xlu1 %v807_v14 }
 0x269   :  { %v2239_v35 = vpop.eup %1569  ;;  %1589 = vrcp.f32 %v755_v15  ;;  %v927_v28 = vpack.c.bf16 %v867_v10, %v865_v27  ;;  %v926_v50 = vpack.c.bf16 %v866_v24, %v864_v5  ;;  %v2563_v15 = vld [vmem:[#allocation42_spill] sm:$0xff] }
 0x26a   :  { %v724_v19 = vmul.f32 1.442695, %v600_v32  ;;  %v726_v56 = vmul.f32 1.442695, %v601_v43  ;;  %v539_v2 = vpop.xlane.xlu1 %538  ;;  %v810_v61 = vadd.f32 %v2239_v35, %v2235_v0  ;;  %v1572_v30 = vpop.eup %1571 }
 0x26b   :  { %996 = vmatprep.mubr.bf16.mxu1 %v927_v28  ;;  %v758_v29 = vpop.xlane.xlu0 %757  ;;  %v602_v47 = vsub.f32 %v2067_v39, %v539_v2  ;;  %v603_v51 = vsub.f32 %v2079_v49, %v539_v2  ;;  %v869_v37 = vmul.f32 %v1572_v30, %v2037_v40  ;;  %v2562_v49 = vld [vmem:[#allocation41_spill] sm:$0xff]  ;;  %v2564_v2 = vld [vmem:[#allocation43_spill] sm:$0xff] }
 0x26c   :  { %1591 = vpow2.f32 %v724_v19  ;;  %v2245_v53 = vpop.eup %1573  ;;  %997 = vmatmul.mubr.bf16.gmra.mxu1 %v926_v50  ;;  %811 = vadd.xlane.f32.xlu0 %v810_v61  ;;  %v868_v34 = vmul.f32 %v1572_v30, %v2562_v49  ;;  %v2565_v30 = vld [vmem:[#allocation44_spill] sm:$0xff] }
 0x26d   :  { %1593 = vpow2.f32 %v726_v56  ;;  %v2247_v21 = vpop.eup %1575  ;;  %v728_v63 = vmul.f32 1.442695, %v602_v47  ;;  %v730_v42 = vmul.f32 1.442695, %v603_v51 }
 0x26e   :  { %v1578_v18 = vpop.eup %1577  ;;  %1595 = vrcp.f32 %v758_v29  ;;  %v761_v54 = vpop.xlane.xlu1 %760  ;;  %v813_v45 = vadd.f32 %v2247_v21, %v2245_v53 }
 0x26f   :  { %1597 = vpow2.f32 %v728_v63  ;;  %v871_v39 = vmul.f32 %v1578_v18, %v2049_v4  ;;  %v870_v12 = vmul.f32 %v1578_v18, %v2563_v15 }
 0x270   :  { %v2255_v14 = vpop.eup %1579  ;;  %1599 = vpow2.f32 %v730_v42  ;;  %814 = vadd.xlane.f32.xlu1 %v813_v45 }
 0x271   :  { %v2257_v27 = vpop.eup %1581  ;;  %1601 = vrcp.f32 %v761_v54  ;;  %v929_v32 = vpack.c.bf16 %v871_v39, %v869_v37  ;;  %v928_v43 = vpack.c.bf16 %v870_v12, %v868_v34  ;;  %v2566_v12 = vld [vmem:[#allocation45_spill] sm:$0xff] }
 0x272   :  { %v764_v10 = vpop.xlane.xlu0 %763  ;;  %v816_v40 = vadd.f32 %v2257_v27, %v2255_v14  ;;  %v1584_v5 = vpop.eup %1583 }
 0x273   :  { %1004 = vmatprep.mubr.bf16.mxu1 %v929_v32  ;;  %1603 = vrcp.f32 %v764_v10  ;;  %v873_v28 = vmul.f32 %v1584_v5, %v2061_v9  ;;  %v872_v61 = vmul.f32 %v1584_v5, %v2564_v2 }
 0x274   :  { %v2261_v4 = vpop.eup %1585  ;;  %1005 = vmatmul.mubr.bf16.gmra.mxu1 %v928_v43  ;;  %817 = vadd.xlane.f32.xlu0 %v816_v40 }
 0x275   :  { %v2263_v41 = vpop.eup %1587 }
 0x276   :  { %v1590_v24 = vpop.eup %1589  ;;  %v767_v19 = vpop.xlane.xlu1 %766  ;;  %v819_v56 = vadd.f32 %v2263_v41, %v2261_v4 }
 0x277   :  { %1605 = vrcp.f32 %v767_v19  ;;  %v875_v50 = vmul.f32 %v1590_v24, %v2073_v58  ;;  %v874_v29 = vmul.f32 %v1590_v24, %v2565_v30 }
 0x278   :  { %820 = vadd.xlane.f32.xlu1 %v819_v56 }
 0x279   :  { %v2271_v47 = vpop.eup %1591  ;;  %v931_v63 = vpack.c.bf16 %v875_v50, %v873_v28  ;;  %v930_v42 = vpack.c.bf16 %v874_v29, %v872_v61 }
 0x27a   :  { %v2273_v51 = vpop.eup %1593  ;;  %v770_v18 = vpop.xlane.xlu0 %769 }
 0x27b   :  { %v822_v54 = vadd.f32 %v2273_v51, %v2271_v47  ;;  %v1596_v45 = vpop.eup %1595  ;;  %1012 = vmatprep.mubr.bf16.mxu1 %v931_v63  ;;  %1607 = vrcp.f32 %v770_v18 }
 0x27c   :  { %v2277_v9 = vpop.eup %1597  ;;  %1013 = vmatmul.mubr.bf16.gmra.mxu1 %v930_v42  ;;  %v877_v34 = vmul.f32 %v1596_v45, %v2085_v25  ;;  %v876_v32 = vmul.f32 %v1596_v45, %v2566_v12 }
 0x27d   :  { %823 = vadd.xlane.f32.xlu0 %v822_v54  ;;  %v2279_v58 = vpop.eup %1599 }
 0x27e   :  { %v1602_v37 = vpop.eup %1601  ;;  %v773_v39 = vpop.xlane.xlu1 %772  ;;  %v825_v49 = vadd.f32 %v2279_v58, %v2277_v9 }
 0x27f   :  { %1609 = vrcp.f32 %v773_v39  ;;  %v879_v15 = vmul.f32 %v1602_v37, %v2095_v46  ;;  %v878_v43 = vmul.f32 %v1602_v37, %v2093_v7 }
 0x280   :  { %826 = vadd.xlane.f32.xlu1 %v825_v49  ;;  %v1604_v5 = vpop.eup %1603 }
 0x281   :  { %v933_v10 = vpack.c.bf16 %v879_v15, %v877_v34  ;;  %v932_v40 = vpack.c.bf16 %v878_v43, %v876_v32  ;;  %v881_v56 = vmul.f32 %v1604_v5, %v2103_v22  ;;  %v880_v50 = vmul.f32 %v1604_v5, %v2101_v48 }
 0x282   :  { %v776_v24 = vpop.xlane.xlu0 %775 }
 0x283   :  { %1020 = vmatprep.mubr.bf16.mxu1 %v933_v10  ;;  %1611 = vrcp.f32 %v776_v24 }
 0x284   :  { %v1606_v19 = vpop.eup %1605  ;;  %1021 = vmatmul.mubr.bf16.gmra.mxu1 %v932_v40 }
 0x285   :  { %v883_v25 = vmul.f32 %v1606_v19, %v2111_v38  ;;  %v882_v28 = vmul.f32 %v1606_v19, %v2109_v44 }
 0x286   :  { %v779_v46 = vpop.xlane.xlu1 %778 }
 0x287   :  { %1613 = vrcp.f32 %v779_v46  ;;  %v935_v7 = vpack.c.bf16 %v883_v25, %v881_v56  ;;  %v934_v2 = vpack.c.bf16 %v882_v28, %v880_v50 }
 0x288   :  { %v1608_v61 = vpop.eup %1607 }
 0x289   :  { %1028 = vmatprep.mubr.bf16.mxu1 %v935_v7  ;;  %v885_v63 = vmul.f32 %v1608_v61, %v2119_v33  ;;  %v884_v44 = vmul.f32 %v1608_v61, %v2117_v36  ;;  %v2567_v7 = vld [vmem:[#allocation47_spill] sm:$0xff]  ;;  %v2568_v61 = vld [vmem:[#allocation49_spill] sm:$0xff] }
 0x28a   :  { %v782_v30 = vpop.xlane.xlu0 %781 }
 0x28b   :  { %1615 = vrcp.f32 %v782_v30 }
 0x28c   :  { %v1610_v29 = vpop.eup %1609  ;;  %1029 = vmatmul.mubr.bf16.gmra.mxu1 %v934_v2 }
 0x28d   :  { %v887_v22 = vmul.f32 %v1610_v29, %v2127_v26  ;;  %v886_v38 = vmul.f32 %v1610_v29, %v2125_v31  ;;  %v2569_v29 = vld [vmem:[#allocation48_spill] sm:$0xff] }
 0x28e   :  { %v785_v42 = vpop.xlane.xlu1 %784 }
 0x28f   :  { %1617 = vrcp.f32 %v785_v42  ;;  %v937_v48 = vpack.c.bf16 %v887_v22, %v885_v63  ;;  %v936_v18 = vpack.c.bf16 %v886_v38, %v884_v44  ;;  %v2570_v63 = vld [vmem:[#allocation46_spill] sm:$0xff]  ;;  %v2571_v42 = vld [vmem:[#allocation51_spill] sm:$0xff] }
 0x290   :  { %v1612_v54 = vpop.eup %1611 }
 0x291   :  { %1036 = vmatprep.mubr.bf16.mxu1 %v937_v48  ;;  %v889_v39 = vmul.f32 %v1612_v54, %v2135_v20  ;;  %v888_v31 = vmul.f32 %v1612_v54, %v2133_v23  ;;  %v2572_v48 = vld [vmem:[#allocation53_spill] sm:$0xff]  ;;  %v2573_v54 = vld [vmem:[#allocation52_spill] sm:$0xff] }
 0x292   :  { %v788_v45 = vpop.xlane.xlu0 %787 }
 0x293   :  { %1619 = vrcp.f32 %v788_v45 }
 0x294   :  { %v1614_v37 = vpop.eup %1613  ;;  %1037 = vmatmul.mubr.bf16.gmra.mxu1 %v936_v18 }
 0x295   :  { %v891_v33 = vmul.f32 %v1614_v37, %v2143_v13  ;;  %v890_v26 = vmul.f32 %v1614_v37, %v2141_v16  ;;  %v2574_v37 = vld [vmem:[#allocation50_spill] sm:$0xff] }
 0x296   :  { %v791_v49 = vpop.xlane.xlu1 %790 }
 0x297   :  { %1621 = vrcp.f32 %v791_v49  ;;  %v939_v36 = vpack.c.bf16 %v891_v33, %v889_v39  ;;  %v938_v34 = vpack.c.bf16 %v890_v26, %v888_v31 }
 0x298   :  { %v1616_v15 = vpop.eup %1615 }
 0x299   :  { %1044 = vmatprep.mubr.bf16.mxu1 %v939_v36  ;;  %v893_v43 = vmul.f32 %v1616_v15, %v2151_v8  ;;  %v892_v16 = vmul.f32 %v1616_v15, %v2149_v11 }
 0x29a   :  { %v794_v12 = vpop.xlane.xlu0 %793 }
 0x29b   :  { %1623 = vrcp.f32 %v794_v12 }
 0x29c   :  { %v1618_v32 = vpop.eup %1617  ;;  %1045 = vmatmul.mubr.bf16.gmra.mxu1 %v938_v34 }
 0x29d   :  { %v895_v20 = vmul.f32 %v1618_v32, %v2159_v3  ;;  %v894_v13 = vmul.f32 %v1618_v32, %v2157_v6 }
 0x29e   :  { %v797_v10 = vpop.xlane.xlu1 %796 }
 0x29f   :  { %1625 = vrcp.f32 %v797_v10  ;;  %v941_v23 = vpack.c.bf16 %v895_v20, %v893_v43  ;;  %v940_v40 = vpack.c.bf16 %v894_v13, %v892_v16 }
 0x2a0   :  { %v1620_v5 = vpop.eup %1619 }
 0x2a1   :  { %1052 = vmatprep.mubr.bf16.mxu1 %v941_v23  ;;  %v897_v56 = vmul.f32 %v1620_v5, %v2167_v62  ;;  %v896_v6 = vmul.f32 %v1620_v5, %v2165_v1 }
 0x2a2   :  { %v800_v24 = vpop.xlane.xlu0 %799 }
 0x2a3   :  { %1627 = vrcp.f32 %v800_v24 }
 0x2a4   :  { %v1622_v19 = vpop.eup %1621  ;;  %1053 = vmatmul.mubr.bf16.gmra.mxu1 %v940_v40 }
 0x2a5   :  { %v899_v8 = vmul.f32 %v1622_v19, %v2175_v57  ;;  %v898_v3 = vmul.f32 %v1622_v19, %v2173_v60 }
 0x2a6   :  { %v803_v25 = vpop.xlane.xlu1 %802 }
 0x2a7   :  { %1629 = vrcp.f32 %v803_v25  ;;  %v943_v11 = vpack.c.bf16 %v899_v8, %v897_v56  ;;  %v942_v28 = vpack.c.bf16 %v898_v3, %v896_v6 }
 0x2a8   :  { %v1624_v46 = vpop.eup %1623 }
 0x2a9   :  { %1060 = vmatprep.mubr.bf16.mxu1 %v943_v11  ;;  %v901_v2 = vmul.f32 %v1624_v46, %v2567_v7  ;;  %v900_v57 = vmul.f32 %v1624_v46, %v2570_v63  ;;  %v2575_v63 = vld [vmem:[#allocation8_spill] sm:$0xff] }
 0x2ac   :  { %v1626_v50 = vpop.eup %1625  ;;  %1061 = vmatmul.mubr.bf16.gmra.mxu1 %v942_v28 }
 0x2ad   :  { %v903_v30 = vmul.f32 %v1626_v50, %v2568_v61  ;;  %v902_v62 = vmul.f32 %v1626_v50, %v2569_v29 }
 0x2af   :  { %v945_v22 = vpack.c.bf16 %v903_v30, %v901_v2  ;;  %v944_v60 = vpack.c.bf16 %v902_v62, %v900_v57 }
 0x2b0   :  { %v1628_v38 = vpop.eup %1627 }
 0x2b1   :  { %1068 = vmatprep.mubr.bf16.mxu1 %v945_v22  ;;  %v905_v44 = vmul.f32 %v1628_v38, %v2571_v42  ;;  %v904_v39 = vmul.f32 %v1628_v38, %v2574_v37  ;;  %v2578_v37 = vld [vmem:[#allocation11_spill] sm:$0xff] }
 0x2b4   :  { %v1630_v1 = vpop.eup %1629  ;;  %1069 = vmatmul.mubr.bf16.gmra.mxu1 %v944_v60 }
 0x2b5   :  { %v907_v18 = vmul.f32 %v1630_v1, %v2572_v48  ;;  %v906_v45 = vmul.f32 %v1630_v1, %v2573_v54 }
 0x2b7   :  { %v947_v33 = vpack.c.bf16 %v907_v18, %v905_v44  ;;  %v946_v26 = vpack.c.bf16 %v906_v45, %v904_v39  ;;  %v2577_v44 = vld [vmem:[#allocation10_spill] sm:$0xff] }
 0x2b9   :  { %1076 = vmatprep.mubr.bf16.mxu1 %v947_v33 }
 0x2bc   :  { %1077 = vmatmul.mubr.bf16.gmra.mxu1 %v946_v26 }
 0x2ed   :  { %v806_v49 = vpop.xlane.xlu0 %805 }
 0x2ee   :  { %1631 = vrcp.f32 %v806_v49 }
 0x2f1   :  { %v809_v31 = vpop.xlane.xlu1 %808 }
 0x2f2   :  { %1633 = vrcp.f32 %v809_v31  ;;  %v2579_v31 = vld [vmem:[#allocation12_spill] sm:$0xff] }
 0x2f5   :  { %v812_v36 = vpop.xlane.xlu0 %811 }
 0x2f6   :  { %1635 = vrcp.f32 %v812_v36 }
 0x2f9   :  { %v815_v34 = vpop.xlane.xlu1 %814 }
 0x2fa   :  { %1637 = vrcp.f32 %v815_v34 }
 0x2fb   :  { %v1632_v15 = vpop.eup %1631 }
 0x2fc   :  { %v909_v43 = vmul.f32 %v1632_v15, %v2219_v59  ;;  %v908_v13 = vmul.f32 %v1632_v15, %v2217_v17 }
 0x2fd   :  { %v818_v12 = vpop.xlane.xlu0 %817 }
 0x2fe   :  { %1639 = vrcp.f32 %v818_v12 }
 0x2ff   :  { %v1634_v32 = vpop.eup %1633 }
 0x300   :  { %v911_v20 = vmul.f32 %v1634_v32, %v2227_v52  ;;  %v910_v10 = vmul.f32 %v1634_v32, %v2225_v55  ;;  %v2580_v32 = vld [vmem:[#allocation13_spill] sm:$0xff] }
 0x301   :  { %v821_v16 = vpop.xlane.xlu1 %820 }
 0x302   :  { %1641 = vrcp.f32 %v821_v16  ;;  %v949_v23 = vpack.c.bf16 %v911_v20, %v909_v43  ;;  %v948_v40 = vpack.c.bf16 %v910_v10, %v908_v13  ;;  %v2581_v16 = vld [vmem:[#allocation14_spill] sm:$0xff] }
 0x303   :  { %v1636_v5 = vpop.eup %1635 }
 0x304   :  { %1084 = vmatprep.mubr.bf16.mxu1 %v949_v23  ;;  %v913_v56 = vmul.f32 %v1636_v5, %v2239_v35  ;;  %v912_v52 = vmul.f32 %v1636_v5, %v2235_v0 }
 0x305   :  { %1085 = vmatmul.mubr.bf16.gmra.mxu1 %v948_v40 }
 0x306   :  { %v824_v24 = vpop.xlane.xlu0 %823 }
 0x307   :  { %v1638_v19 = vpop.eup %1637  ;;  %1643 = vrcp.f32 %v824_v24 }
 0x308   :  { %v915_v59 = vmul.f32 %v1638_v19, %v2247_v21  ;;  %v914_v17 = vmul.f32 %v1638_v19, %v2245_v53  ;;  %v2582_v19 = vld [vmem:[#allocation15_spill] sm:$0xff] }
 0x309   :  { %v827_v8 = vpop.xlane.xlu1 %826 }
 0x30a   :  { %1645 = vrcp.f32 %v827_v8  ;;  %v951_v55 = vpack.c.bf16 %v915_v59, %v913_v56  ;;  %v950_v3 = vpack.c.bf16 %v914_v17, %v912_v52  ;;  %v2583_v8 = vld [vmem:[#allocation16_spill] sm:$0xff] }
 0x30b   :  { %v1640_v25 = vpop.eup %1639 }
 0x30c   :  { %1092 = vmatprep.mubr.bf16.mxu1 %v951_v55  ;;  %v917_v11 = vmul.f32 %v1640_v25, %v2257_v27  ;;  %v916_v35 = vmul.f32 %v1640_v25, %v2255_v14 }
 0x30d   :  { %1093 = vmatmul.mubr.bf16.gmra.mxu1 %v950_v3 }
 0x30f   :  { %v1642_v6 = vpop.eup %1641 }
 0x310   :  { %v919_v28 = vmul.f32 %v1642_v6, %v2263_v41  ;;  %v918_v21 = vmul.f32 %v1642_v6, %v2261_v4 }
 0x312   :  { %v953_v46 = vpack.c.bf16 %v919_v28, %v917_v11  ;;  %v952_v0 = vpack.c.bf16 %v918_v21, %v916_v35  ;;  %v2584_v11 = vld [vmem:[#allocation17_spill] sm:$0xff] }
 0x314   :  { %1100 = vmatprep.mubr.bf16.mxu1 %v953_v46  ;;  %v1644_v53 = vpop.eup %1643 }
 0x315   :  { %1101 = vmatmul.mubr.bf16.gmra.mxu1 %v952_v0  ;;  %v921_v7 = vmul.f32 %v1644_v53, %v2273_v51  ;;  %v920_v61 = vmul.f32 %v1644_v53, %v2271_v47  ;;  %v1185_v51 = vld [vmem:[%s2465_s0] sm:$0xf]  ;;  %v2585_v0 = vld [vmem:[#allocation18_spill] sm:$0xff] }
 0x317   :  { %v1646_v50 = vpop.eup %1645 }
 0x318   :  { %v923_v2 = vmul.f32 %v1646_v50, %v2279_v58  ;;  %v922_v27 = vmul.f32 %v1646_v50, %v2277_v9  ;;  %v2576_v9 = vld [vmem:[#allocation9_spill] sm:$0xff] }
 0x31a   :  { %v955_v30 = vpack.c.bf16 %v923_v2, %v921_v7  ;;  %v954_v41 = vpack.c.bf16 %v922_v27, %v920_v61  ;;  %v2586_v61 = vld [vmem:[#allocation19_spill] sm:$0xff] }
 0x31c   :  { %1108 = vmatprep.mubr.bf16.mxu1 %v955_v30 }
 0x31d   :  { %1109 = vmatmul.mubr.bf16.gmra.mxu1 %v954_v41 }
 0x322   :  { %v1273_v14 = vpop.f32.mrf.mxu1 }
 0x324   :  { %v1274_v4 = vpop.f32.mrf.mxu1 }
 0x325   :  { %v1275_v29 = vadd.f32 %v1274_v4, %v1273_v14  ;;  %v2587_v4 = vld [vmem:[#allocation20_spill] sm:$0xff] }
 0x326   :  { %v1276_v62 = vpop.f32.mrf.mxu1 }
 0x327   :  { %v1117_v57 = vadd.f32 %v2575_v63, %v1275_v29 }
 0x328   :  { %v1277_v22 = vpop.f32.mrf.mxu1 }
 0x329   :  { %1149 = vst [vmem:[%s2468_s3] sm:$0xff] %v1117_v57  ;;  %v1278_v47 = vadd.f32 %v1277_v22, %v1276_v62 }
 0x32a   :  { %1186 = vst [vmem:[%s2468_s3] sm:$0xf] %v1185_v51  ;;  %v2588_v51 = vld [vmem:[#allocation21_spill] sm:$0xff] }
 0x32b   :  { %v1118_v58 = vadd.f32 %v2576_v9, %v1278_v47 }
 0x32c   :  { %v1279_v60 = vpop.f32.mrf.mxu1 }
 0x32d   :  { %1150 = vst [vmem:[%s2468_s3 + $0x8] sm:$0xff] %v1118_v58 }
 0x32e   :  { %v1280_v38 = vpop.f32.mrf.mxu1 }
 0x32f   :  { %v1281_v1 = vadd.f32 %v1280_v38, %v1279_v60  ;;  %v2589_v60 = vld [vmem:[#allocation22_spill] sm:$0xff] }
 0x330   :  { %v1282_v42 = vpop.f32.mrf.mxu1 }
 0x331   :  { %v1119_v48 = vadd.f32 %v2577_v44, %v1281_v1 }
 0x332   :  { %v1283_v18 = vpop.f32.mrf.mxu1 }
 0x333   :  { %1151 = vst [vmem:[%s2468_s3 + $0x10] sm:$0xff] %v1119_v48  ;;  %v1284_v54 = vadd.f32 %v1283_v18, %v1282_v42  ;;  %v2590_v48 = vld [vmem:[#allocation23_spill] sm:$0xff] }
 0x334   :  { %v1285_v45 = vpop.f32.mrf.mxu1 }
 0x335   :  { %v1120_v39 = vadd.f32 %v2578_v37, %v1284_v54 }
 0x336   :  { %v1286_v33 = vpop.f32.mrf.mxu1 }
 0x337   :  { %1152 = vst [vmem:[%s2468_s3 + $0x18] sm:$0xff] %v1120_v39  ;;  %v1287_v26 = vadd.f32 %v1286_v33, %v1285_v45  ;;  %v2591_v39 = vld [vmem:[#allocation24_spill] sm:$0xff] }
 0x338   :  { %v1288_v49 = vpop.f32.mrf.mxu1 }
 0x339   :  { %v1121_v36 = vadd.f32 %v2579_v31, %v1287_v26 }
 0x33a   :  { %v1289_v34 = vpop.f32.mrf.mxu1 }
 0x33b   :  { %1153 = vst [vmem:[%s2468_s3 + $0x20] sm:$0xff] %v1121_v36  ;;  %v1290_v15 = vadd.f32 %v1289_v34, %v1288_v49  ;;  %v2592_v36 = vld [vmem:[#allocation25_spill] sm:$0xff] }
 0x33c   :  { %v1291_v12 = vpop.f32.mrf.mxu1 }
 0x33d   :  { %v1122_v43 = vadd.f32 %v2580_v32, %v1290_v15 }
 0x33e   :  { %v1292_v20 = vpop.f32.mrf.mxu1 }
 0x33f   :  { %1154 = vst [vmem:[%s2468_s3 + $0x28] sm:$0xff] %v1122_v43  ;;  %v1293_v13 = vadd.f32 %v1292_v20, %v1291_v12  ;;  %v2593_v43 = vld [vmem:[#allocation26_spill] sm:$0xff] }
 0x340   :  { %v1294_v10 = vpop.f32.mrf.mxu1 }
 0x341   :  { %v1123_v23 = vadd.f32 %v2581_v16, %v1293_v13 }
 0x342   :  { %v1295_v40 = vpop.f32.mrf.mxu1 }
 0x343   :  { %1155 = vst [vmem:[%s2468_s3 + $0x30] sm:$0xff] %v1123_v23  ;;  %v1296_v5 = vadd.f32 %v1295_v40, %v1294_v10  ;;  %v2594_v23 = vld [vmem:[#allocation27_spill] sm:$0xff] }
 0x344   :  { %v1297_v24 = vpop.f32.mrf.mxu1 }
 0x345   :  { %v1124_v56 = vadd.f32 %v2582_v19, %v1296_v5 }
 0x346   :  { %v1298_v59 = vpop.f32.mrf.mxu1 }
 0x347   :  { %1156 = vst [vmem:[%s2468_s3 + $0x38] sm:$0xff] %v1124_v56  ;;  %v1299_v52 = vadd.f32 %v1298_v59, %v1297_v24  ;;  %v2595_v56 = vld [vmem:[#allocation28_spill] sm:$0xff] }
 0x348   :  { %v1300_v17 = vpop.f32.mrf.mxu1 }
 0x349   :  { %v1125_v55 = vadd.f32 %v2583_v8, %v1299_v52 }
 0x34a   :  { %v1301_v3 = vpop.f32.mrf.mxu1 }
 0x34b   :  { %1157 = vst [vmem:[%s2468_s3 + $0x40] sm:$0xff] %v1125_v55  ;;  %v1302_v25 = vadd.f32 %v1301_v3, %v1300_v17  ;;  %v2596_v55 = vld [vmem:[#allocation29_spill] sm:$0xff] }
 0x34c   :  { %v1303_v6 = vpop.f32.mrf.mxu1 }
 0x34d   :  { %v1126_v28 = vadd.f32 %v2584_v11, %v1302_v25 }
 0x34e   :  { %v1304_v35 = vpop.f32.mrf.mxu1 }
 0x34f   :  { %1158 = vst [vmem:[%s2468_s3 + $0x48] sm:$0xff] %v1126_v28  ;;  %v1305_v21 = vadd.f32 %v1304_v35, %v1303_v6  ;;  %v2597_v28 = vld [vmem:[#allocation30_spill] sm:$0xff] }
 0x350   :  { %v1306_v46 = vpop.f32.mrf.mxu1 }
 0x351   :  { %v1127_v53 = vadd.f32 %v2585_v0, %v1305_v21  ;;  %v2598_v0 = vld [vmem:[#allocation31_spill] sm:$0xff] }
 0x352   :  { %v1307_v50 = vpop.f32.mrf.mxu1 }
 0x353   :  { %1159 = vst [vmem:[%s2468_s3 + $0x50] sm:$0xff] %v1127_v53  ;;  %v1308_v7 = vadd.f32 %v1307_v50, %v1306_v46 }
 0x354   :  { %v1309_v2 = vpop.f32.mrf.mxu1 }
 0x355   :  { %v1128_v27 = vadd.f32 %v2586_v61, %v1308_v7 }
 0x356   :  { %v1310_v30 = vpop.f32.mrf.mxu1 }
 0x357   :  { %1160 = vst [vmem:[%s2468_s3 + $0x58] sm:$0xff] %v1128_v27  ;;  %v1311_v41 = vadd.f32 %v1310_v30, %v1309_v2  ;;  %v2599_v27 = vld [vmem:[#allocation32_spill] sm:$0xff] }
 0x358   :  { %v1312_v14 = vpop.f32.mrf.mxu1 }
 0x359   :  { %v1129_v29 = vadd.f32 %v2587_v4, %v1311_v41 }
 0x35a   :  { %v1313_v62 = vpop.f32.mrf.mxu1 }
 0x35b   :  { %1161 = vst [vmem:[%s2468_s3 + $0x60] sm:$0xff] %v1129_v29  ;;  %v1314_v63 = vadd.f32 %v1313_v62, %v1312_v14  ;;  %v2600_v29 = vld [vmem:[#allocation33_spill] sm:$0xff] }
 0x35c   :  { %v1315_v57 = vpop.f32.mrf.mxu1 }
 0x35d   :  { %v1130_v22 = vadd.f32 %v2588_v51, %v1314_v63 }
 0x35e   :  { %v1316_v47 = vpop.f32.mrf.mxu1 }
 0x35f   :  { %1162 = vst [vmem:[%s2468_s3 + $0x68] sm:$0xff] %v1130_v22  ;;  %v1317_v9 = vadd.f32 %v1316_v47, %v1315_v57  ;;  %v2601_v22 = vld [vmem:[#allocation34_spill] sm:$0xff] }
 0x360   :  { %v1318_v58 = vpop.f32.mrf.mxu1 }
 0x361   :  { %v1131_v38 = vadd.f32 %v2589_v60, %v1317_v9 }
 0x362   :  { %v1319_v1 = vpop.f32.mrf.mxu1 }
 0x363   :  { %1163 = vst [vmem:[%s2468_s3 + $0x70] sm:$0xff] %v1131_v38  ;;  %v1320_v42 = vadd.f32 %v1319_v1, %v1318_v58  ;;  %v2602_v38 = vld [vmem:[#allocation35_spill] sm:$0xff] }
 0x364   :  { %v1321_v44 = vpop.f32.mrf.mxu1 }
 0x365   :  { %v1132_v18 = vadd.f32 %v2590_v48, %v1320_v42 }
 0x366   :  { %v1322_v54 = vpop.f32.mrf.mxu1 }
 0x367   :  { %1164 = vst [vmem:[%s2468_s3 + $0x78] sm:$0xff] %v1132_v18  ;;  %v1323_v45 = vadd.f32 %v1322_v54, %v1321_v44  ;;  %v2603_v18 = vld [vmem:[#allocation36_spill] sm:$0xff] }
 0x368   :  { %v1324_v37 = vpop.f32.mrf.mxu1 }
 0x369   :  { %v1133_v33 = vadd.f32 %v2591_v39, %v1323_v45 }
 0x36a   :  { %v1325_v26 = vpop.f32.mrf.mxu1 }
 0x36b   :  { %1165 = vst [vmem:[%s2468_s3 + $0x80] sm:$0xff] %v1133_v33  ;;  %v1326_v49 = vadd.f32 %v1325_v26, %v1324_v37  ;;  %v2604_v33 = vld [vmem:[#allocation37_spill] sm:$0xff] }
 0x36c   :  { %v1327_v31 = vpop.f32.mrf.mxu1 }
 0x36d   :  { %v1134_v34 = vadd.f32 %v2592_v36, %v1326_v49 }
 0x36e   :  { %v1328_v15 = vpop.f32.mrf.mxu1 }
 0x36f   :  { %1166 = vst [vmem:[%s2468_s3 + $0x88] sm:$0xff] %v1134_v34  ;;  %v1329_v12 = vadd.f32 %v1328_v15, %v1327_v31  ;;  %v2605_v34 = vld [vmem:[#allocation38_spill] sm:$0xff] }
 0x370   :  { %v1330_v32 = vpop.f32.mrf.mxu1 }
 0x371   :  { %v1135_v20 = vadd.f32 %v2593_v43, %v1329_v12  ;;  %v2606_v43 = vld [vmem:[#allocation39_spill] sm:$0xff] }
 0x372   :  { %v1331_v13 = vpop.f32.mrf.mxu1 }
 0x373   :  { %1167 = vst [vmem:[%s2468_s3 + $0x90] sm:$0xff] %v1135_v20  ;;  %v1332_v10 = vadd.f32 %v1331_v13, %v1330_v32 }
 0x374   :  { %v1333_v16 = vpop.f32.mrf.mxu1 }
 0x375   :  { %v1136_v40 = vadd.f32 %v2594_v23, %v1332_v10 }
 0x376   :  { %v1334_v5 = vpop.f32.mrf.mxu1 }
 0x377   :  { %1168 = vst [vmem:[%s2468_s3 + $0x98] sm:$0xff] %v1136_v40  ;;  %v1335_v24 = vadd.f32 %v1334_v5, %v1333_v16 }
 0x378   :  { %v1336_v19 = vpop.f32.mrf.mxu1 }
 0x379   :  { %v1137_v59 = vadd.f32 %v2595_v56, %v1335_v24 }
 0x37a   :  { %v1337_v52 = vpop.f32.mrf.mxu1 }
 0x37b   :  { %1169 = vst [vmem:[%s2468_s3 + $0xa0] sm:$0xff] %v1137_v59  ;;  %v1338_v17 = vadd.f32 %v1337_v52, %v1336_v19 }
 0x37c   :  { %v1339_v8 = vpop.f32.mrf.mxu1 }
 0x37d   :  { %v1138_v3 = vadd.f32 %v2596_v55, %v1338_v17 }
 0x37e   :  { %v1340_v25 = vpop.f32.mrf.mxu1 }
 0x37f   :  { %1170 = vst [vmem:[%s2468_s3 + $0xa8] sm:$0xff] %v1138_v3  ;;  %v1341_v6 = vadd.f32 %v1340_v25, %v1339_v8 }
 0x380   :  { %v1342_v11 = vpop.f32.mrf.mxu1 }
 0x381   :  { %v1139_v35 = vadd.f32 %v2597_v28, %v1341_v6 }
 0x382   :  { %v1343_v21 = vpop.f32.mrf.mxu1 }
 0x383   :  { %1171 = vst [vmem:[%s2468_s3 + $0xb0] sm:$0xff] %v1139_v35  ;;  %v1344_v46 = vadd.f32 %v1343_v21, %v1342_v11 }
 0x385   :  { %v1140_v53 = vadd.f32 %v2598_v0, %v1344_v46 }
 0x387   :  { %1172 = vst [vmem:[%s2468_s3 + $0xb8] sm:$0xff] %v1140_v53 }
 0x3c5   :  { %v1345_v50 = vpop.f32.mrf.mxu1 }
 0x3c7   :  { %v1346_v7 = vpop.f32.mrf.mxu1 }
 0x3c8   :  { %v1347_v2 = vadd.f32 %v1346_v7, %v1345_v50 }
 0x3c9   :  { %v1348_v61 = vpop.f32.mrf.mxu1 }
 0x3ca   :  { %v1141_v30 = vadd.f32 %v2599_v27, %v1347_v2 }
 0x3cb   :  { %v1349_v41 = vpop.f32.mrf.mxu1 }
 0x3cc   :  { %1173 = vst [vmem:[%s2468_s3 + $0xc0] sm:$0xff] %v1141_v30  ;;  %v1350_v14 = vadd.f32 %v1349_v41, %v1348_v61 }
 0x3cd   :  { %v1351_v4 = vpop.f32.mrf.mxu1 }
 0x3ce   :  { %v1142_v62 = vadd.f32 %v2600_v29, %v1350_v14 }
 0x3cf   :  { %v1352_v63 = vpop.f32.mrf.mxu1 }
 0x3d0   :  { %1174 = vst [vmem:[%s2468_s3 + $0xc8] sm:$0xff] %v1142_v62  ;;  %v1353_v57 = vadd.f32 %v1352_v63, %v1351_v4 }
 0x3d1   :  { %v1354_v51 = vpop.f32.mrf.mxu1 }
 0x3d2   :  { %v1143_v47 = vadd.f32 %v2601_v22, %v1353_v57 }
 0x3d3   :  { %v1355_v9 = vpop.f32.mrf.mxu1 }
 0x3d4   :  { %1175 = vst [vmem:[%s2468_s3 + $0xd0] sm:$0xff] %v1143_v47  ;;  %v1356_v58 = vadd.f32 %v1355_v9, %v1354_v51 }
 0x3d5   :  { %v1357_v60 = vpop.f32.mrf.mxu1 }
 0x3d6   :  { %v1144_v1 = vadd.f32 %v2602_v38, %v1356_v58 }
 0x3d7   :  { %v1358_v42 = vpop.f32.mrf.mxu1 }
 0x3d8   :  { %1176 = vst [vmem:[%s2468_s3 + $0xd8] sm:$0xff] %v1144_v1  ;;  %v1359_v44 = vadd.f32 %v1358_v42, %v1357_v60 }
 0x3d9   :  { %v1360_v48 = vpop.f32.mrf.mxu1 }
 0x3da   :  { %v1145_v54 = vadd.f32 %v2603_v18, %v1359_v44 }
 0x3db   :  { %v1361_v45 = vpop.f32.mrf.mxu1 }
 0x3dc   :  { %1177 = vst [vmem:[%s2468_s3 + $0xe0] sm:$0xff] %v1145_v54  ;;  %v1362_v37 = vadd.f32 %v1361_v45, %v1360_v48 }
 0x3dd   :  { %v1363_v39 = vpop.f32.mrf.mxu1 }
 0x3de   :  { %v1146_v26 = vadd.f32 %v2604_v33, %v1362_v37 }
 0x3df   :  { %v1364_v49 = vpop.f32.mrf.mxu1 }
 0x3e0   :  { %1178 = vst [vmem:[%s2468_s3 + $0xe8] sm:$0xff] %v1146_v26  ;;  %v1365_v31 = vadd.f32 %v1364_v49, %v1363_v39 }
 0x3e1   :  { %v1366_v36 = vpop.f32.mrf.mxu1 }
 0x3e2   :  { %v1147_v15 = vadd.f32 %v2605_v34, %v1365_v31 }
 0x3e3   :  { %v1367_v12 = vpop.f32.mrf.mxu1 }
 0x3e4   :  { %1179 = vst [vmem:[%s2468_s3 + $0xf0] sm:$0xff] %v1147_v15  ;;  %v1368_v32 = vadd.f32 %v1367_v12, %v1366_v36 }
 0x3e6   :  { %v1148_v20 = vadd.f32 %v2606_v43, %v1368_v32 }
 0x3e8   :  { %1180 = vst [vmem:[%s2468_s3 + $0xf8] sm:$0xff] %v1148_v20 }
 0x3e9   :  { %1191 = vsyncpa [#allocation3], 1 }
 0x3ea   :  { %1192 = vsyncpa [#allocation5], 1 }

</bundles_post_ra>
